<compile_context>
chip_gen: v7x
topology: tpu7x:2x2x1
jax: 0.10.0
libtpu: 0.0.40
codegen_flags: <defaults>
</compile_context>

<pallas_src>
import functools

import jax
import jax.numpy as jnp
from jax.experimental import pallas as pl
from jax.experimental.pallas import tpu as pltpu


def _round_up(x, m):
    return (x + m - 1) // m * m


def _conv_tap_stats_kernel(xa_ref, xb_ref, w_ref, mask_ref,
                           y_ref, sum_ref, sqsum_ref, xs_ref, *, taps, tm):
    # Stage the current M-tile plus its halo contiguously in VMEM.  The scratch is fp32
    # so the unaligned per-tap row slices below are plain 32-bit sublane loads.
    xs_ref[0:tm, :] = xa_ref[...].astype(jnp.float32)
    xs_ref[tm:, :] = xb_ref[...].astype(jnp.float32)

    # Tap accumulation: each tap is a shifted contiguous row window of the staged block.
    acc = jnp.zeros((tm, w_ref.shape[-1]), jnp.float32)
    for t in range(len(taps)):
        off = taps[t]
        a = xs_ref[off:off + tm, :].astype(jnp.bfloat16)
        acc = acc + jnp.dot(a, w_ref[t], preferred_element_type=jnp.float32)

    # Zero rows that are not real conv outputs (stride phase, width junk, tail padding)
    # so the batch statistics below stay exact (we divide by the true count).
    acc = acc * mask_ref[...]

    # Store conv result (bf16, only the true output columns) + per-tile BN partials.
    y_ref[...] = acc[:, :y_ref.shape[-1]].astype(y_ref.dtype)
    sum_ref[...] = jnp.sum(acc, axis=0, keepdims=True)[None]
    sqsum_ref[...] = jnp.sum(acc * acc, axis=0, keepdims=True)[None]


def _bn_relu_kernel(y_ref, scale_ref, bias_ref, o_ref, *, relu6):
    # Fused BN (scale/bias precomputed in the wrapper) + ReLU / ReLU6, fp32 math.
    out = y_ref[...].astype(jnp.float32) * scale_ref[...] + bias_ref[...]
    out = jnp.maximum(out, 0.0)
    if relu6:
        out = jnp.minimum(out, 6.0)
    o_ref[...] = out.astype(o_ref.dtype)


def conv_bn_relu_nhwc(x_nhwc, weight, gamma, beta, *, stride=1, padding=0,
                      dilation=1, groups=1, relu6=False, eps=1e-5, tm=512,
                      compute_dtype=jnp.bfloat16):
    """Forward of _ConvBNReLU on NHWC input. weight: (Cout, Cin, KH, KW)."""
    assert groups == 1  # TODO(synk): grouped convolution (groups > 1) not implemented
    N, H, W, Cin = x_nhwc.shape
    Cout, Cin_w, KH, KW = weight.shape
    assert Cin_w == Cin

    Hp, Wp = H + 2 * padding, W + 2 * padding
    OH = (Hp - dilation * (KH - 1) - 1) // stride + 1
    OW = (Wp - dilation * (KW - 1) - 1) // stride + 1

    Cin_p = _round_up(Cin, 8)
    Cmm = _round_up(Cout, 128)                 # matmul / stats width (MXU-friendly)
    if Cmm <= 256:
        tn = Cmm
    else:
        tn = 256 if Cmm % 256 == 0 else 128    # 256-wide tiles keep v6e/v7x MXU full
    nct = Cmm // tn
    Cy = Cout if nct == 1 else Cmm             # stored y width (true Cout when small)
    tny = Cy // nct

    # ---- glue: one bf16 pad of x + free reshapes.  NO im2col materialization. ----
    xpad = jnp.pad(x_nhwc.astype(compute_dtype),
                   ((0, 0), (padding, padding), (padding, padding), (0, Cin_p - Cin)))
    x_flat = xpad.reshape(N * Hp * Wp, Cin_p)

    # Flat row offset of each conv tap (stride-1 "wide" output formulation).
    taps = tuple(ki * dilation * Wp + kj * dilation
                 for ki in range(KH) for kj in range(KW))
    halo = taps[-1]

    M_wide = N * Hp * Wp
    tm = min(tm, _round_up(M_wide, 8))
    tm = max(tm, _round_up(halo, 8))
    Mp = _round_up(M_wide, tm)
    nm = Mp // tm

    # Halo tile: smallest (tm-dividing, 8-aligned) block >= halo -> x read ~(1 + th/tm)x.
    th = tm
    for d in (8, 4, 2):
        cand = tm // d
        if tm % d == 0 and cand % 8 == 0 and cand >= halo:
            th = cand
            break
    xb_step = tm // th

    # Pad flat rows so every [i*tm, i*tm + tm + th) window (and its taps) is in bounds;
    # zero rows contribute nothing to the matmul or the statistics.
    x_flat = jnp.pad(x_flat, ((0, Mp + tm - M_wide), (0, 0)))

    # weight (Cout, Cin, KH, KW) -> (KH*KW, Cin_p, Cmm), bf16, zero padded.
    w_t = jnp.transpose(weight, (2, 3, 1, 0)).reshape(KH * KW, Cin, Cout)
    w_p = jnp.pad(w_t, ((0, 0), (0, Cin_p - Cin), (0, Cmm - Cout))).astype(compute_dtype)

    # Row-validity mask over wide-output rows: keeps only real (strided) conv outputs.
    m_idx = jnp.arange(Mp, dtype=jnp.int32)
    rem = m_idx % (Hp * Wp)
    oh_r = rem // Wp
    ow_r = rem % Wp
    valid = ((oh_r % stride == 0) & (oh_r <= (OH - 1) * stride) &
             (ow_r % stride == 0) & (ow_r <= (OW - 1) * stride) &
             (m_idx < M_wide))
    mask = valid.astype(jnp.float32).reshape(Mp, 1)

    # Per-generation VMEM budget: 3/4 of physical, capped at 96 MiB.
    try:
        vmem_cap = pltpu.get_tpu_info().vmem_capacity_bytes
    except Exception:
        vmem_cap = 64 * 1024 * 1024
    vmem_limit = int(min(96 * 1024 * 1024, (vmem_cap * 3) // 4))

    # ---- pass 1: tap-accumulated conv matmul + per-tile partial BN statistics ----
    kernel1 = functools.partial(_conv_tap_stats_kernel, taps=taps, tm=tm)
    y, psum, psqsum = pl.pallas_call(
        kernel1,
        out_shape=(jax.ShapeDtypeStruct((Mp, Cy), compute_dtype),
                   jax.ShapeDtypeStruct((nm, 1, Cmm), jnp.float32),
                   jax.ShapeDtypeStruct((nm, 1, Cmm), jnp.float32)),
        grid_spec=pltpu.PrefetchScalarGridSpec(
            num_scalar_prefetch=0,
            grid=(nm, nct),
            in_specs=[
                pl.BlockSpec((tm, Cin_p), lambda i, j: (i, 0)),
                pl.BlockSpec((th, Cin_p), lambda i, j: ((i + 1) * xb_step, 0)),
                pl.BlockSpec((KH * KW, Cin_p, tn), lambda i, j: (0, 0, j)),
                pl.BlockSpec((tm, 1), lambda i, j: (i, 0)),
            ],
            out_specs=[
                pl.BlockSpec((tm, tny), lambda i, j: (i, j)),
                pl.BlockSpec((1, 1, tn), lambda i, j: (i, 0, j)),
                pl.BlockSpec((1, 1, tn), lambda i, j: (i, 0, j)),
            ],
            scratch_shapes=[pltpu.VMEM((tm + th, Cin_p), jnp.float32)],
        ),
        compiler_params=pltpu.CompilerParams(
            dimension_semantics=("parallel", "parallel"),
            vmem_limit_bytes=vmem_limit),
    )(x_flat, x_flat, w_p, mask)

    # ---- tiny BN fold (Cout-sized, plain JAX): scale/bias computed once ----
    inv_m = jnp.float32(1.0 / (N * OH * OW))          # reciprocal of TRUE element count
    s = jnp.sum(psum, axis=0)                         # (1, Cmm) tree-reduced partials
    sq = jnp.sum(psqsum, axis=0)                      # (1, Cmm)
    mean = s * inv_m
    # TODO(synk): switch to shifted/Welford merge if tighter fp32 accuracy is needed.
    var = jnp.maximum(sq * inv_m - mean * mean, 0.0)  # biased var, clamped >= 0
    gamma_p = jnp.pad(gamma.astype(jnp.float32), (0, Cmm - Cout)).reshape(1, Cmm)
    beta_p = jnp.pad(beta.astype(jnp.float32), (0, Cmm - Cout)).reshape(1, Cmm)
    scale = (gamma_p * jax.lax.rsqrt(var + jnp.float32(eps)))[:, :Cy]
    bias = (beta_p - mean * (gamma_p * jax.lax.rsqrt(var + jnp.float32(eps))))[:, :Cy]

    # ---- pass 2: fused normalize/affine/ReLU epilogue (decoupled, larger row tile) ----
    tm2 = tm
    for mult in (8, 4, 2):
        if nm % mult == 0 and tm * mult <= 4096:
            tm2 = tm * mult
            break

    out_dtype = x_nhwc.dtype
    out_wide = pl.pallas_call(
        functools.partial(_bn_relu_kernel, relu6=relu6),
        out_shape=jax.ShapeDtypeStruct((Mp, Cy), out_dtype),
        grid_spec=pltpu.PrefetchScalarGridSpec(
            num_scalar_prefetch=0,
            grid=(Mp // tm2,),
            in_specs=[pl.BlockSpec((tm2, Cy), lambda i: (i, 0)),
                      pl.BlockSpec((1, Cy), lambda i: (0, 0)),
                      pl.BlockSpec((1, Cy), lambda i: (0, 0))],
            out_specs=pl.BlockSpec((tm2, Cy), lambda i: (i, 0)),
        ),
        compiler_params=pltpu.CompilerParams(
            dimension_semantics=("parallel",),
            vmem_limit_bytes=vmem_limit),
    )(y, scale, bias)

    # Gather the real output rows/columns from the wide result.
    out = out_wide[:M_wide].reshape(N, Hp, Wp, Cy)
    out = out[:, 0:(OH - 1) * stride + 1:stride,
              0:(OW - 1) * stride + 1:stride, :Cout]
    return out                                        # (N, OH, OW, Cout) NHWC


def conv_bn_relu(x_nchw, weight, gamma, beta, **kwargs):
    """NCHW wrapper matching the PyTorch module interface."""
    x_nhwc = jnp.transpose(x_nchw, (0, 2, 3, 1))
    out = conv_bn_relu_nhwc(x_nhwc, weight, gamma, beta, **kwargs)
    return jnp.transpose(out, (0, 3, 1, 2))


def _reference(x, weight, gamma, beta, stride, padding, dilation, eps, relu6):
    y = jax.lax.conv_general_dilated(
        x, weight, window_strides=(stride, stride),
        padding=((padding, padding), (padding, padding)),
        rhs_dilation=(dilation, dilation),
        dimension_numbers=("NCHW", "OIHW", "NCHW"),
        precision=jax.lax.Precision.HIGHEST)
    mean = jnp.mean(y, axis=(0, 2, 3), keepdims=True)
    var = jnp.mean((y - mean) ** 2, axis=(0, 2, 3), keepdims=True)
    yhat = (y - mean) * jax.lax.rsqrt(var + eps)
    yhat = yhat * gamma.reshape(1, -1, 1, 1) + beta.reshape(1, -1, 1, 1)
    out = jnp.maximum(yhat, 0.0)
    if relu6:
        out = jnp.minimum(out, 6.0)
    return out


if __name__ == "__main__":
    key = jax.random.PRNGKey(0)
    k1, k2, k3, k4 = jax.random.split(key, 4)

    # module config: _ConvBNReLU(in_channels=4, out_channels=8, kernel_size=3,
    #                            stride=1, padding=1)  -> ReLU (relu6=False)
    N, Cin, H, W = 2, 4, 16, 16
    Cout, ksz = 8, 3
    stride, padding, dilation = 1, 1, 1
    eps = 1e-5

    x = jax.random.normal(k1, (N, Cin, H, W), jnp.float32)
    weight = 0.1 * jax.random.normal(k2, (Cout, Cin, ksz, ksz), jnp.float32)
    gamma = 1.0 + 0.1 * jax.random.normal(k3, (Cout,), jnp.float32)
    beta = 0.1 * jax.random.normal(k4, (Cout,), jnp.float32)

    out = conv_bn_relu(x, weight, gamma, beta, stride=stride, padding=padding,
                       dilation=dilation, relu6=False, eps=eps)
    out = jax.block_until_ready(out)

    ref = _reference(x, weight, gamma, beta, stride, padding, dilation, eps, False)
    assert out.shape == (N, Cout, H, W)
    max_err = float(jnp.max(jnp.abs(out - ref)))
    # bf16 MXU operands + bf16 y intermediate (fp32 accumulation / fp32 statistics)
    assert jnp.allclose(out, ref, atol=3e-2, rtol=3e-2), max_err
    print("KERNEL_OK")
</pallas_src>

<mosaic_0001>
module attributes {stable_mosaic.version = 11 : i64} {
  func.func @_conv_tap_stats_kernel(%arg0: i32, %arg1: i32, %arg2: memref<512x8xbf16, #tpu.memory_space<vmem>>, %arg3: memref<64x8xbf16, #tpu.memory_space<vmem>>, %arg4: memref<9x8x128xbf16, #tpu.memory_space<vmem>>, %arg5: memref<512x1xf32, #tpu.memory_space<vmem>>, %arg6: memref<512x8xbf16, #tpu.memory_space<vmem>>, %arg7: memref<1x1x128xf32, #tpu.memory_space<vmem>>, %arg8: memref<1x1x128xf32, #tpu.memory_space<vmem>>, %arg9: memref<576x8xf32, #tpu.memory_space<vmem>>) attributes {dimension_semantics = [#tpu.dimension_semantics<parallel>, #tpu.dimension_semantics<parallel>], iteration_bounds = array<i64: 2, 1>, scalar_prefetch = 0 : i64, scratch_operands = 1 : i64, tpu.core_type = #tpu.core_type<tc>, window_params = [{transform_indices = @transform_0, window_bounds = array<i64: 512, 8>}, {transform_indices = @transform_1, window_bounds = array<i64: 64, 8>}, {transform_indices = @transform_2, window_bounds = array<i64: 9, 8, 128>}, {transform_indices = @transform_3, window_bounds = array<i64: 512, 1>}, {transform_indices = @transform_4, window_bounds = array<i64: 512, 8>}, {transform_indices = @transform_5, window_bounds = array<i64: 1, 1, 128>}, {transform_indices = @transform_6, window_bounds = array<i64: 1, 1, 128>}]} {
    %c0 = arith.constant 0 : index
    %c0_0 = arith.constant 0 : index
    %0 = vector.load %arg2[%c0, %c0_0] : memref<512x8xbf16, #tpu.memory_space<vmem>>, vector<512x8xbf16>
    %1 = arith.extf %0 : vector<512x8xbf16> to vector<512x8xf32>
    %c0_1 = arith.constant 0 : index
    %c0_2 = arith.constant 0 : index
    %2 = vector.load %arg9[%c0_1, %c0_2] : memref<576x8xf32, #tpu.memory_space<vmem>>, vector<512x8xf32>
    tpu.vector_store %arg9[%c0_1, %c0_2], %1 {strides = array<i32>} : memref<576x8xf32, #tpu.memory_space<vmem>>, vector<512x8xf32>,
    %c0_3 = arith.constant 0 : index
    %c0_4 = arith.constant 0 : index
    %3 = vector.load %arg3[%c0_3, %c0_4] : memref<64x8xbf16, #tpu.memory_space<vmem>>, vector<64x8xbf16>
    %4 = arith.extf %3 : vector<64x8xbf16> to vector<64x8xf32>
    %c512 = arith.constant 512 : index
    %c0_5 = arith.constant 0 : index
    %5 = vector.load %arg9[%c512, %c0_5] : memref<576x8xf32, #tpu.memory_space<vmem>>, vector<64x8xf32>
    tpu.vector_store %arg9[%c512, %c0_5], %4 {strides = array<i32>} : memref<576x8xf32, #tpu.memory_space<vmem>>, vector<64x8xf32>,
    %cst = arith.constant 0.000000e+00 : f32
    %6 = vector.broadcast %cst : f32 to vector<512x128xf32>
    %c0_6 = arith.constant 0 : index
    %c0_7 = arith.constant 0 : index
    %7 = vector.load %arg9[%c0_6, %c0_7] : memref<576x8xf32, #tpu.memory_space<vmem>>, vector<512x8xf32>
    %8 = arith.truncf %7 : vector<512x8xf32> to vector<512x8xbf16>
    %c0_8 = arith.constant 0 : index
    %c0_9 = arith.constant 0 : index
    %c0_10 = arith.constant 0 : index
    %9 = vector.load %arg4[%c0_8, %c0_9, %c0_10] : memref<9x8x128xbf16, #tpu.memory_space<vmem>>, vector<1x8x128xbf16>
    %10 = vector.shape_cast %9 : vector<1x8x128xbf16> to vector<8x128xbf16>
    %cst_11 = arith.constant dense<0.000000e+00> : vector<512x128xf32>
    %11 = tpu.matmul %8, %10, %cst_11 {dimension_numbers = #tpu.dot_dimension_numbers<[1], [0], [0], [1], [0, 0, 1, 1], [], []>} : vector<512x8xbf16>, vector<8x128xbf16>, vector<512x128xf32> -> vector<512x128xf32>
    %12 = arith.addf %6, %11 : vector<512x128xf32>
    %c1 = arith.constant 1 : index
    %c0_12 = arith.constant 0 : index
    %13 = vector.load %arg9[%c1, %c0_12] : memref<576x8xf32, #tpu.memory_space<vmem>>, vector<512x8xf32>
    %14 = arith.truncf %13 : vector<512x8xf32> to vector<512x8xbf16>
    %c1_13 = arith.constant 1 : index
    %c0_14 = arith.constant 0 : index
    %c0_15 = arith.constant 0 : index
    %15 = vector.load %arg4[%c1_13, %c0_14, %c0_15] : memref<9x8x128xbf16, #tpu.memory_space<vmem>>, vector<1x8x128xbf16>
    %16 = vector.shape_cast %15 : vector<1x8x128xbf16> to vector<8x128xbf16>
    %cst_16 = arith.constant dense<0.000000e+00> : vector<512x128xf32>
    %17 = tpu.matmul %14, %16, %cst_16 {dimension_numbers = #tpu.dot_dimension_numbers<[1], [0], [0], [1], [0, 0, 1, 1], [], []>} : vector<512x8xbf16>, vector<8x128xbf16>, vector<512x128xf32> -> vector<512x128xf32>
    %18 = arith.addf %12, %17 : vector<512x128xf32>
    %c2 = arith.constant 2 : index
    %c0_17 = arith.constant 0 : index
    %19 = vector.load %arg9[%c2, %c0_17] : memref<576x8xf32, #tpu.memory_space<vmem>>, vector<512x8xf32>
    %20 = arith.truncf %19 : vector<512x8xf32> to vector<512x8xbf16>
    %c2_18 = arith.constant 2 : index
    %c0_19 = arith.constant 0 : index
    %c0_20 = arith.constant 0 : index
    %21 = vector.load %arg4[%c2_18, %c0_19, %c0_20] : memref<9x8x128xbf16, #tpu.memory_space<vmem>>, vector<1x8x128xbf16>
    %22 = vector.shape_cast %21 : vector<1x8x128xbf16> to vector<8x128xbf16>
    %cst_21 = arith.constant dense<0.000000e+00> : vector<512x128xf32>
    %23 = tpu.matmul %20, %22, %cst_21 {dimension_numbers = #tpu.dot_dimension_numbers<[1], [0], [0], [1], [0, 0, 1, 1], [], []>} : vector<512x8xbf16>, vector<8x128xbf16>, vector<512x128xf32> -> vector<512x128xf32>
    %24 = arith.addf %18, %23 : vector<512x128xf32>
    %c18 = arith.constant 18 : index
    %c0_22 = arith.constant 0 : index
    %25 = vector.load %arg9[%c18, %c0_22] : memref<576x8xf32, #tpu.memory_space<vmem>>, vector<512x8xf32>
    %26 = arith.truncf %25 : vector<512x8xf32> to vector<512x8xbf16>
    %c3 = arith.constant 3 : index
    %c0_23 = arith.constant 0 : index
    %c0_24 = arith.constant 0 : index
    %27 = vector.load %arg4[%c3, %c0_23, %c0_24] : memref<9x8x128xbf16, #tpu.memory_space<vmem>>, vector<1x8x128xbf16>
    %28 = vector.shape_cast %27 : vector<1x8x128xbf16> to vector<8x128xbf16>
    %cst_25 = arith.constant dense<0.000000e+00> : vector<512x128xf32>
    %29 = tpu.matmul %26, %28, %cst_25 {dimension_numbers = #tpu.dot_dimension_numbers<[1], [0], [0], [1], [0, 0, 1, 1], [], []>} : vector<512x8xbf16>, vector<8x128xbf16>, vector<512x128xf32> -> vector<512x128xf32>
    %30 = arith.addf %24, %29 : vector<512x128xf32>
    %c19 = arith.constant 19 : index
    %c0_26 = arith.constant 0 : index
    %31 = vector.load %arg9[%c19, %c0_26] : memref<576x8xf32, #tpu.memory_space<vmem>>, vector<512x8xf32>
    %32 = arith.truncf %31 : vector<512x8xf32> to vector<512x8xbf16>
    %c4 = arith.constant 4 : index
    %c0_27 = arith.constant 0 : index
    %c0_28 = arith.constant 0 : index
    %33 = vector.load %arg4[%c4, %c0_27, %c0_28] : memref<9x8x128xbf16, #tpu.memory_space<vmem>>, vector<1x8x128xbf16>
    %34 = vector.shape_cast %33 : vector<1x8x128xbf16> to vector<8x128xbf16>
    %cst_29 = arith.constant dense<0.000000e+00> : vector<512x128xf32>
    %35 = tpu.matmul %32, %34, %cst_29 {dimension_numbers = #tpu.dot_dimension_numbers<[1], [0], [0], [1], [0, 0, 1, 1], [], []>} : vector<512x8xbf16>, vector<8x128xbf16>, vector<512x128xf32> -> vector<512x128xf32>
    %36 = arith.addf %30, %35 : vector<512x128xf32>
    %c20 = arith.constant 20 : index
    %c0_30 = arith.constant 0 : index
    %37 = vector.load %arg9[%c20, %c0_30] : memref<576x8xf32, #tpu.memory_space<vmem>>, vector<512x8xf32>
    %38 = arith.truncf %37 : vector<512x8xf32> to vector<512x8xbf16>
    %c5 = arith.constant 5 : index
    %c0_31 = arith.constant 0 : index
    %c0_32 = arith.constant 0 : index
    %39 = vector.load %arg4[%c5, %c0_31, %c0_32] : memref<9x8x128xbf16, #tpu.memory_space<vmem>>, vector<1x8x128xbf16>
    %40 = vector.shape_cast %39 : vector<1x8x128xbf16> to vector<8x128xbf16>
    %cst_33 = arith.constant dense<0.000000e+00> : vector<512x128xf32>
    %41 = tpu.matmul %38, %40, %cst_33 {dimension_numbers = #tpu.dot_dimension_numbers<[1], [0], [0], [1], [0, 0, 1, 1], [], []>} : vector<512x8xbf16>, vector<8x128xbf16>, vector<512x128xf32> -> vector<512x128xf32>
    %42 = arith.addf %36, %41 : vector<512x128xf32>
    %c36 = arith.constant 36 : index
    %c0_34 = arith.constant 0 : index
    %43 = vector.load %arg9[%c36, %c0_34] : memref<576x8xf32, #tpu.memory_space<vmem>>, vector<512x8xf32>
    %44 = arith.truncf %43 : vector<512x8xf32> to vector<512x8xbf16>
    %c6 = arith.constant 6 : index
    %c0_35 = arith.constant 0 : index
    %c0_36 = arith.constant 0 : index
    %45 = vector.load %arg4[%c6, %c0_35, %c0_36] : memref<9x8x128xbf16, #tpu.memory_space<vmem>>, vector<1x8x128xbf16>
    %46 = vector.shape_cast %45 : vector<1x8x128xbf16> to vector<8x128xbf16>
    %cst_37 = arith.constant dense<0.000000e+00> : vector<512x128xf32>
    %47 = tpu.matmul %44, %46, %cst_37 {dimension_numbers = #tpu.dot_dimension_numbers<[1], [0], [0], [1], [0, 0, 1, 1], [], []>} : vector<512x8xbf16>, vector<8x128xbf16>, vector<512x128xf32> -> vector<512x128xf32>
    %48 = arith.addf %42, %47 : vector<512x128xf32>
    %c37 = arith.constant 37 : index
    %c0_38 = arith.constant 0 : index
    %49 = vector.load %arg9[%c37, %c0_38] : memref<576x8xf32, #tpu.memory_space<vmem>>, vector<512x8xf32>
    %50 = arith.truncf %49 : vector<512x8xf32> to vector<512x8xbf16>
    %c7 = arith.constant 7 : index
    %c0_39 = arith.constant 0 : index
    %c0_40 = arith.constant 0 : index
    %51 = vector.load %arg4[%c7, %c0_39, %c0_40] : memref<9x8x128xbf16, #tpu.memory_space<vmem>>, vector<1x8x128xbf16>
    %52 = vector.shape_cast %51 : vector<1x8x128xbf16> to vector<8x128xbf16>
    %cst_41 = arith.constant dense<0.000000e+00> : vector<512x128xf32>
    %53 = tpu.matmul %50, %52, %cst_41 {dimension_numbers = #tpu.dot_dimension_numbers<[1], [0], [0], [1], [0, 0, 1, 1], [], []>} : vector<512x8xbf16>, vector<8x128xbf16>, vector<512x128xf32> -> vector<512x128xf32>
    %54 = arith.addf %48, %53 : vector<512x128xf32>
    %c38 = arith.constant 38 : index
    %c0_42 = arith.constant 0 : index
    %55 = vector.load %arg9[%c38, %c0_42] : memref<576x8xf32, #tpu.memory_space<vmem>>, vector<512x8xf32>
    %56 = arith.truncf %55 : vector<512x8xf32> to vector<512x8xbf16>
    %c8 = arith.constant 8 : index
    %c0_43 = arith.constant 0 : index
    %c0_44 = arith.constant 0 : index
    %57 = vector.load %arg4[%c8, %c0_43, %c0_44] : memref<9x8x128xbf16, #tpu.memory_space<vmem>>, vector<1x8x128xbf16>
    %58 = vector.shape_cast %57 : vector<1x8x128xbf16> to vector<8x128xbf16>
    %cst_45 = arith.constant dense<0.000000e+00> : vector<512x128xf32>
    %59 = tpu.matmul %56, %58, %cst_45 {dimension_numbers = #tpu.dot_dimension_numbers<[1], [0], [0], [1], [0, 0, 1, 1], [], []>} : vector<512x8xbf16>, vector<8x128xbf16>, vector<512x128xf32> -> vector<512x128xf32>
    %60 = arith.addf %54, %59 : vector<512x128xf32>
    %c0_46 = arith.constant 0 : index
    %c0_47 = arith.constant 0 : index
    %61 = vector.load %arg5[%c0_46, %c0_47] : memref<512x1xf32, #tpu.memory_space<vmem>>, vector<512x1xf32>
    %62 = vector.broadcast %61 : vector<512x1xf32> to vector<512x128xf32>
    %63 = arith.mulf %60, %62 : vector<512x128xf32>
    %64 = vector.extract_strided_slice %63 {offsets = [0, 0], sizes = [512, 8], strides = [1, 1]} : vector<512x128xf32> to vector<512x8xf32>
    %65 = arith.truncf %64 : vector<512x8xf32> to vector<512x8xbf16>
    %c0_48 = arith.constant 0 : index
    %c0_49 = arith.constant 0 : index
    %66 = vector.load %arg6[%c0_48, %c0_49] : memref<512x8xbf16, #tpu.memory_space<vmem>>, vector<512x8xbf16>
    tpu.vector_store %arg6[%c0_48, %c0_49], %65 {strides = array<i32>} : memref<512x8xbf16, #tpu.memory_space<vmem>>, vector<512x8xbf16>,
    %cst_50 = arith.constant dense<0.000000e+00> : vector<128xf32>
    %67 = vector.multi_reduction <add>, %63, %cst_50 [0] : vector<512x128xf32> to vector<128xf32>
    %68 = vector.shape_cast %67 : vector<128xf32> to vector<1x128xf32>
    %69 = vector.shape_cast %68 : vector<1x128xf32> to vector<1x1x128xf32>
    %c0_51 = arith.constant 0 : index
    %c0_52 = arith.constant 0 : index
    %c0_53 = arith.constant 0 : index
    %70 = vector.load %arg7[%c0_51, %c0_52, %c0_53] : memref<1x1x128xf32, #tpu.memory_space<vmem>>, vector<1x1x128xf32>
    tpu.vector_store %arg7[%c0_51, %c0_52, %c0_53], %69 {strides = array<i32>} : memref<1x1x128xf32, #tpu.memory_space<vmem>>, vector<1x1x128xf32>,
    %71 = arith.mulf %63, %63 : vector<512x128xf32>
    %cst_54 = arith.constant dense<0.000000e+00> : vector<128xf32>
    %72 = vector.multi_reduction <add>, %71, %cst_54 [0] : vector<512x128xf32> to vector<128xf32>
    %73 = vector.shape_cast %72 : vector<128xf32> to vector<1x128xf32>
    %74 = vector.shape_cast %73 : vector<1x128xf32> to vector<1x1x128xf32>
    %c0_55 = arith.constant 0 : index
    %c0_56 = arith.constant 0 : index
    %c0_57 = arith.constant 0 : index
    %75 = vector.load %arg8[%c0_55, %c0_56, %c0_57] : memref<1x1x128xf32, #tpu.memory_space<vmem>>, vector<1x1x128xf32>
    tpu.vector_store %arg8[%c0_55, %c0_56, %c0_57], %74 {strides = array<i32>} : memref<1x1x128xf32, #tpu.memory_space<vmem>>, vector<1x1x128xf32>,
    return
  }
  func.func @transform_0(%arg0: i32, %arg1: i32) -> (i32, i32) {
    %c0_i32 = arith.constant 0 : i32
    %c0_i32_0 = arith.constant 0 : i32
    return %arg0, %c0_i32 : i32, i32
  }
  func.func @transform_1(%arg0: i32, %arg1: i32) -> (i32, i32) {
    %c1_i32 = arith.constant 1 : i32
    %0 = arith.addi %arg0, %c1_i32 : i32
    %c8_i32 = arith.constant 8 : i32
    %1 = arith.muli %0, %c8_i32 : i32
    %c0_i32 = arith.constant 0 : i32
    %c0_i32_0 = arith.constant 0 : i32
    return %1, %c0_i32 : i32, i32
  }
  func.func @transform_2(%arg0: i32, %arg1: i32) -> (i32, i32, i32) {
    %c0_i32 = arith.constant 0 : i32
    %c0_i32_0 = arith.constant 0 : i32
    %c0_i32_1 = arith.constant 0 : i32
    return %c0_i32, %c0_i32_0, %arg1 : i32, i32, i32
  }
  func.func @transform_3(%arg0: i32, %arg1: i32) -> (i32, i32) {
    %c0_i32 = arith.constant 0 : i32
    %c0_i32_0 = arith.constant 0 : i32
    return %arg0, %c0_i32 : i32, i32
  }
  func.func @transform_4(%arg0: i32, %arg1: i32) -> (i32, i32) {
    %c0_i32 = arith.constant 0 : i32
    return %arg0, %arg1 : i32, i32
  }
  func.func @transform_5(%arg0: i32, %arg1: i32) -> (i32, i32, i32) {
    %c0_i32 = arith.constant 0 : i32
    %c0_i32_0 = arith.constant 0 : i32
    return %arg0, %c0_i32, %arg1 : i32, i32, i32
  }
  func.func @transform_6(%arg0: i32, %arg1: i32) -> (i32, i32, i32) {
    %c0_i32 = arith.constant 0 : i32
    %c0_i32_0 = arith.constant 0 : i32
    return %arg0, %c0_i32, %arg1 : i32, i32, i32
  }
}

</mosaic_0001>

<bundles_post_ra>
// kernel: tpu_custom_call.1
= control target key start
LH: loop header
LB: loop body
LE: loop exit
PB: predicated region body
PF: predicated region fallthrough
CT: control target
= control target key end

     0   :  { %12 = vsyncpa [#allocation4], 0  ;;  %s10239_s0 = inlined_call_operand.vmem [shape: bf16[1536,8], index: 0, kind: input, shape index: {}]   ;;  %s10240_s1 = inlined_call_operand.vmem [shape: bf16[1536,8], index: 1, kind: input, shape index: {}]   ;;  %s10241_s2 = inlined_call_operand.vmem [shape: bf16[9,8,128], index: 2, kind: input, shape index: {}]   ;;  %s10242_s3 = inlined_call_operand.vmem [shape: f32[1024,1], index: 3, kind: input, shape index: {}]   ;;  %s10243_s4 = inlined_call_operand.vmem [shape: bf16[1024,8], index: 4, kind: output, shape index: {0}]   ;;  %s10244_s5 = inlined_call_operand.hbm [shape: f32[2,1,128], index: 5, kind: output, shape index: {1}]   ;;  %s10245_s6 = inlined_call_operand.hbm [shape: f32[2,1,128], index: 6, kind: output, shape index: {2}]  }
   0x1   :  { %14 = vsyncpa [#allocation4 + $0x1], 0 }
   0x2   :  { %15 = vsyncpa [#allocation6], 0 }
   0x3   :  { %17 = vsyncpa [#allocation6 + $0x1], 0  ;;  %s8855_s21 = smov 0   ;;  %s8857_s22 = smov 0  }
   0x4   :  { %s8859_s23 = smov 0   ;;  %s8861_s24 = smov 0  }
   0x5   :  { %s8863_s25 = smov 0   ;;  %s8865_s26 = smov 0  }
   0x6 LB: > { %s6594_s27 = sadd.s32 4294967295, %s8815_s26   ;;  %s6595_s28 = sadd.s32 4294967294, %s8815_s26   ;;  %s8815_s26 = sphi %s8865_s26, %s23_s26   ;;  %s8811_s25 = sphi %s8863_s25, %s10272_s25   ;;  %s8807_s24 = sphi %s8861_s24, %s10271_s24   ;;  %s8803_s23 = sphi %s8859_s23, %s10270_s23   ;;  %s8799_s22 = sphi %s8857_s22, %s10269_s22   ;;  %s8795_s21 = sphi %s8855_s21, %s10268_s21  }
   0x7   : > { %s35_s29 = sadd.s32 1, %s8811_s25  ;;  %s180_s30 = sadd.s32 1, %s8803_s23 }
   0x8   : > { %p37_p0 = scmp.ge.s32.totalorder %s35_s29, 2  ;;  %p190_p1 = scmp.ne.s32.totalorder %s8803_s23, %s8799_s22 }
   0x9   : > { %p191_p2 = scmp.eq.s32.totalorder %s6594_s27, 1  ;;  %p196_p3 = scmp.ne.s32.totalorder %s8799_s22, %s8795_s21 }
   0xa   : > { %s10274_s29 = smov (%p37_p0, %s35_s29), 0  ;;  %p197_p5 = scmp.eq.s32.totalorder %s6595_s28, 1 }
   0xb   : > { %p8895_p4 = por %p191_p2, %p190_p1  ;;  %s175_s8 = ssub.s32 %s8811_s25, %s10274_s29 }
   0xc   : > { %p6601_p6 = scmp.ge.s32.totalorder %s8815_s26, 1  ;;  %p178_p7 = scmp.eq.s32.totalorder %s175_s8, 0 }
   0xd   : > { %p8902_p8 = por %p197_p5, %p196_p3  ;;  %p281_p9 = scmp.lt.s32.totalorder %s8815_s26, 3 }
   0xe   : > { %s8908_s10 = scalar_select %p178_p7, %s8803_s23, %s180_s30  }
   0xf   : > { %p282_p10 = pnand %p6601_p6, %p281_p9 }
  0x11   : > { %285 = sbr.rel (%p282_p10) target bundleno = 893 (0x37d), region = 36 }
  0x18   : > { %v6611_v0 = vld [vmem:[%s10241_s2 + $0x4] sm:$0xf]  ;;  %vm882_vm0 = vcmask 1043456   ;;  %v6742_v1 = vld [vmem:[%s10241_s2 + $0x10] sm:$0xf]  ;;  %s8917_s15 = sshll.u32 %s8807_s24, 6 }
  0x19   : > { %8631 = vmatprep.subr.msk.bf16.mxu1 %vm882_vm0, %v6611_v0  ;;  %8635 = vmatprep.subr.msk.bf16.mxu0 %vm882_vm0, %v6742_v1  ;;  %v884_v2 = vsel %vm882_vm0, %v6611_v0, 0  ;;  %v8923_v3 = vsel %vm882_vm0, %v6742_v1, 0  ;;  %p339_p11 = scmp.lt.s32.totalorder %s8917_s15, 191  ;;  %v687_v4 = vld [vmem:[%s10241_s2] sm:$0xf]  ;;  %vm502_vm1 = vcmask 64512  }
  0x1a   : > { %7524 = vmatpush3.bf16.msra.mxu1 %v884_v2  ;;  %7788 = vmatpush3.bf16.msra.mxu0 %v8923_v3  ;;  %v6775_v5 = vld [vmem:[%s10241_s2 + $0x14] sm:$0xf]  ;;  %v8945_v9 = vsel %vm882_vm0, %v687_v4, 0  ;;  %s7191_s13 = sadd.s32 64, %s8917_s15  ;;  %p359_p13 = scmp.lt.s32.totalorder %s8917_s15, 127  ;;  %vm6117_vm2 = vcmask 60416  }
  0x1b   : > { %s340_s20 = scalar_select %p339_p11, %s8917_s15, 191  ;;  %8632 = vmatprep.subr.msk.bf16.mxu1 %vm882_vm0, %v687_v4  ;;  %8637 = vmatprep.subr.msk.bf16.mxu0 %vm882_vm0, %v6775_v5  ;;  %v8948_v10 = vsel %vm882_vm0, %v6775_v5, 0 }
  0x1c   : > { %p347_p12 = scmp.lt.s32.totalorder %s7191_s13, 191  ;;  %s10278_s15 = smov (!%p359_p13, %s8917_s15), 127 }
  0x1d   : > { %s6603_s27 = sshll.u32 %s340_s20, 2  ;;  %s6608_s16 = sshll.u32 %s10278_s15, 3 }
  0x1e   : > { %s8939_s8 = scalar_lea.vmem %s10239_s0, %s6603_s27  ;;  %s10276_s13 = smov (!%p347_p12, %s7191_s13), 191 }
  0x1f   : > { %v7047_v6 = vld [vmem:[%s8939_s8] sm:$0xff]   ;;  %v7192_v7 = vld [vmem:[%s8939_s8 + $0x8] sm:$0xff]   ;;  %v7193_v8 = vld [vmem:[%s8939_s8 + $0x10] sm:$0xff]   ;;  %s6606_s14 = sshll.u32 %s10276_s13, 2  ;;  %s9426_s19 = scalar_lea.vmem %s10242_s3, %s6608_s16 }
  0x20   : > { %v7048_v11 = vunpack.c.l.bf16 %v7047_v6  ;;  %v7049_v12 = vunpack.c.h.bf16 %v7047_v6  ;;  %v7052_v13 = vunpack.c.l.bf16 %v7192_v7  ;;  %v7053_v14 = vunpack.c.h.bf16 %v7192_v7  ;;  %v7194_v15 = vld [vmem:[%s8939_s8 + $0x18] sm:$0xff]   ;;  %v7195_v16 = vld [vmem:[%s8939_s8 + $0x20] sm:$0xff]   ;;  %v7196_v17 = vld [vmem:[%s8939_s8 + $0x28] sm:$0xff]   ;;  %s9101_s18 = scalar_lea.vmem %s10240_s1, %s6606_s14  ;;  %s6610_s20 = sshll.u32 %s10278_s15, 2 }
  0x21   : > { %v7056_v18 = vunpack.c.l.bf16 %v7193_v8  ;;  %v7057_v19 = vunpack.c.h.bf16 %v7193_v8  ;;  %v7060_v20 = vunpack.c.l.bf16 %v7194_v15  ;;  %v7061_v21 = vunpack.c.h.bf16 %v7194_v15  ;;  %v7197_v22 = vld [vmem:[%s8939_s8 + $0x30] sm:$0xff]   ;;  %v7198_v23 = vld [vmem:[%s8939_s8 + $0x38] sm:$0xff]   ;;  %v7199_v24 = vld [vmem:[%s8939_s8 + $0x40] sm:$0xff]   ;;  %s9872_s30 = scalar_lea.vmem %s10243_s4, %s6610_s20  ;;  %s10150_s15 = sand.u32 1, %s8799_s22  }
  0x22   : > { %503 = vst.msk [vmem:[#allocation2] sm:$0xff] %vm502_vm1, %v7048_v11  ;;  %504 = vst.msk [vmem:[#allocation2 + $0x8] sm:$0xff] %vm502_vm1, %v7049_v12  ;;  %v7064_v25 = vunpack.c.l.bf16 %v7195_v16  ;;  %v7065_v26 = vunpack.c.h.bf16 %v7195_v16  ;;  %v7068_v27 = vunpack.c.l.bf16 %v7196_v17  ;;  %v7069_v28 = vunpack.c.h.bf16 %v7196_v17  ;;  %v7200_v29 = vld [vmem:[%s8939_s8 + $0x48] sm:$0xff]   ;;  %v7201_v30 = vld [vmem:[%s8939_s8 + $0x50] sm:$0xff]   ;;  %s331_s11 = scalar_lea.vmem [#allocation3], %s10150_s15  ;;  %s337_s13 = scalar_lea.vmem [#allocation5], %s10150_s15 }
  0x23   : > { %505 = vst.msk [vmem:[#allocation2 + $0x10] sm:$0xff] %vm502_vm1, %v7052_v13  ;;  %506 = vst.msk [vmem:[#allocation2 + $0x18] sm:$0xff] %vm502_vm1, %v7053_v14  ;;  %v7202_v31 = vld [vmem:[%s8939_s8 + $0x58] sm:$0xff]   ;;  %v7072_v32 = vunpack.c.l.bf16 %v7197_v22  ;;  %v7073_v33 = vunpack.c.h.bf16 %v7197_v22  ;;  %v7076_v34 = vunpack.c.l.bf16 %v7198_v23  ;;  %v7077_v35 = vunpack.c.h.bf16 %v7198_v23  ;;  %v7203_v36 = vld [vmem:[%s8939_s8 + $0x60] sm:$0xff]   ;;  %s6416_s12 = sshll.u32 %s331_s11, 4  ;;  %s6430_s14 = sshll.u32 %s337_s13, 4  ;;  %s10162_s12 = int_to_ptr.vmem [resolvable:$true] %s6416_s12  ;;  %s10169_s14 = int_to_ptr.vmem [resolvable:$true] %s6430_s14 }
  0x24   : > { %507 = vst.msk [vmem:[#allocation2 + $0x20] sm:$0xff] %vm502_vm1, %v7056_v18  ;;  %508 = vst.msk [vmem:[#allocation2 + $0x28] sm:$0xff] %vm502_vm1, %v7057_v19  ;;  %v7204_v37 = vld [vmem:[%s8939_s8 + $0x68] sm:$0xff]   ;;  %v7080_v38 = vunpack.c.l.bf16 %v7199_v24  ;;  %v7081_v39 = vunpack.c.h.bf16 %v7199_v24  ;;  %v7084_v40 = vunpack.c.l.bf16 %v7200_v29  ;;  %v7085_v41 = vunpack.c.h.bf16 %v7200_v29  ;;  %v7205_v42 = vld [vmem:[%s8939_s8 + $0x70] sm:$0xff]   ;;  %s6395_s27 = scalar_lea.sflag [#allocation4], %s10150_s15  ;;  %s8705_s28 = scalar_lea.vmem %s10162_s12, 16 }
  0x25   : > { %509 = vst.msk [vmem:[#allocation2 + $0x30] sm:$0xff] %vm502_vm1, %v7060_v20  ;;  %510 = vst.msk [vmem:[#allocation2 + $0x38] sm:$0xff] %vm502_vm1, %v7061_v21  ;;  %v7206_v43 = vld [vmem:[%s8939_s8 + $0x78] sm:$0xff]   ;;  %v7088_v44 = vunpack.c.l.bf16 %v7201_v30  ;;  %v7089_v45 = vunpack.c.h.bf16 %v7201_v30  ;;  %v7092_v46 = vunpack.c.l.bf16 %v7202_v31  ;;  %v7093_v47 = vunpack.c.h.bf16 %v7202_v31  ;;  %v7207_v48 = vld [vmem:[%s8939_s8 + $0x80] sm:$0xff]   ;;  %p8706_p0 = scmp.ne.s32.totalorder %s10162_s12, %s8705_s28 }
  0x26   : > { %511 = vst.msk [vmem:[#allocation2 + $0x40] sm:$0xff] %vm502_vm1, %v7064_v25  ;;  %512 = vst.msk [vmem:[#allocation2 + $0x48] sm:$0xff] %vm502_vm1, %v7065_v26  ;;  %v7208_v49 = vld [vmem:[%s8939_s8 + $0x88] sm:$0xff]   ;;  %v7096_v50 = vunpack.c.l.bf16 %v7203_v36  ;;  %v7097_v51 = vunpack.c.h.bf16 %v7203_v36  ;;  %v7100_v52 = vunpack.c.l.bf16 %v7204_v37  ;;  %v7101_v53 = vunpack.c.h.bf16 %v7204_v37  ;;  %v7209_v54 = vld [vmem:[%s8939_s8 + $0x90] sm:$0xff]  }
  0x27   : > { %513 = vst.msk [vmem:[#allocation2 + $0x50] sm:$0xff] %vm502_vm1, %v7068_v27  ;;  %514 = vst.msk [vmem:[#allocation2 + $0x58] sm:$0xff] %vm502_vm1, %v7069_v28  ;;  %v7210_v55 = vld [vmem:[%s8939_s8 + $0x98] sm:$0xff]   ;;  %v7104_v56 = vunpack.c.l.bf16 %v7205_v42  ;;  %v7105_v57 = vunpack.c.h.bf16 %v7205_v42  ;;  %v7108_v58 = vunpack.c.l.bf16 %v7206_v43  ;;  %v7109_v59 = vunpack.c.h.bf16 %v7206_v43  ;;  %v7211_v60 = vld [vmem:[%s8939_s8 + $0xa0] sm:$0xff]   ;;  %p8707_p1 = pnand %p8706_p0, %p8895_p4 }
  0x28   : > { %515 = vst.msk [vmem:[#allocation2 + $0x60] sm:$0xff] %vm502_vm1, %v7072_v32  ;;  %516 = vst.msk [vmem:[#allocation2 + $0x68] sm:$0xff] %vm502_vm1, %v7073_v33  ;;  %v8993_v61 = vld [vmem:[%s8939_s8 + $0xa8] sm:$0xff]   ;;  %v7112_v62 = vunpack.c.l.bf16 %v7207_v48  ;;  %v7113_v63 = vunpack.c.h.bf16 %v7207_v48  ;;  %v7116_v0 = vunpack.c.l.bf16 %v7208_v49  ;;  %v7117_v1 = vunpack.c.h.bf16 %v7208_v49  ;;  %v9000_v2 = vld [vmem:[%s8939_s8 + $0xb0] sm:$0xff]  }
  0x29   : > { %517 = vst.msk [vmem:[#allocation2 + $0x70] sm:$0xff] %vm502_vm1, %v7076_v34  ;;  %518 = vst.msk [vmem:[#allocation2 + $0x78] sm:$0xff] %vm502_vm1, %v7077_v35  ;;  %v9003_v4 = vld [vmem:[%s8939_s8 + $0xb8] sm:$0xff]   ;;  %v9006_v5 = vld [vmem:[%s8939_s8 + $0xc0] sm:$0xff]   ;;  %v7120_v11 = vunpack.c.l.bf16 %v7209_v54  ;;  %v7121_v12 = vunpack.c.h.bf16 %v7209_v54  ;;  %v7124_v13 = vunpack.c.l.bf16 %v7210_v55  ;;  %v7125_v14 = vunpack.c.h.bf16 %v7210_v55  ;;  %p8708_p2 = pneg %p8707_p1 }
  0x2a   : > { %519 = vst.msk [vmem:[#allocation2 + $0x80] sm:$0xff] %vm502_vm1, %v7080_v38  ;;  %520 = vst.msk [vmem:[#allocation2 + $0x88] sm:$0xff] %vm502_vm1, %v7081_v39  ;;  %v688_v6 = vld [vmem:[#allocation2 + $0x1] sm:$0xff]  ;;  %v689_v7 = vld [vmem:[#allocation2 + $0x9] sm:$0xff]  ;;  %v7128_v21 = vunpack.c.l.bf16 %v7211_v60  ;;  %v7129_v22 = vunpack.c.h.bf16 %v7211_v60  ;;  %v7132_v23 = vunpack.c.l.bf16 %v8993_v61  ;;  %v7133_v30 = vunpack.c.h.bf16 %v8993_v61 }
  0x2b   : > { %521 = vst.msk [vmem:[#allocation2 + $0x90] sm:$0xff] %vm502_vm1, %v7084_v40  ;;  %522 = vst.msk [vmem:[#allocation2 + $0x98] sm:$0xff] %vm502_vm1, %v7085_v41  ;;  %v2663_v8 = vld [vmem:[#allocation2 + $0x13] sm:$0xff]  ;;  %v9013_v15 = vld [vmem:[%s8939_s8 + $0xc8] sm:$0xff]   ;;  %v752_v17 = vpack.c.bf16 %v689_v7, %v688_v6  ;;  %v7136_v31 = vunpack.c.l.bf16 %v9000_v2  ;;  %v7137_v36 = vunpack.c.h.bf16 %v9000_v2  ;;  %v7140_v37 = vunpack.c.l.bf16 %v9003_v4 }
  0x2c   : > { %523 = vst.msk [vmem:[#allocation2 + $0xa0] sm:$0xff] %vm502_vm1, %v7088_v44  ;;  %524 = vst.msk [vmem:[#allocation2 + $0xa8] sm:$0xff] %vm502_vm1, %v7089_v45  ;;  %v9016_v16 = vld [vmem:[%s8939_s8 + $0xd0] sm:$0xff]   ;;  %v2664_v18 = vld [vmem:[#allocation2 + $0x1b] sm:$0xff]  ;;  %v7141_v38 = vunpack.c.h.bf16 %v9003_v4  ;;  %v7144_v42 = vunpack.c.l.bf16 %v9006_v5  ;;  %v7145_v43 = vunpack.c.h.bf16 %v9006_v5  ;;  %v7148_v49 = vunpack.c.l.bf16 %v9013_v15 }
  0x2d   : > { %525 = vst.msk [vmem:[#allocation2 + $0xb0] sm:$0xff] %vm502_vm1, %v7092_v46  ;;  %526 = vst.msk [vmem:[#allocation2 + $0xb8] sm:$0xff] %vm502_vm1, %v7093_v47  ;;  %v690_v19 = vld [vmem:[#allocation2 + $0x11] sm:$0xff]  ;;  %v691_v20 = vld [vmem:[#allocation2 + $0x19] sm:$0xff]  ;;  %v2727_v25 = vpack.c.bf16 %v2664_v18, %v2663_v8  ;;  %7525 = vmatprep.mubr.msk.bf16.mxu1 %vm502_vm1, %v752_v17  ;;  %v7153_v54 = vunpack.c.h.bf16 %v9016_v16 }
  0x2e   : > { %527 = vst.msk [vmem:[#allocation2 + $0xc0] sm:$0xff] %vm502_vm1, %v7096_v50  ;;  %528 = vst.msk [vmem:[#allocation2 + $0xc8] sm:$0xff] %vm502_vm1, %v7097_v51  ;;  %v9024_v24 = vld [vmem:[%s8939_s8 + $0xd8] sm:$0xff]   ;;  %v753_v26 = vpack.c.bf16 %v691_v20, %v690_v19  ;;  %v2665_v27 = vld [vmem:[#allocation2 + $0x23] sm:$0xff]  ;;  %v7149_v50 = vunpack.c.h.bf16 %v9013_v15  ;;  %v7152_v51 = vunpack.c.l.bf16 %v9016_v16 }
  0x2f   : > { %529 = vst.msk [vmem:[#allocation2 + $0xd0] sm:$0xff] %vm502_vm1, %v7100_v52  ;;  %530 = vst.msk [vmem:[#allocation2 + $0xd8] sm:$0xff] %vm502_vm1, %v7101_v53  ;;  %v2666_v28 = vld [vmem:[#allocation2 + $0x2b] sm:$0xff]  ;;  %v692_v29 = vld [vmem:[#allocation2 + $0x21] sm:$0xff]  ;;  %7789 = vmatprep.mubr.msk.bf16.mxu0 %vm502_vm1, %v2727_v25  ;;  %v7156_v55 = vunpack.c.l.bf16 %v9024_v24 }
  0x30   : > { %531 = vst.msk [vmem:[#allocation2 + $0xe0] sm:$0xff] %vm502_vm1, %v7104_v56  ;;  %532 = vst.msk [vmem:[#allocation2 + $0xe8] sm:$0xff] %vm502_vm1, %v7105_v57  ;;  %v2728_v32 = vpack.c.bf16 %v2666_v28, %v2665_v27  ;;  %v693_v33 = vld [vmem:[#allocation2 + $0x29] sm:$0xff]  ;;  %v2667_v34 = vld [vmem:[#allocation2 + $0x33] sm:$0xff]  ;;  %7526 = vmatmul.mubr.msk.bf16.vlgmr.msra.gmra.mrb[0].mxu1 %vm502_vm1, %v753_v26 }
  0x31   : > { %533 = vst.msk [vmem:[#allocation2 + $0xf0] sm:$0xff] %vm502_vm1, %v7108_v58  ;;  %534 = vst.msk [vmem:[#allocation2 + $0xf8] sm:$0xff] %vm502_vm1, %v7109_v59  ;;  %v2668_v35 = vld [vmem:[#allocation2 + $0x3b] sm:$0xff]  ;;  %v754_v39 = vpack.c.bf16 %v693_v33, %v692_v29  ;;  %v7220_v45 = vld [vmem:[%s8939_s8 + $0xe8] sm:$0xff]   ;;  %7590 = vmatpush3.bf16.msra.mxu1 %v8945_v9 }
  0x32   : > { %535 = vst.msk [vmem:[#allocation2 + $0x100] sm:$0xff] %vm502_vm1, %v7112_v62  ;;  %536 = vst.msk [vmem:[#allocation2 + $0x108] sm:$0xff] %vm502_vm1, %v7113_v63  ;;  %v2729_v40 = vpack.c.bf16 %v2668_v35, %v2667_v34  ;;  %v9044_v41 = vld [vmem:[%s10241_s2 + $0x18] sm:$0xf]  ;;  %v7219_v44 = vld [vmem:[%s8939_s8 + $0xe0] sm:$0xff]   ;;  %7790 = vmatmul.mubr.msk.bf16.vlgmr.msra.gmra.mrb[0].mxu0 %vm502_vm1, %v2728_v32  ;;  %v7164_v61 = vunpack.c.l.bf16 %v7220_v45  ;;  %v7165_v62 = vunpack.c.h.bf16 %v7220_v45 }
  0x33   : > { %537 = vst.msk [vmem:[#allocation2 + $0x110] sm:$0xff] %vm502_vm1, %v7116_v0  ;;  %538 = vst.msk [vmem:[#allocation2 + $0x118] sm:$0xff] %vm502_vm1, %v7117_v1  ;;  %v694_v46 = vld [vmem:[#allocation2 + $0x31] sm:$0xff]  ;;  %v695_v47 = vld [vmem:[#allocation2 + $0x39] sm:$0xff]  ;;  %7854 = vmatpush3.bf16.msra.mxu0 %v8948_v10  ;;  %7529 = vmatprep.mubr.msk.bf16.mxu1 %vm502_vm1, %v754_v39  ;;  %v7157_v10 = vunpack.c.h.bf16 %v9024_v24  ;;  %v7160_v58 = vunpack.c.l.bf16 %v7219_v44  ;;  %v7161_v59 = vunpack.c.h.bf16 %v7219_v44 }
  0x34   : > { %539 = vst.msk [vmem:[#allocation2 + $0x120] sm:$0xff] %vm502_vm1, %v7120_v11  ;;  %540 = vst.msk [vmem:[#allocation2 + $0x128] sm:$0xff] %vm502_vm1, %v7121_v12  ;;  %v2669_v48 = vld [vmem:[#allocation2 + $0x43] sm:$0xff]  ;;  %v2670_v9 = vld [vmem:[#allocation2 + $0x4b] sm:$0xff]  ;;  %7793 = vmatprep.mubr.msk.bf16.mxu0 %vm502_vm1, %v2729_v40  ;;  %8638 = vmatprep.subr.msk.bf16.mxu0 %vm882_vm0, %v9044_v41  ;;  %v755_v60 = vpack.c.bf16 %v695_v47, %v694_v46 }
  0x35   : > { %541 = vst.msk [vmem:[#allocation2 + $0x130] sm:$0xff] %vm502_vm1, %v7124_v13  ;;  %542 = vst.msk [vmem:[#allocation2 + $0x138] sm:$0xff] %vm502_vm1, %v7125_v14  ;;  %v696_v52 = vld [vmem:[#allocation2 + $0x41] sm:$0xff]  ;;  %v697_v53 = vld [vmem:[#allocation2 + $0x49] sm:$0xff]  ;;  %v2730_v63 = vpack.c.bf16 %v2670_v9, %v2669_v48 }
  0x36   : > { %543 = vst.msk [vmem:[#allocation2 + $0x140] sm:$0xff] %vm502_vm1, %v7128_v21  ;;  %544 = vst.msk [vmem:[#allocation2 + $0x148] sm:$0xff] %vm502_vm1, %v7129_v22  ;;  %v2671_v56 = vld [vmem:[#allocation2 + $0x53] sm:$0xff]  ;;  %v2672_v57 = vld [vmem:[#allocation2 + $0x5b] sm:$0xff]  ;;  %v756_v0 = vpack.c.bf16 %v697_v53, %v696_v52 }
  0x37   : > { %545 = vst.msk [vmem:[#allocation2 + $0x150] sm:$0xff] %vm502_vm1, %v7132_v23  ;;  %546 = vst.msk [vmem:[#allocation2 + $0x158] sm:$0xff] %vm502_vm1, %v7133_v30  ;;  %v2731_v1 = vpack.c.bf16 %v2672_v57, %v2671_v56  ;;  %v698_v2 = vld [vmem:[#allocation2 + $0x51] sm:$0xff]  ;;  %v699_v4 = vld [vmem:[#allocation2 + $0x59] sm:$0xff] }
  0x38   : > { %547 = vst.msk [vmem:[#allocation2 + $0x160] sm:$0xff] %vm502_vm1, %v7136_v31  ;;  %548 = vst.msk [vmem:[#allocation2 + $0x168] sm:$0xff] %vm502_vm1, %v7137_v36  ;;  %7530 = vmatmul.mubr.msk.bf16.gmra.mrb[4].mxu1 %vm502_vm1, %v755_v60  ;;  %v2673_v5 = vld [vmem:[#allocation2 + $0x63] sm:$0xff]  ;;  %v2674_v6 = vld [vmem:[#allocation2 + $0x6b] sm:$0xff]  ;;  %v757_v13 = vpack.c.bf16 %v699_v4, %v698_v2 }
  0x39   : > { %549 = vst.msk [vmem:[#allocation2 + $0x170] sm:$0xff] %vm502_vm1, %v7140_v37  ;;  %550 = vst.msk [vmem:[#allocation2 + $0x178] sm:$0xff] %vm502_vm1, %v7141_v38  ;;  %7533 = vmatprep.mubr.msk.bf16.mxu1 %vm502_vm1, %v756_v0  ;;  %v700_v7 = vld [vmem:[#allocation2 + $0x61] sm:$0xff]  ;;  %v701_v8 = vld [vmem:[#allocation2 + $0x69] sm:$0xff]  ;;  %v2732_v14 = vpack.c.bf16 %v2674_v6, %v2673_v5 }
  0x3a   : > { %551 = vst.msk [vmem:[#allocation2 + $0x180] sm:$0xff] %vm502_vm1, %v7144_v42  ;;  %552 = vst.msk [vmem:[#allocation2 + $0x188] sm:$0xff] %vm502_vm1, %v7145_v43  ;;  %7794 = vmatmul.mubr.msk.bf16.gmra.mrb[4].mxu0 %vm502_vm1, %v2730_v63  ;;  %v2675_v11 = vld [vmem:[#allocation2 + $0x73] sm:$0xff]  ;;  %v2676_v12 = vld [vmem:[#allocation2 + $0x7b] sm:$0xff]  ;;  %v758_v15 = vpack.c.bf16 %v701_v8, %v700_v7 }
  0x3b   : > { %553 = vst.msk [vmem:[#allocation2 + $0x190] sm:$0xff] %vm502_vm1, %v7148_v49  ;;  %554 = vst.msk [vmem:[#allocation2 + $0x198] sm:$0xff] %vm502_vm1, %v7149_v50  ;;  %7797 = vmatprep.mubr.msk.bf16.mxu0 %vm502_vm1, %v2731_v1  ;;  %v2733_v16 = vpack.c.bf16 %v2676_v12, %v2675_v11  ;;  %v702_v17 = vld [vmem:[#allocation2 + $0x71] sm:$0xff]  ;;  %v703_v18 = vld [vmem:[#allocation2 + $0x79] sm:$0xff] }
  0x3c   : > { %555 = vst.msk [vmem:[#allocation2 + $0x1a0] sm:$0xff] %vm502_vm1, %v7152_v51  ;;  %556 = vst.msk [vmem:[#allocation2 + $0x1a8] sm:$0xff] %vm502_vm1, %v7153_v54  ;;  %v2677_v19 = vld [vmem:[#allocation2 + $0x83] sm:$0xff]  ;;  %v2678_v20 = vld [vmem:[#allocation2 + $0x8b] sm:$0xff]  ;;  %v759_v25 = vpack.c.bf16 %v703_v18, %v702_v17 }
  0x3d   : > { %557 = vst.msk [vmem:[#allocation2 + $0x1b0] sm:$0xff] %vm502_vm1, %v7156_v55  ;;  %558 = vst.msk [vmem:[#allocation2 + $0x1b8] sm:$0xff] %vm502_vm1, %v7157_v10  ;;  %v704_v21 = vld [vmem:[#allocation2 + $0x81] sm:$0xff]  ;;  %v705_v22 = vld [vmem:[#allocation2 + $0x89] sm:$0xff]  ;;  %v2734_v26 = vpack.c.bf16 %v2678_v20, %v2677_v19 }
  0x3e   : > { %559 = vst.msk [vmem:[#allocation2 + $0x1c0] sm:$0xff] %vm502_vm1, %v7160_v58  ;;  %560 = vst.msk [vmem:[#allocation2 + $0x1c8] sm:$0xff] %vm502_vm1, %v7161_v59  ;;  %v2679_v23 = vld [vmem:[#allocation2 + $0x93] sm:$0xff]  ;;  %v2680_v24 = vld [vmem:[#allocation2 + $0x9b] sm:$0xff]  ;;  %v760_v27 = vpack.c.bf16 %v705_v22, %v704_v21 }
  0x3f   : > { %561 = vst.msk [vmem:[#allocation2 + $0x1d0] sm:$0xff] %vm502_vm1, %v7164_v61  ;;  %562 = vst.msk [vmem:[#allocation2 + $0x1d8] sm:$0xff] %vm502_vm1, %v7165_v62  ;;  %v2735_v28 = vpack.c.bf16 %v2680_v24, %v2679_v23  ;;  %v706_v29 = vld [vmem:[#allocation2 + $0x91] sm:$0xff]  ;;  %v707_v30 = vld [vmem:[#allocation2 + $0x99] sm:$0xff] }
  0x40   : > { %7534 = vmatmul.mubr.msk.bf16.gmra.mrb[8].mxu1 %vm502_vm1, %v757_v13  ;;  %v2681_v31 = vld [vmem:[#allocation2 + $0xa3] sm:$0xff]  ;;  %v2682_v32 = vld [vmem:[#allocation2 + $0xab] sm:$0xff]  ;;  %v2683_v35 = vld [vmem:[#allocation2 + $0xb3] sm:$0xff]  ;;  %v761_v37 = vpack.c.bf16 %v707_v30, %v706_v29 }
  0x41   : > { %7537 = vmatprep.mubr.msk.bf16.mxu1 %vm502_vm1, %v758_v15  ;;  %v708_v33 = vld [vmem:[#allocation2 + $0xa1] sm:$0xff]  ;;  %v709_v34 = vld [vmem:[#allocation2 + $0xa9] sm:$0xff]  ;;  %v2736_v38 = vpack.c.bf16 %v2682_v32, %v2681_v31  ;;  %v710_v42 = vld [vmem:[#allocation2 + $0xb1] sm:$0xff] }
  0x42   : > { %7798 = vmatmul.mubr.msk.bf16.gmra.mrb[8].mxu0 %vm502_vm1, %v2732_v14  ;;  %v2684_v36 = vld [vmem:[#allocation2 + $0xbb] sm:$0xff]  ;;  %v762_v39 = vpack.c.bf16 %v709_v34, %v708_v33  ;;  %v2685_v44 = vld [vmem:[#allocation2 + $0xc3] sm:$0xff]  ;;  %v2686_v45 = vld [vmem:[#allocation2 + $0xcb] sm:$0xff] }
  0x43   : > { %7801 = vmatprep.mubr.msk.bf16.mxu0 %vm502_vm1, %v2733_v16  ;;  %v2737_v40 = vpack.c.bf16 %v2684_v36, %v2683_v35  ;;  %v711_v43 = vld [vmem:[#allocation2 + $0xb9] sm:$0xff]  ;;  %v712_v46 = vld [vmem:[#allocation2 + $0xc1] sm:$0xff]  ;;  %v713_v47 = vld [vmem:[#allocation2 + $0xc9] sm:$0xff]  ;;  %v2738_v54 = vpack.c.bf16 %v2686_v45, %v2685_v44 }
  0x44   : > { %v7221_v48 = vld [vmem:[%s8939_s8 + $0xf0] sm:$0xff]   ;;  %v2688_v50 = vld [vmem:[#allocation2 + $0xdb] sm:$0xff]  ;;  %v763_v52 = vpack.c.bf16 %v711_v43, %v710_v42  ;;  %v764_v55 = vpack.c.bf16 %v713_v47, %v712_v46  ;;  %v9112_v60 = vld [vmem:[%s10241_s2 + $0x8] sm:$0xf] }
  0x45   : > { %v2687_v49 = vld [vmem:[#allocation2 + $0xd3] sm:$0xff]  ;;  %v7168_v51 = vunpack.c.l.bf16 %v7221_v48  ;;  %v7169_v9 = vunpack.c.h.bf16 %v7221_v48  ;;  %v7175_v10 = vld [vmem:[%s9101_s18] sm:$0xff]   ;;  %8633 = vmatprep.subr.msk.bf16.mxu1 %vm882_vm0, %v9112_v60  ;;  %v2690_v0 = vld [vmem:[#allocation2 + $0xeb] sm:$0xff] }
  0x46   : > { %v7222_v53 = vld [vmem:[%s8939_s8 + $0xf8] sm:$0xff]   ;;  %v2739_v58 = vpack.c.bf16 %v2688_v50, %v2687_v49  ;;  %v7176_v59 = vunpack.c.l.bf16 %v7175_v10  ;;  %v2689_v63 = vld [vmem:[#allocation2 + $0xe3] sm:$0xff]  ;;  %v7177_v11 = vunpack.c.h.bf16 %v7175_v10  ;;  %v2694_v16 = vld [vmem:[#allocation2 + $0x10b] sm:$0xff]  ;;  %s6971_s8 = sshll.u32 %s8807_s24, 4 }
  0x47   : > { %563 = vst.msk [vmem:[#allocation2 + $0x1e0] sm:$0xff] %vm502_vm1, %v7168_v51  ;;  %v7172_v56 = vunpack.c.l.bf16 %v7222_v53  ;;  %564 = vst.msk [vmem:[#allocation2 + $0x1e8] sm:$0xff] %vm502_vm1, %v7169_v9  ;;  %v7173_v57 = vunpack.c.h.bf16 %v7222_v53  ;;  %v714_v61 = vld [vmem:[#allocation2 + $0xd1] sm:$0xff]  ;;  %v715_v62 = vld [vmem:[#allocation2 + $0xd9] sm:$0xff]  ;;  %v2740_v7 = vpack.c.bf16 %v2690_v0, %v2689_v63  ;;  %s10167_s20 = scalar_lea.hbm %s10245_s6, %s6971_s8 }
  0x48   : > { %7538 = vmatmul.mubr.msk.bf16.gmra.mrb[12].mxu1 %vm502_vm1, %v759_v25  ;;  %583 = vst.msk [vmem:[#allocation2 + $0x200] sm:$0xff] %vm502_vm1, %v7176_v59  ;;  %v716_v1 = vld [vmem:[#allocation2 + $0xe1] sm:$0xff]  ;;  %v717_v2 = vld [vmem:[#allocation2 + $0xe9] sm:$0xff]  ;;  %v2691_v4 = vld [vmem:[#allocation2 + $0xf3] sm:$0xff]  ;;  %v765_v6 = vpack.c.bf16 %v715_v62, %v714_v61 }
  0x49   : > { %7541 = vmatprep.mubr.msk.bf16.mxu1 %vm502_vm1, %v760_v27  ;;  %565 = vst.msk [vmem:[#allocation2 + $0x1f0] sm:$0xff] %vm502_vm1, %v7172_v56  ;;  %566 = vst.msk [vmem:[#allocation2 + $0x1f8] sm:$0xff] %vm502_vm1, %v7173_v57  ;;  %v2692_v5 = vld [vmem:[#allocation2 + $0xfb] sm:$0xff]  ;;  %v766_v8 = vpack.c.bf16 %v717_v2, %v716_v1  ;;  %v718_v13 = vld [vmem:[#allocation2 + $0xf1] sm:$0xff] }
  0x4a   : > { %7802 = vmatmul.mubr.msk.bf16.gmra.mrb[12].mxu0 %vm502_vm1, %v2734_v26  ;;  %v2741_v12 = vpack.c.bf16 %v2692_v5, %v2691_v4  ;;  %584 = vst.msk [vmem:[#allocation2 + $0x208] sm:$0xff] %vm502_vm1, %v7177_v11  ;;  %v719_v14 = vld [vmem:[#allocation2 + $0xf9] sm:$0xff]  ;;  %v2693_v15 = vld [vmem:[#allocation2 + $0x103] sm:$0xff]  ;;  %v722_v25 = vld [vmem:[#allocation2 + $0x111] sm:$0xff] }
  0x4b   : > { %7805 = vmatprep.mubr.msk.bf16.mxu0 %vm502_vm1, %v2735_v28  ;;  %v720_v17 = vld [vmem:[#allocation2 + $0x101] sm:$0xff]  ;;  %v721_v18 = vld [vmem:[#allocation2 + $0x109] sm:$0xff]  ;;  %v3213_v19 = vld [vmem:[#allocation2 + $0x14] sm:$0xff]  ;;  %v767_v21 = vpack.c.bf16 %v719_v14, %v718_v13  ;;  %v2742_v22 = vpack.c.bf16 %v2694_v16, %v2693_v15 }
  0x4c   : > { %v3214_v20 = vld [vmem:[#allocation2 + $0x1c] sm:$0xff]  ;;  %v768_v23 = vpack.c.bf16 %v721_v18, %v720_v17  ;;  %v3215_v27 = vld [vmem:[#allocation2 + $0x24] sm:$0xff]  ;;  %v3216_v28 = vld [vmem:[#allocation2 + $0x2c] sm:$0xff] }
  0x4d   : > { %v3277_v24 = vpack.c.bf16 %v3214_v20, %v3213_v19  ;;  %v723_v26 = vld [vmem:[#allocation2 + $0x119] sm:$0xff]  ;;  %v724_v29 = vld [vmem:[#allocation2 + $0x121] sm:$0xff]  ;;  %v725_v30 = vld [vmem:[#allocation2 + $0x129] sm:$0xff]  ;;  %v9130_v34 = vpack.c.bf16 %v3216_v28, %v3215_v27 }
  0x4e   : > { %v3217_v31 = vld [vmem:[#allocation2 + $0x34] sm:$0xff]  ;;  %v3218_v32 = vld [vmem:[#allocation2 + $0x3c] sm:$0xff]  ;;  %v769_v33 = vpack.c.bf16 %v723_v26, %v722_v25  ;;  %v770_v35 = vpack.c.bf16 %v725_v30, %v724_v29  ;;  %v9133_v36 = vld [vmem:[%s9101_s18 + $0x8] sm:$0xff]  }
  0x4f   : > { %v726_v42 = vld [vmem:[#allocation2 + $0x131] sm:$0xff]  ;;  %v727_v43 = vld [vmem:[#allocation2 + $0x139] sm:$0xff]  ;;  %v3219_v44 = vld [vmem:[#allocation2 + $0x44] sm:$0xff] }
  0x50   : > { %7542 = vmatmul.mubr.msk.bf16.gmra.mrb[16].mxu1 %vm502_vm1, %v761_v37  ;;  %v9135_v37 = vpack.c.bf16 %v3218_v32, %v3217_v31  ;;  %v728_v45 = vld [vmem:[#allocation2 + $0x141] sm:$0xff]  ;;  %v729_v46 = vld [vmem:[#allocation2 + $0x149] sm:$0xff]  ;;  %v3221_v47 = vld [vmem:[#allocation2 + $0x54] sm:$0xff]  ;;  %v771_v49 = vpack.c.bf16 %v727_v43, %v726_v42 }
  0x51   : > { %7545 = vmatprep.mubr.msk.bf16.mxu1 %vm502_vm1, %v762_v39  ;;  %v3958_v39 = vsel %vm882_vm0, %v9044_v41, 0  ;;  %v3220_v41 = vld [vmem:[#allocation2 + $0x4c] sm:$0xff]  ;;  %v3222_v48 = vld [vmem:[#allocation2 + $0x5c] sm:$0xff]  ;;  %v772_v51 = vpack.c.bf16 %v729_v46, %v728_v45  ;;  %v3225_v10 = vld [vmem:[#allocation2 + $0x74] sm:$0xff] }
  0x52   : > { %7806 = vmatmul.mubr.msk.bf16.gmra.mrb[16].mxu0 %vm502_vm1, %v2736_v38  ;;  %v7180_v38 = vunpack.c.l.bf16 %v9133_v36  ;;  %v9154_v50 = vpack.c.bf16 %v3220_v41, %v3219_v44  ;;  %v9156_v9 = vpack.c.bf16 %v3222_v48, %v3221_v47  ;;  %v731_v53 = vld [vmem:[#allocation2 + $0x159] sm:$0xff]  ;;  %v732_v56 = vld [vmem:[#allocation2 + $0x161] sm:$0xff]  ;;  %v733_v57 = vld [vmem:[#allocation2 + $0x169] sm:$0xff] }
  0x53   : > { %7809 = vmatprep.mubr.msk.bf16.mxu0 %vm502_vm1, %v2737_v40  ;;  %v9145_v40 = vld [vmem:[%s10241_s2 + $0x1c] sm:$0xf]  ;;  %v774_v62 = vpack.c.bf16 %v733_v57, %v732_v56  ;;  %v734_v0 = vld [vmem:[#allocation2 + $0x171] sm:$0xff]  ;;  %v3227_v2 = vld [vmem:[#allocation2 + $0x84] sm:$0xff] }
  0x54   : > { %585 = vst.msk [vmem:[#allocation2 + $0x210] sm:$0xff] %vm502_vm1, %v7180_v38  ;;  %v735_v1 = vld [vmem:[#allocation2 + $0x179] sm:$0xff]  ;;  %v3228_v4 = vld [vmem:[#allocation2 + $0x8c] sm:$0xff]  ;;  %v736_v5 = vld [vmem:[#allocation2 + $0x181] sm:$0xff] }
  0x55   : > { %v775_v11 = vpack.c.bf16 %v735_v1, %v734_v0  ;;  %v738_v15 = vld [vmem:[#allocation2 + $0x191] sm:$0xff]  ;;  %v739_v16 = vld [vmem:[#allocation2 + $0x199] sm:$0xff]  ;;  %v3231_v17 = vld [vmem:[#allocation2 + $0xa4] sm:$0xff] }
  0x56   : > { %v3232_v18 = vld [vmem:[#allocation2 + $0xac] sm:$0xff]  ;;  %v740_v19 = vld [vmem:[#allocation2 + $0x1a1] sm:$0xff]  ;;  %v743_v28 = vld [vmem:[#allocation2 + $0x1b9] sm:$0xff] }
  0x57   : > { %v741_v20 = vld [vmem:[#allocation2 + $0x1a9] sm:$0xff]  ;;  %v742_v27 = vld [vmem:[#allocation2 + $0x1b1] sm:$0xff]  ;;  %v744_v31 = vld [vmem:[#allocation2 + $0x1c1] sm:$0xff] }
  0x58   : > { %7546 = vmatmul.mubr.msk.bf16.gmra.mrb[20].mxu1 %vm502_vm1, %v763_v52  ;;  %v730_v52 = vld [vmem:[#allocation2 + $0x151] sm:$0xff]  ;;  %v778_v25 = vpack.c.bf16 %v741_v20, %v740_v19  ;;  %v3235_v29 = vld [vmem:[#allocation2 + $0xc4] sm:$0xff]  ;;  %v779_v38 = vpack.c.bf16 %v743_v28, %v742_v27  ;;  %v747_v41 = vld [vmem:[#allocation2 + $0x1d9] sm:$0xff] }
  0x59   : > { %7549 = vmatprep.mubr.msk.bf16.mxu1 %vm502_vm1, %v764_v55  ;;  %v3224_v55 = vld [vmem:[#allocation2 + $0x6c] sm:$0xff]  ;;  %v773_v59 = vpack.c.bf16 %v731_v53, %v730_v52  ;;  %v3239_v45 = vld [vmem:[#allocation2 + $0xe4] sm:$0xff]  ;;  %v751_v57 = vld [vmem:[#allocation2 + $0x1f9] sm:$0xff] }
  0x5a   : > { %7810 = vmatmul.mubr.msk.bf16.gmra.mrb[20].mxu0 %vm502_vm1, %v2738_v54  ;;  %v3223_v54 = vld [vmem:[#allocation2 + $0x64] sm:$0xff]  ;;  %v3236_v30 = vld [vmem:[#allocation2 + $0xcc] sm:$0xff]  ;;  %v3245_v0 = vld [vmem:[#allocation2 + $0x114] sm:$0xff] }
  0x5b   : > { %7813 = vmatprep.mubr.msk.bf16.mxu0 %vm502_vm1, %v2739_v58  ;;  %v3226_v58 = vld [vmem:[#allocation2 + $0x7c] sm:$0xff]  ;;  %v9164_v61 = vpack.c.bf16 %v3224_v55, %v3223_v54  ;;  %v745_v32 = vld [vmem:[#allocation2 + $0x1c9] sm:$0xff]  ;;  %v746_v44 = vld [vmem:[#allocation2 + $0x1d1] sm:$0xff] }
  0x5c   : > { %v9166_v63 = vpack.c.bf16 %v3226_v58, %v3225_v10  ;;  %v780_v42 = vpack.c.bf16 %v745_v32, %v744_v31  ;;  %v3240_v46 = vld [vmem:[#allocation2 + $0xec] sm:$0xff]  ;;  %v748_v47 = vld [vmem:[#allocation2 + $0x1e1] sm:$0xff]  ;;  %v781_v52 = vpack.c.bf16 %v747_v41, %v746_v44  ;;  %v598_v28 = vld [vmem:[#allocation2 + $0x38] sm:$0xff] }
  0x5d   : > { %v749_v48 = vld [vmem:[#allocation2 + $0x1e9] sm:$0xff]  ;;  %v9204_v53 = vpack.c.bf16 %v3240_v46, %v3239_v45  ;;  %v750_v56 = vld [vmem:[#allocation2 + $0x1f1] sm:$0xff]  ;;  %v3246_v1 = vld [vmem:[#allocation2 + $0x11c] sm:$0xff] }
  0x5e   : > { %v782_v54 = vpack.c.bf16 %v749_v48, %v748_v47  ;;  %v3243_v10 = vld [vmem:[#allocation2 + $0x104] sm:$0xff]  ;;  %v3244_v58 = vld [vmem:[#allocation2 + $0x10c] sm:$0xff]  ;;  %v3253_v32 = vld [vmem:[#allocation2 + $0x154] sm:$0xff] }
  0x5f   : > { %v597_v27 = vld [vmem:[#allocation2 + $0x30] sm:$0xff]  ;;  %v600_v31 = vld [vmem:[#allocation2 + $0x48] sm:$0xff]  ;;  %v602_v45 = vld [vmem:[#allocation2 + $0x58] sm:$0xff] }
  0x60   : > { %7550 = vmatmul.mubr.msk.bf16.gmra.mrb[24].mxu1 %vm502_vm1, %v765_v6  ;;  %v737_v6 = vld [vmem:[#allocation2 + $0x189] sm:$0xff]  ;;  %v603_v48 = vld [vmem:[#allocation2 + $0x60] sm:$0xff] }
  0x61   : > { %7553 = vmatprep.mubr.msk.bf16.mxu1 %vm502_vm1, %v766_v8  ;;  %v3230_v8 = vld [vmem:[#allocation2 + $0x9c] sm:$0xff]  ;;  %v776_v13 = vpack.c.bf16 %v737_v6, %v736_v5  ;;  %v9216_v6 = vpack.c.bf16 %v3246_v1, %v3245_v0  ;;  %v601_v41 = vld [vmem:[#allocation2 + $0x50] sm:$0xff]  ;;  %v3255_v46 = vld [vmem:[#allocation2 + $0x164] sm:$0xff] }
  0x62   : > { %7814 = vmatmul.mubr.msk.bf16.gmra.mrb[24].mxu0 %vm502_vm1, %v2740_v7  ;;  %v3229_v7 = vld [vmem:[#allocation2 + $0x94] sm:$0xff]  ;;  %v3256_v47 = vld [vmem:[#allocation2 + $0x16c] sm:$0xff]  ;;  %v607_v1 = vld [vmem:[#allocation2 + $0x80] sm:$0xff] }
  0x63   : > { %7817 = vmatprep.mubr.msk.bf16.mxu0 %vm502_vm1, %v2741_v12  ;;  %v9174_v12 = vpack.c.bf16 %v3228_v4, %v3227_v2  ;;  %v9176_v14 = vpack.c.bf16 %v3230_v8, %v3229_v7  ;;  %v783_v2 = vpack.c.bf16 %v751_v57, %v750_v56  ;;  %v9214_v4 = vpack.c.bf16 %v3244_v58, %v3243_v10  ;;  %v593_v7 = vld [vmem:[#allocation2 + $0x10] sm:$0xff]  ;;  %v594_v8 = vld [vmem:[#allocation2 + $0x18] sm:$0xff] }
  0x64   : > { %v656_v19 = vpack.c.bf16 %v594_v8, %v593_v7  ;;  %v9253_v56 = vpack.c.bf16 %v3256_v47, %v3255_v46  ;;  %v605_v58 = vld [vmem:[#allocation2 + $0x70] sm:$0xff]  ;;  %v3262_v7 = vld [vmem:[#allocation2 + $0x19c] sm:$0xff] }
  0x65   : > { %v3260_v0 = vld [vmem:[#allocation2 + $0x18c] sm:$0xff]  ;;  %v3269_v46 = vld [vmem:[#allocation2 + $0x1d4] sm:$0xff]  ;;  %v3270_v47 = vld [vmem:[#allocation2 + $0x1dc] sm:$0xff] }
  0x68   : > { %7554 = vmatmul.mubr.msk.bf16.gmra.mrb[28].mxu1 %vm502_vm1, %v767_v21  ;;  %v3233_v21 = vld [vmem:[#allocation2 + $0xb4] sm:$0xff] }
  0x69   : > { %7557 = vmatprep.mubr.msk.bf16.mxu1 %vm502_vm1, %v768_v23  ;;  %v777_v23 = vpack.c.bf16 %v739_v16, %v738_v15  ;;  %v595_v15 = vld [vmem:[#allocation2 + $0x20] sm:$0xff]  ;;  %v596_v16 = vld [vmem:[#allocation2 + $0x28] sm:$0xff] }
  0x6a   : > { %7818 = vmatmul.mubr.msk.bf16.gmra.mrb[28].mxu0 %vm502_vm1, %v2742_v22  ;;  %v3234_v22 = vld [vmem:[#allocation2 + $0xbc] sm:$0xff] }
  0x6b   : > { %7855 = vmatprep.mubr.msk.bf16.mxu0 %vm502_vm1, %v3277_v24  ;;  %v9184_v24 = vpack.c.bf16 %v3232_v18, %v3231_v17  ;;  %v9186_v26 = vpack.c.bf16 %v3234_v22, %v3233_v21  ;;  %v3249_v17 = vld [vmem:[#allocation2 + $0x134] sm:$0xff]  ;;  %v3250_v18 = vld [vmem:[#allocation2 + $0x13c] sm:$0xff]  ;;  %v1758_v21 = vsel %vm882_vm0, %v9112_v60, 0  ;;  %v657_v22 = vpack.c.bf16 %v596_v16, %v595_v15  ;;  %v3252_v60 = vld [vmem:[#allocation2 + $0x14c] sm:$0xff] }
  0x6c   : > { %v609_v16 = vld [vmem:[#allocation2 + $0x90] sm:$0xff] }
  0x70   : > { %7558 = vmatmul.mubr.msk.bf16.gmra.mrb[32].mxu1 %vm502_vm1, %v769_v33  ;;  %v3237_v33 = vld [vmem:[#allocation2 + $0xd4] sm:$0xff] }
  0x71   : > { %7561 = vmatprep.mubr.msk.bf16.mxu1 %vm502_vm1, %v770_v35  ;;  %v3238_v35 = vld [vmem:[#allocation2 + $0xdc] sm:$0xff] }
  0x72   : > { %7856 = vmatmul.mubr.msk.bf16.vlgmr.msra.gmra.mrb[0].mxu0 %vm502_vm1, %v9130_v34  ;;  %v9196_v43 = vpack.c.bf16 %v3238_v35, %v3237_v33  ;;  %v3254_v33 = vld [vmem:[#allocation2 + $0x15c] sm:$0xff]  ;;  %v658_v35 = vpack.c.bf16 %v598_v28, %v597_v27  ;;  %v3265_v27 = vld [vmem:[#allocation2 + $0x1b4] sm:$0xff] }
  0x73   : > { %7920 = vmatpush3.bf16.msra.mxu0 %v3958_v39  ;;  %7859 = vmatprep.mubr.msk.bf16.mxu0 %vm502_vm1, %v9135_v37  ;;  %v9194_v39 = vpack.c.bf16 %v3236_v30, %v3235_v29  ;;  %v3251_v29 = vld [vmem:[#allocation2 + $0x144] sm:$0xff]  ;;  %v9245_v44 = vpack.c.bf16 %v3254_v33, %v3253_v32  ;;  %v3266_v28 = vld [vmem:[#allocation2 + $0x1bc] sm:$0xff]  ;;  %v613_v32 = vld [vmem:[#allocation2 + $0xb0] sm:$0xff] }
  0x74   : > { %8639 = vmatprep.subr.msk.bf16.mxu0 %vm882_vm0, %v9145_v40  ;;  %v599_v30 = vld [vmem:[#allocation2 + $0x40] sm:$0xff]  ;;  %v614_v33 = vld [vmem:[#allocation2 + $0xb8] sm:$0xff] }
  0x78   : > { %7562 = vmatmul.mubr.msk.bf16.gmra.mrb[36].mxu1 %vm502_vm1, %v771_v49  ;;  %v3241_v49 = vld [vmem:[#allocation2 + $0xf4] sm:$0xff] }
  0x79   : > { %7565 = vmatprep.mubr.msk.bf16.mxu1 %vm502_vm1, %v772_v51  ;;  %v3242_v51 = vld [vmem:[#allocation2 + $0xfc] sm:$0xff] }
  0x7a   : > { %7860 = vmatmul.mubr.msk.bf16.gmra.mrb[4].mxu0 %vm502_vm1, %v9154_v50  ;;  %v9206_v55 = vpack.c.bf16 %v3242_v51, %v3241_v49  ;;  %v604_v49 = vld [vmem:[#allocation2 + $0x68] sm:$0xff]  ;;  %v3257_v51 = vld [vmem:[#allocation2 + $0x174] sm:$0xff] }
  0x7b   : > { %7863 = vmatprep.mubr.msk.bf16.mxu0 %vm502_vm1, %v9156_v9  ;;  %v661_v57 = vpack.c.bf16 %v604_v49, %v603_v48  ;;  %v666_v48 = vpack.c.bf16 %v614_v33, %v613_v32  ;;  %v625_v33 = vld [vmem:[#allocation2 + $0x110] sm:$0xff] }
  0x80   : > { %7566 = vmatmul.mubr.msk.bf16.gmra.mrb[40].mxu1 %vm502_vm1, %v773_v59  ;;  %v591_v59 = vld [vmem:[#allocation2] sm:$0xff] }
  0x81   : > { %7569 = vmatprep.mubr.msk.bf16.mxu1 %vm502_vm1, %v774_v62  ;;  %v592_v62 = vld [vmem:[#allocation2 + $0x8] sm:$0xff] }
  0x82   : > { %7864 = vmatmul.mubr.msk.bf16.gmra.mrb[8].mxu0 %vm502_vm1, %v9164_v61  ;;  %v655_v5 = vpack.c.bf16 %v592_v62, %v591_v59  ;;  %v606_v59 = vld [vmem:[#allocation2 + $0x78] sm:$0xff]  ;;  %v3259_v62 = vld [vmem:[#allocation2 + $0x184] sm:$0xff] }
  0x83   : > { %7867 = vmatprep.mubr.msk.bf16.mxu0 %vm502_vm1, %v9166_v63  ;;  %v662_v8 = vpack.c.bf16 %v606_v59, %v605_v58  ;;  %v3271_v58 = vld [vmem:[#allocation2 + $0x1e4] sm:$0xff]  ;;  %v3272_v59 = vld [vmem:[#allocation2 + $0x1ec] sm:$0xff] }
  0x88   : > { %7570 = vmatmul.mubr.msk.bf16.gmra.mrb[44].mxu1 %vm502_vm1, %v775_v11  ;;  %v3247_v11 = vld [vmem:[#allocation2 + $0x124] sm:$0xff] }
  0x89   : > { %7573 = vmatprep.mubr.msk.bf16.mxu1 %vm502_vm1, %v776_v13  ;;  %v3248_v13 = vld [vmem:[#allocation2 + $0x12c] sm:$0xff] }
  0x8a   : > { %7868 = vmatmul.mubr.msk.bf16.gmra.mrb[12].mxu0 %vm502_vm1, %v9174_v12  ;;  %v9224_v20 = vpack.c.bf16 %v3248_v13, %v3247_v11  ;;  %v9263_v11 = vpack.c.bf16 %v3260_v0, %v3259_v62  ;;  %v619_v62 = vld [vmem:[#allocation2 + $0xe0] sm:$0xff]  ;;  %v620_v0 = vld [vmem:[#allocation2 + $0xe8] sm:$0xff] }
  0x8b   : > { %7871 = vmatprep.mubr.msk.bf16.mxu0 %vm502_vm1, %v9176_v14 }
  0x90   : > { %7574 = vmatmul.mubr.msk.bf16.gmra.mrb[48].mxu1 %vm502_vm1, %v777_v23  ;;  %v9228_v23 = vpack.c.bf16 %v3250_v18, %v3249_v17  ;;  %v610_v17 = vld [vmem:[#allocation2 + $0x98] sm:$0xff]  ;;  %v3263_v18 = vld [vmem:[#allocation2 + $0x1a4] sm:$0xff] }
  0x91   : > { %7577 = vmatprep.mubr.msk.bf16.mxu1 %vm502_vm1, %v778_v25  ;;  %v9234_v25 = vld [vmem:[%s10241_s2 + $0xc] sm:$0xf] }
  0x92   : > { %7872 = vmatmul.mubr.msk.bf16.gmra.mrb[16].mxu0 %vm502_vm1, %v9184_v24 }
  0x93   : > { %7875 = vmatprep.mubr.msk.bf16.mxu0 %vm502_vm1, %v9186_v26 }
  0x98   : > { %7578 = vmatmul.mubr.msk.bf16.gmra.mrb[52].mxu1 %vm502_vm1, %v779_v38  ;;  %v9243_v38 = vpack.c.bf16 %v3252_v60, %v3251_v29  ;;  %v664_v29 = vpack.c.bf16 %v610_v17, %v609_v16  ;;  %v7181_v16 = vunpack.c.h.bf16 %v9133_v36  ;;  %v3276_v36 = vld [vmem:[#allocation2 + $0x20c] sm:$0xff] }
  0x99   : > { %7581 = vmatprep.mubr.msk.bf16.mxu1 %vm502_vm1, %v780_v42  ;;  %v659_v42 = vpack.c.bf16 %v600_v31, %v599_v30  ;;  %v9275_v31 = vpack.c.bf16 %v3266_v28, %v3265_v27  ;;  %v623_v27 = vld [vmem:[#allocation2 + $0x100] sm:$0xff]  ;;  %v624_v28 = vld [vmem:[#allocation2 + $0x108] sm:$0xff] }
  0x9a   : > { %7876 = vmatmul.mubr.msk.bf16.gmra.mrb[20].mxu0 %vm502_vm1, %v9194_v39  ;;  %586 = vst.msk [vmem:[#allocation2 + $0x218] sm:$0xff] %vm502_vm1, %v7181_v16  ;;  %v671_v32 = vpack.c.bf16 %v624_v28, %v623_v27  ;;  %v641_v16 = vld [vmem:[#allocation2 + $0x190] sm:$0xff]  ;;  %v648_v27 = vld [vmem:[#allocation2 + $0x1c8] sm:$0xff] }
  0x9b   : > { %7879 = vmatprep.mubr.msk.bf16.mxu0 %vm502_vm1, %v9196_v43 }
  0xa0   : > { %7582 = vmatmul.mubr.msk.bf16.gmra.mrb[56].mxu1 %vm502_vm1, %v781_v52  ;;  %v3258_v52 = vld [vmem:[#allocation2 + $0x17c] sm:$0xff] }
  0xa1   : > { %7585 = vmatprep.mubr.msk.bf16.mxu1 %vm502_vm1, %v782_v54  ;;  %v660_v54 = vpack.c.bf16 %v602_v45, %v601_v41  ;;  %v9255_v10 = vpack.c.bf16 %v3258_v52, %v3257_v51  ;;  %v615_v41 = vld [vmem:[#allocation2 + $0xc0] sm:$0xff]  ;;  %v616_v45 = vld [vmem:[#allocation2 + $0xc8] sm:$0xff]  ;;  %v9285_v52 = vpack.c.bf16 %v3270_v47, %v3269_v46  ;;  %v4508_v47 = vsel %vm882_vm0, %v9145_v40, 0 }
  0xa2   : > { %7880 = vmatmul.mubr.msk.bf16.gmra.mrb[24].mxu0 %vm502_vm1, %v9204_v53  ;;  %v667_v51 = vpack.c.bf16 %v616_v45, %v615_v41  ;;  %v628_v41 = vld [vmem:[#allocation2 + $0x128] sm:$0xff] }
  0xa3   : > { %7883 = vmatprep.mubr.msk.bf16.mxu0 %vm502_vm1, %v9206_v55  ;;  %v632_v40 = vld [vmem:[#allocation2 + $0x148] sm:$0xff] }
  0xa8   : > { %7586 = vmatmul.mubr.msk.bf16.gmra.mrb[60].mxu1 %vm502_vm1, %v783_v2  ;;  %v608_v2 = vld [vmem:[#allocation2 + $0x88] sm:$0xff] }
  0xa9   : > { %7591 = vmatprep.mubr.msk.bf16.mxu1 %vm502_vm1, %v655_v5  ;;  %v3261_v5 = vld [vmem:[#allocation2 + $0x194] sm:$0xff]  ;;  %v663_v13 = vpack.c.bf16 %v608_v2, %v607_v1  ;;  %v3274_v2 = vld [vmem:[#allocation2 + $0x1fc] sm:$0xff] }
  0xaa   : > { %7884 = vmatmul.mubr.msk.bf16.gmra.mrb[28].mxu0 %vm502_vm1, %v9214_v4  ;;  %v9265_v15 = vpack.c.bf16 %v3262_v7, %v3261_v5  ;;  %v3273_v1 = vld [vmem:[#allocation2 + $0x1f4] sm:$0xff] }
  0xab   : > { %7887 = vmatprep.mubr.msk.bf16.mxu0 %vm502_vm1, %v9216_v6  ;;  %v7224_v7 = vld [vmem:[%s9101_s18 + $0x10] sm:$0xff]   ;;  %s10160_s18 = scalar_lea.hbm %s10244_s5, %s6971_s8 }
  0xac   : > { %v7184_v17 = vunpack.c.l.bf16 %v7224_v7  ;;  %v640_v7 = vld [vmem:[#allocation2 + $0x188] sm:$0xff] }
  0xae   : > { %587 = vst.msk [vmem:[#allocation2 + $0x220] sm:$0xff] %vm502_vm1, %v7184_v17  ;;  %v643_v17 = vld [vmem:[#allocation2 + $0x1a0] sm:$0xff] }
  0xb0   : > { %7592 = vmatmul.mubr.msk.bf16.vlgmr.msra.gmra.mrb[0].mxu1 %vm502_vm1, %v656_v19  ;;  %v3264_v19 = vld [vmem:[#allocation2 + $0x1ac] sm:$0xff] }
  0xb1   : > { %7656 = vmatpush3.bf16.msra.mxu1 %v1758_v21  ;;  %7595 = vmatprep.mubr.msk.bf16.mxu1 %vm502_vm1, %v657_v22  ;;  %v611_v21 = vld [vmem:[#allocation2 + $0xa0] sm:$0xff]  ;;  %v612_v22 = vld [vmem:[#allocation2 + $0xa8] sm:$0xff]  ;;  %v9273_v60 = vpack.c.bf16 %v3264_v19, %v3263_v18  ;;  %v9297_v18 = vpack.c.bf16 %v3274_v2, %v3273_v1  ;;  %v621_v19 = vld [vmem:[#allocation2 + $0xf0] sm:$0xff] }
  0xb2   : > { %7888 = vmatmul.mubr.msk.bf16.gmra.mrb[32].mxu0 %vm502_vm1, %v9224_v20  ;;  %8634 = vmatprep.subr.msk.bf16.mxu1 %vm882_vm0, %v9234_v25  ;;  %v665_v30 = vpack.c.bf16 %v612_v22, %v611_v21  ;;  %v622_v21 = vld [vmem:[#allocation2 + $0xf8] sm:$0xff]  ;;  %v3275_v22 = vld [vmem:[#allocation2 + $0x204] sm:$0xff]  ;;  %v637_v2 = vld [vmem:[#allocation2 + $0x170] sm:$0xff] }
  0xb3   : > { %7891 = vmatprep.mubr.msk.bf16.mxu0 %vm502_vm1, %v9228_v23 }
  0xb8   : > { %7596 = vmatmul.mubr.msk.bf16.gmra.mrb[4].mxu1 %vm502_vm1, %v658_v35  ;;  %v3267_v35 = vld [vmem:[#allocation2 + $0x1c4] sm:$0xff] }
  0xb9   : > { %7599 = vmatprep.mubr.msk.bf16.mxu1 %vm502_vm1, %v659_v42  ;;  %v3268_v42 = vld [vmem:[#allocation2 + $0x1cc] sm:$0xff] }
  0xba   : > { %7892 = vmatmul.mubr.msk.bf16.gmra.mrb[36].mxu0 %vm502_vm1, %v9243_v38  ;;  %v9283_v49 = vpack.c.bf16 %v3268_v42, %v3267_v35  ;;  %v626_v35 = vld [vmem:[#allocation2 + $0x118] sm:$0xff]  ;;  %v627_v42 = vld [vmem:[#allocation2 + $0x120] sm:$0xff] }
  0xbb   : > { %7895 = vmatprep.mubr.msk.bf16.mxu0 %vm502_vm1, %v9245_v44  ;;  %v672_v45 = vpack.c.bf16 %v626_v35, %v625_v33  ;;  %v673_v46 = vpack.c.bf16 %v628_v41, %v627_v42  ;;  %v652_v33 = vld [vmem:[#allocation2 + $0x1e8] sm:$0xff]  ;;  %v653_v42 = vld [vmem:[#allocation2 + $0x1f0] sm:$0xff] }
  0xbc   : > { %v1563_v41 = vld [vmem:[#allocation2 + $0x2] sm:$0xff] }
  0xc0   : > { %7600 = vmatmul.mubr.msk.bf16.gmra.mrb[8].mxu1 %vm502_vm1, %v660_v54  ;;  %v617_v54 = vld [vmem:[#allocation2 + $0xd0] sm:$0xff] }
  0xc1   : > { %7603 = vmatprep.mubr.msk.bf16.mxu1 %vm502_vm1, %v661_v57  ;;  %v618_v57 = vld [vmem:[#allocation2 + $0xd8] sm:$0xff] }
  0xc2   : > { %7896 = vmatmul.mubr.msk.bf16.gmra.mrb[40].mxu0 %vm502_vm1, %v9253_v56  ;;  %v668_v5 = vpack.c.bf16 %v618_v57, %v617_v54  ;;  %v631_v54 = vld [vmem:[#allocation2 + $0x140] sm:$0xff] }
  0xc3   : > { %7899 = vmatprep.mubr.msk.bf16.mxu0 %vm502_vm1, %v9255_v10 }
  0xc8   : > { %7604 = vmatmul.mubr.msk.bf16.gmra.mrb[12].mxu1 %vm502_vm1, %v662_v8  ;;  %v9294_v8 = vpack.c.bf16 %v3272_v59, %v3271_v58  ;;  %v675_v58 = vpack.c.bf16 %v632_v40, %v631_v54  ;;  %v634_v59 = vld [vmem:[#allocation2 + $0x158] sm:$0xff] }
  0xc9   : > { %7607 = vmatprep.mubr.msk.bf16.mxu1 %vm502_vm1, %v663_v13  ;;  %v669_v13 = vpack.c.bf16 %v620_v0, %v619_v62  ;;  %v636_v62 = vld [vmem:[#allocation2 + $0x168] sm:$0xff] }
  0xca   : > { %7900 = vmatmul.mubr.msk.bf16.gmra.mrb[44].mxu0 %vm502_vm1, %v9263_v11 }
  0xcb   : > { %7903 = vmatprep.mubr.msk.bf16.mxu0 %vm502_vm1, %v9265_v15 }
  0xd0   : > { %7608 = vmatmul.mubr.msk.bf16.gmra.mrb[16].mxu1 %vm502_vm1, %v664_v29  ;;  %v670_v29 = vpack.c.bf16 %v622_v21, %v621_v19  ;;  %v644_v19 = vld [vmem:[#allocation2 + $0x1a8] sm:$0xff] }
  0xd1   : > { %7611 = vmatprep.mubr.msk.bf16.mxu1 %vm502_vm1, %v665_v30  ;;  %v9307_v30 = vpack.c.bf16 %v3276_v36, %v3275_v22  ;;  %v645_v22 = vld [vmem:[#allocation2 + $0x1b0] sm:$0xff]  ;;  %v647_v36 = vld [vmem:[#allocation2 + $0x1c0] sm:$0xff] }
  0xd2   : > { %7904 = vmatmul.mubr.msk.bf16.gmra.mrb[48].mxu0 %vm502_vm1, %v9273_v60 }
  0xd3   : > { %7907 = vmatprep.mubr.msk.bf16.mxu0 %vm502_vm1, %v9275_v31 }
  0xd8   : > { %7612 = vmatmul.mubr.msk.bf16.gmra.mrb[20].mxu1 %vm502_vm1, %v666_v48  ;;  %v9321_v48 = vld [vmem:[%s10241_s2 + $0x20] sm:$0xf] }
  0xd9   : > { %7615 = vmatprep.mubr.msk.bf16.mxu1 %vm502_vm1, %v667_v51  ;;  %v630_v51 = vld [vmem:[#allocation2 + $0x138] sm:$0xff] }
  0xda   : > { %7908 = vmatmul.mubr.msk.bf16.gmra.mrb[52].mxu0 %vm502_vm1, %v9283_v49 }
  0xdb   : > { %7911 = vmatprep.mubr.msk.bf16.mxu0 %vm502_vm1, %v9285_v52 }
  0xe0   : > { %7616 = vmatmul.mubr.msk.bf16.gmra.mrb[24].mxu1 %vm502_vm1, %v668_v5  ;;  %v639_v5 = vld [vmem:[#allocation2 + $0x180] sm:$0xff] }
  0xe1   : > { %7619 = vmatprep.mubr.msk.bf16.mxu1 %vm502_vm1, %v669_v13 }
  0xe2   : > { %7912 = vmatmul.mubr.msk.bf16.gmra.mrb[56].mxu0 %vm502_vm1, %v9294_v8 }
  0xe3   : > { %7915 = vmatprep.mubr.msk.bf16.mxu0 %vm502_vm1, %v9297_v18 }
  0xe8   : > { %7620 = vmatmul.mubr.msk.bf16.gmra.mrb[28].mxu1 %vm502_vm1, %v670_v29  ;;  %v649_v29 = vld [vmem:[#allocation2 + $0x1d0] sm:$0xff] }
  0xe9   : > { %7623 = vmatprep.mubr.msk.bf16.mxu1 %vm502_vm1, %v671_v32  ;;  %v651_v32 = vld [vmem:[#allocation2 + $0x1e0] sm:$0xff] }
  0xea   : > { %7916 = vmatmul.mubr.msk.bf16.gmra.mrb[60].mxu0 %vm502_vm1, %v9307_v30 }
  0xeb   : > { %7921 = vmatprep.mubr.msk.bf16.mxu0 %vm502_vm1, %v9130_v34  ;;  %v629_v34 = vld [vmem:[#allocation2 + $0x130] sm:$0xff] }
  0xec   : > { %v674_v57 = vpack.c.bf16 %v630_v51, %v629_v34  ;;  %v1567_v34 = vld [vmem:[#allocation2 + $0x22] sm:$0xff]  ;;  %v1568_v51 = vld [vmem:[#allocation2 + $0x2a] sm:$0xff] }
  0xed   : > { %v9376_v40 = vpack.c.bf16 %v1568_v51, %v1567_v34  ;;  %v1595_v34 = vld [vmem:[#allocation2 + $0x102] sm:$0xff]  ;;  %v1596_v51 = vld [vmem:[#allocation2 + $0x10a] sm:$0xff] }
  0xf0   : > { %7624 = vmatmul.mubr.msk.bf16.gmra.mrb[32].mxu1 %vm502_vm1, %v672_v45  ;;  %v1564_v45 = vld [vmem:[#allocation2 + $0xa] sm:$0xff] }
  0xf1   : > { %7627 = vmatprep.mubr.msk.bf16.mxu1 %vm502_vm1, %v673_v46 }
  0xf2   : > { %7922 = vmatmul.mubr.msk.bf16.vlgmr.msra.gmra.mrb[0].mxu0 %vm502_vm1, %v9135_v37  ;;  %v633_v37 = vld [vmem:[#allocation2 + $0x150] sm:$0xff] }
  0xf3   : > { %7986 = vmatpush3.bf16.msra.mxu0 %v4508_v47  ;;  %7925 = vmatprep.mubr.msk.bf16.mxu0 %vm502_vm1, %v9154_v50  ;;  %v635_v50 = vld [vmem:[#allocation2 + $0x160] sm:$0xff]  ;;  %v676_v0 = vpack.c.bf16 %v634_v59, %v633_v37  ;;  %v1565_v47 = vld [vmem:[#allocation2 + $0x12] sm:$0xff] }
  0xf4   : > { %8640 = vmatprep.subr.msk.bf16.mxu0 %vm882_vm0, %v9321_v48  ;;  %v677_v1 = vpack.c.bf16 %v636_v62, %v635_v50  ;;  %v1574_v59 = vld [vmem:[#allocation2 + $0x5a] sm:$0xff]  ;;  %v1575_v50 = vld [vmem:[#allocation2 + $0x62] sm:$0xff]  ;;  %v1576_v62 = vld [vmem:[#allocation2 + $0x6a] sm:$0xff] }
  0xf8   : > { %7628 = vmatmul.mubr.msk.bf16.gmra.mrb[36].mxu1 %vm502_vm1, %v674_v57  ;;  %v1570_v57 = vld [vmem:[#allocation2 + $0x3a] sm:$0xff] }
  0xf9   : > { %7631 = vmatprep.mubr.msk.bf16.mxu1 %vm502_vm1, %v675_v58  ;;  %v8704_v58 = vld [vmem:[%s10241_s2 + $0x10] sm:$0xf] }
  0xfa   : > { %7926 = vmatmul.mubr.msk.bf16.gmra.mrb[4].mxu0 %vm502_vm1, %v9156_v9  ;;  %v638_v9 = vld [vmem:[#allocation2 + $0x178] sm:$0xff] }
  0xfb   : > { %7929 = vmatprep.mubr.msk.bf16.mxu0 %vm502_vm1, %v9164_v61  ;;  %v678_v13 = vpack.c.bf16 %v638_v9, %v637_v2  ;;  %v679_v61 = vpack.c.bf16 %v640_v7, %v639_v5  ;;  %v1579_v2 = vld [vmem:[#allocation2 + $0x82] sm:$0xff]  ;;  %v1580_v9 = vld [vmem:[#allocation2 + $0x8a] sm:$0xff]  ;;  %v8817_v5 = vmov 0  }
  0xfc   : > { %8702 = vset.pattern.permute.xlu0 %v8817_v5  ;;  %8703 = vset.pattern.permute.xlu1 %v8817_v5  ;;  %v4317_v5 = vld [vmem:[#allocation2 + $0x45] sm:$0xff] }
 0x100   : > { %7632 = vmatmul.mubr.msk.bf16.gmra.mrb[40].mxu1 %vm502_vm1, %v676_v0 }
 0x101   : > { %7635 = vmatprep.mubr.msk.bf16.mxu1 %vm502_vm1, %v677_v1  ;;  %v9405_v1 = vpack.c.bf16 %v1576_v62, %v1575_v50  ;;  %v4315_v50 = vld [vmem:[#allocation2 + $0x35] sm:$0xff] }
 0x102   : > { %7930 = vmatmul.mubr.msk.bf16.gmra.mrb[8].mxu0 %vm502_vm1, %v9166_v63  ;;  %v642_v63 = vld [vmem:[#allocation2 + $0x198] sm:$0xff] }
 0x103   : > { %7933 = vmatprep.mubr.msk.bf16.mxu0 %vm502_vm1, %v9174_v12  ;;  %v680_v21 = vpack.c.bf16 %v642_v63, %v641_v16  ;;  %v681_v12 = vpack.c.bf16 %v644_v19, %v643_v17  ;;  %v5415_v16 = vld [vmem:[%s9426_s19 + $0x10] sm:$0xff]  ;;  %v1583_v63 = vld [vmem:[#allocation2 + $0xa2] sm:$0xff]  ;;  %v5428_v62 = vld [vmem:[%s9426_s19 + $0x78] sm:$0xff] }
 0x104   : > { %v1584_v17 = vld [vmem:[#allocation2 + $0xaa] sm:$0xff]  ;;  %5489 = vperm.xlu1 %8703, %v5415_v16  }
 0x105   : > { %v5414_v19 = vld [vmem:[%s9426_s19 + $0x8] sm:$0xff]  ;;  %v5431_v16 = vld [vmem:[%s9426_s19 + $0x90] sm:$0xff] }
 0x108   : > { %7636 = vmatmul.mubr.msk.bf16.gmra.mrb[44].mxu1 %vm502_vm1, %v678_v13  ;;  %v9421_v13 = vpack.c.bf16 %v1580_v9, %v1579_v2  ;;  %v1599_v2 = vld [vmem:[#allocation2 + $0x122] sm:$0xff]  ;;  %v1600_v9 = vld [vmem:[#allocation2 + $0x12a] sm:$0xff] }
 0x109   : > { %7639 = vmatprep.mubr.msk.bf16.mxu1 %vm502_vm1, %v679_v61  ;;  %v5413_v61 = vld [vmem:[%s9426_s19] sm:$0xff] }
 0x10a   : > { %7934 = vmatmul.mubr.msk.bf16.gmra.mrb[12].mxu0 %vm502_vm1, %v9176_v14  ;;  %v646_v14 = vld [vmem:[#allocation2 + $0x1b8] sm:$0xff]  ;;  %5479 = vperm.xlu0 %8702, %v5413_v61  }
 0x10b   : > { %7937 = vmatprep.mubr.msk.bf16.mxu0 %vm502_vm1, %v9184_v24  ;;  %v682_v28 = vpack.c.bf16 %v646_v14, %v645_v22  ;;  %v683_v24 = vpack.c.bf16 %v648_v27, %v647_v36  ;;  %v5416_v22 = vld [vmem:[%s9426_s19 + $0x18] sm:$0xff]  ;;  %v5417_v14 = vld [vmem:[%s9426_s19 + $0x20] sm:$0xff]  ;;  %v1588_v27 = vld [vmem:[#allocation2 + $0xca] sm:$0xff] }
 0x10c   : > { %v1587_v36 = vld [vmem:[#allocation2 + $0xc2] sm:$0xff]  ;;  %5494 = vperm.xlu1 %8703, %v5416_v22   ;;  %v1602_v22 = vld [vmem:[#allocation2 + $0x13a] sm:$0xff] }
 0x10e   : > { %5484 = vperm.xlu0 %8702, %v5414_v19  }
 0x110   : > { %7640 = vmatmul.mubr.msk.bf16.gmra.mrb[48].mxu1 %vm502_vm1, %v680_v21 }
 0x111   : > { %7643 = vmatprep.mubr.msk.bf16.mxu1 %vm502_vm1, %v681_v12  ;;  %v1585_v12 = vld [vmem:[#allocation2 + $0xb2] sm:$0xff] }
 0x112   : > { %7938 = vmatmul.mubr.msk.bf16.gmra.mrb[16].mxu0 %vm502_vm1, %v9186_v26  ;;  %v650_v26 = vld [vmem:[#allocation2 + $0x1d8] sm:$0xff]  ;;  %5499 = vperm.xlu0 %8702, %v5417_v14  }
 0x113   : > { %7941 = vmatprep.mubr.msk.bf16.mxu0 %vm502_vm1, %v9194_v39  ;;  %v684_v35 = vpack.c.bf16 %v650_v26, %v649_v29  ;;  %v685_v39 = vpack.c.bf16 %v652_v33, %v651_v32  ;;  %v5419_v29 = vld [vmem:[%s9426_s19 + $0x30] sm:$0xff]  ;;  %v1590_v26 = vld [vmem:[#allocation2 + $0xda] sm:$0xff] }
 0x114   : > { %v5420_v32 = vld [vmem:[%s9426_s19 + $0x38] sm:$0xff]  ;;  %v5421_v33 = vld [vmem:[%s9426_s19 + $0x40] sm:$0xff] }
 0x115   : > { %v4319_v14 = vld [vmem:[#allocation2 + $0x55] sm:$0xff] }
 0x116   : > { %5509 = vperm.xlu0 %8702, %v5419_v29   ;;  %v1604_v29 = vld [vmem:[#allocation2 + $0x14a] sm:$0xff] }
 0x118   : > { %7644 = vmatmul.mubr.msk.bf16.gmra.mrb[52].mxu1 %vm502_vm1, %v682_v28  ;;  %v5418_v28 = vld [vmem:[%s9426_s19 + $0x28] sm:$0xff] }
 0x119   : > { %7647 = vmatprep.mubr.msk.bf16.mxu1 %vm502_vm1, %v683_v24  ;;  %5504 = vperm.xlu1 %8703, %v5418_v28   ;;  %v1603_v28 = vld [vmem:[#allocation2 + $0x142] sm:$0xff] }
 0x11a   : > { %7942 = vmatmul.mubr.msk.bf16.gmra.mrb[20].mxu0 %vm502_vm1, %v9196_v43  ;;  %v654_v43 = vld [vmem:[#allocation2 + $0x1f8] sm:$0xff]  ;;  %5519 = vperm.xlu0 %8702, %v5421_v33   ;;  %v5434_v33 = vld [vmem:[%s9426_s19 + $0xa8] sm:$0xff] }
 0x11b   : > { %7945 = vmatprep.mubr.msk.bf16.mxu0 %vm502_vm1, %v9204_v53  ;;  %v686_v46 = vpack.c.bf16 %v654_v43, %v653_v42  ;;  %v1627_v53 = vpack.c.bf16 %v1564_v45, %v1563_v41  ;;  %v5422_v42 = vld [vmem:[%s9426_s19 + $0x48] sm:$0xff]  ;;  %v5423_v41 = vld [vmem:[%s9426_s19 + $0x50] sm:$0xff] }
 0x11c   : > { %v1593_v45 = vld [vmem:[#allocation2 + $0xf2] sm:$0xff] }
 0x11d   : > { %5514 = vperm.xlu1 %8703, %v5420_v32  }
 0x11e   : > { %5529 = vperm.xlu0 %8702, %v5423_v41  }
 0x120   : > { %7648 = vmatmul.mubr.msk.bf16.gmra.mrb[56].mxu1 %vm502_vm1, %v684_v35  ;;  %v1591_v35 = vld [vmem:[#allocation2 + $0xe2] sm:$0xff] }
 0x121   : > { %7651 = vmatprep.mubr.msk.bf16.mxu1 %vm502_vm1, %v685_v39  ;;  %v1592_v39 = vld [vmem:[#allocation2 + $0xea] sm:$0xff]  ;;  %5524 = vperm.xlu1 %8703, %v5422_v42   ;;  %v9519_v42 = vpack.c.bf16 %v1604_v29, %v1603_v28  ;;  %v5444_v28 = vld [vmem:[%s9426_s19 + $0xf8] sm:$0xff]  ;;  %v5445_v29 = vld [vmem:[%s9426_s19 + $0x100] sm:$0xff] }
 0x122   : > { %7946 = vmatmul.mubr.msk.bf16.gmra.mrb[24].mxu0 %vm502_vm1, %v9206_v55  ;;  %v1566_v55 = vld [vmem:[#allocation2 + $0x1a] sm:$0xff] }
 0x123   : > { %7949 = vmatprep.mubr.msk.bf16.mxu0 %vm502_vm1, %v9214_v4  ;;  %v9372_v54 = vpack.c.bf16 %v1566_v55, %v1565_v47  ;;  %v2308_v4 = vsel %vm882_vm0, %v9234_v25, 0  ;;  %v1572_v25 = vld [vmem:[#allocation2 + $0x4a] sm:$0xff]  ;;  %v5425_v47 = vld [vmem:[%s9426_s19 + $0x60] sm:$0xff] }
 0x124   : > { %v3826_v55 = vld [vmem:[#allocation2 + $0x21c] sm:$0xff]  ;;  %5539 = vperm.xlu0 %8702, %v5425_v47  }
 0x125   : > { %v5437_v47 = vld [vmem:[%s9426_s19 + $0xc0] sm:$0xff] }
 0x128   : > { %7652 = vmatmul.mubr.msk.bf16.gmra.mrb[60].mxu1 %vm502_vm1, %v686_v46  ;;  %v3825_v46 = vld [vmem:[#allocation2 + $0x214] sm:$0xff] }
 0x129   : > { %7657 = vmatprep.mubr.msk.bf16.mxu1 %vm502_vm1, %v1627_v53  ;;  %v5424_v53 = vld [vmem:[%s9426_s19 + $0x58] sm:$0xff] }
 0x12a   : > { %7950 = vmatmul.mubr.msk.bf16.gmra.mrb[28].mxu0 %vm502_vm1, %v9216_v6  ;;  %v1569_v6 = vld [vmem:[#allocation2 + $0x32] sm:$0xff]  ;;  %5534 = vperm.xlu1 %8703, %v5424_v53  }
 0x12b   : > { %7953 = vmatprep.mubr.msk.bf16.mxu0 %vm502_vm1, %v9224_v20  ;;  %v1571_v20 = vld [vmem:[#allocation2 + $0x42] sm:$0xff]  ;;  %v9390_v37 = vpack.c.bf16 %v1570_v57, %v1569_v6  ;;  %v4314_v6 = vld [vmem:[#allocation2 + $0x2d] sm:$0xff]  ;;  %v5436_v53 = vld [vmem:[%s9426_s19 + $0xb8] sm:$0xff] }
 0x12c   : > { %v5426_v57 = vld [vmem:[%s9426_s19 + $0x68] sm:$0xff] }
 0x12e   : > { %5544 = vperm.xlu1 %8703, %v5426_v57  }
 0x130   : > { %7658 = vmatmul.mubr.msk.bf16.vlgmr.msra.gmra.mrb[0].mxu1 %vm502_vm1, %v9372_v54 }
 0x131   : > { %7722 = vmatpush3.bf16.msra.mxu1 %v2308_v4  ;;  %7661 = vmatprep.mubr.msk.bf16.mxu1 %vm502_vm1, %v9376_v40  ;;  %v4313_v4 = vld [vmem:[#allocation2 + $0x25] sm:$0xff] }
 0x132   : > { %7954 = vmatmul.mubr.msk.bf16.gmra.mrb[32].mxu0 %vm502_vm1, %v9228_v23  ;;  %8636 = vmatprep.subr.msk.bf16.mxu1 %vm882_vm0, %v8704_v58  ;;  %v9392_v23 = vpack.c.bf16 %v1572_v25, %v1571_v20  ;;  %v5427_v20 = vld [vmem:[%s9426_s19 + $0x70] sm:$0xff]  ;;  %v3858_v25 = vpack.c.bf16 %v3826_v55, %v3825_v46  ;;  %v9489_v58 = vpack.c.bf16 %v1596_v51, %v1595_v34  ;;  %v4324_v55 = vld [vmem:[#allocation2 + $0x7d] sm:$0xff] }
 0x133   : > { %7957 = vmatprep.mubr.msk.bf16.mxu0 %vm502_vm1, %v9243_v38  ;;  %v1573_v38 = vld [vmem:[#allocation2 + $0x52] sm:$0xff]  ;;  %5549 = vperm.xlu0 %8702, %v5427_v20   ;;  %v1607_v34 = vld [vmem:[#allocation2 + $0x162] sm:$0xff]  ;;  %v1608_v51 = vld [vmem:[#allocation2 + $0x16a] sm:$0xff] }
 0x134   : > { %v9403_v0 = vpack.c.bf16 %v1574_v59, %v1573_v38  ;;  %v4377_v38 = vpack.c.bf16 %v4314_v6, %v4313_v4  ;;  %v1598_v59 = vld [vmem:[#allocation2 + $0x11a] sm:$0xff]  ;;  %5554 = vperm.xlu1 %8703, %v5428_v62   ;;  %v4325_v4 = vld [vmem:[#allocation2 + $0x85] sm:$0xff]  ;;  %v4326_v6 = vld [vmem:[#allocation2 + $0x8d] sm:$0xff] }
 0x135   : > { %v4323_v46 = vld [vmem:[#allocation2 + $0x75] sm:$0xff]  ;;  %v5438_v20 = vld [vmem:[%s9426_s19 + $0xc8] sm:$0xff] }
 0x136   : > { %v1610_v62 = vld [vmem:[#allocation2 + $0x17a] sm:$0xff] }
 0x138   : > { %7662 = vmatmul.mubr.msk.bf16.gmra.mrb[4].mxu1 %vm502_vm1, %v9390_v37 }
 0x139   : > { %7665 = vmatprep.mubr.msk.bf16.mxu1 %vm502_vm1, %v9392_v23 }
 0x13a   : > { %7958 = vmatmul.mubr.msk.bf16.gmra.mrb[36].mxu0 %vm502_vm1, %v9245_v44  ;;  %v1577_v44 = vld [vmem:[#allocation2 + $0x72] sm:$0xff] }
 0x13b   : > { %7961 = vmatprep.mubr.msk.bf16.mxu0 %vm502_vm1, %v9253_v56  ;;  %v1578_v56 = vld [vmem:[#allocation2 + $0x7a] sm:$0xff] }
 0x13c   : > { %v9419_v7 = vpack.c.bf16 %v1578_v56, %v1577_v44  ;;  %v5429_v44 = vld [vmem:[%s9426_s19 + $0x80] sm:$0xff] }
 0x13d   : > { %v4316_v56 = vld [vmem:[#allocation2 + $0x3d] sm:$0xff]  ;;  %5559 = vperm.xlu0 %8702, %v5429_v44   ;;  %v4327_v44 = vld [vmem:[#allocation2 + $0x95] sm:$0xff] }
 0x140   : > { %7666 = vmatmul.mubr.msk.bf16.gmra.mrb[8].mxu1 %vm502_vm1, %v9403_v0 }
 0x141   : > { %7669 = vmatprep.mubr.msk.bf16.mxu1 %vm502_vm1, %v9405_v1  ;;  %5569 = vperm.xlu0 %8702, %v5431_v16   ;;  %v4330_v16 = vld [vmem:[#allocation2 + $0xad] sm:$0xff] }
 0x142   : > { %7962 = vmatmul.mubr.msk.bf16.gmra.mrb[40].mxu0 %vm502_vm1, %v9255_v10  ;;  %v1581_v10 = vld [vmem:[#allocation2 + $0x92] sm:$0xff] }
 0x143   : > { %7965 = vmatprep.mubr.msk.bf16.mxu0 %vm502_vm1, %v9263_v11  ;;  %v1582_v11 = vld [vmem:[#allocation2 + $0x9a] sm:$0xff] }
 0x144   : > { %v9439_v21 = vpack.c.bf16 %v1582_v11, %v1581_v10  ;;  %v4318_v10 = vld [vmem:[#allocation2 + $0x4d] sm:$0xff] }
 0x145   : > { %v5430_v11 = vld [vmem:[%s9426_s19 + $0x88] sm:$0xff]  ;;  %v4379_v19 = vpack.c.bf16 %v4318_v10, %v4317_v5 }
 0x146   : > { %5564 = vperm.xlu1 %8703, %v5430_v11   ;;  %v1611_v5 = vld [vmem:[#allocation2 + $0x182] sm:$0xff]  ;;  %v1612_v10 = vld [vmem:[#allocation2 + $0x18a] sm:$0xff] }
 0x147   : > { %v4329_v11 = vld [vmem:[#allocation2 + $0xa5] sm:$0xff] }
 0x148   : > { %7670 = vmatmul.mubr.msk.bf16.gmra.mrb[12].mxu1 %vm502_vm1, %v9419_v7 }
 0x149   : > { %7673 = vmatprep.mubr.msk.bf16.mxu1 %vm502_vm1, %v9421_v13 }
 0x14a   : > { %7966 = vmatmul.mubr.msk.bf16.gmra.mrb[44].mxu0 %vm502_vm1, %v9265_v15  ;;  %v9441_v15 = vpack.c.bf16 %v1584_v17, %v1583_v63  ;;  %v4378_v63 = vpack.c.bf16 %v4316_v56, %v4315_v50  ;;  %v9503_v17 = vpack.c.bf16 %v1600_v9, %v1599_v2  ;;  %v1609_v50 = vld [vmem:[#allocation2 + $0x172] sm:$0xff]  ;;  %v5441_v2 = vld [vmem:[%s9426_s19 + $0xe0] sm:$0xff] }
 0x14b   : > { %7969 = vmatprep.mubr.msk.bf16.mxu0 %vm502_vm1, %v9273_v60  ;;  %v1586_v60 = vld [vmem:[#allocation2 + $0xba] sm:$0xff] }
 0x14c   : > { %v9454_v24 = vpack.c.bf16 %v1586_v60, %v1585_v12  ;;  %v5058_v12 = vsel %vm882_vm0, %v9321_v48, 0  ;;  %v1601_v60 = vld [vmem:[#allocation2 + $0x132] sm:$0xff]  ;;  %v4320_v48 = vld [vmem:[#allocation2 + $0x5d] sm:$0xff] }
 0x14d   : > { %v9515_v32 = vpack.c.bf16 %v1602_v22, %v1601_v60  ;;  %v5440_v56 = vld [vmem:[%s9426_s19 + $0xd8] sm:$0xff]  ;;  %v9547_v22 = vpack.c.bf16 %v1612_v10, %v1611_v5 }
 0x14e   : > { %v4328_v9 = vld [vmem:[#allocation2 + $0x9d] sm:$0xff]  ;;  %v1621_v10 = vld [vmem:[#allocation2 + $0x1d2] sm:$0xff] }
 0x14f   : > { %v4384_v60 = vpack.c.bf16 %v4328_v9, %v4327_v44  ;;  %v5450_v44 = vld [vmem:[%s9426_s19 + $0x128] sm:$0xff] }
 0x150   : > { %7674 = vmatmul.mubr.msk.bf16.gmra.mrb[16].mxu1 %vm502_vm1, %v9439_v21 }
 0x151   : > { %7677 = vmatprep.mubr.msk.bf16.mxu1 %vm502_vm1, %v9441_v15 }
 0x152   : > { %7970 = vmatmul.mubr.msk.bf16.gmra.mrb[48].mxu0 %vm502_vm1, %v9275_v31  ;;  %v9457_v31 = vpack.c.bf16 %v1588_v27, %v1587_v36  ;;  %v5432_v36 = vld [vmem:[%s9426_s19 + $0x98] sm:$0xff]  ;;  %v5433_v27 = vld [vmem:[%s9426_s19 + $0xa0] sm:$0xff] }
 0x153   : > { %7973 = vmatprep.mubr.msk.bf16.mxu0 %vm502_vm1, %v9283_v49  ;;  %v1589_v49 = vld [vmem:[#allocation2 + $0xd2] sm:$0xff]  ;;  %5574 = vperm.xlu1 %8703, %v5432_v36  }
 0x154   : > { %v9470_v43 = vpack.c.bf16 %v1590_v26, %v1589_v49  ;;  %v4321_v49 = vld [vmem:[#allocation2 + $0x65] sm:$0xff]  ;;  %v4322_v26 = vld [vmem:[#allocation2 + $0x6d] sm:$0xff]  ;;  %5579 = vperm.xlu0 %8702, %v5433_v27   ;;  %v1614_v27 = vld [vmem:[#allocation2 + $0x19a] sm:$0xff] }
 0x155   : > { %v4381_v41 = vpack.c.bf16 %v4322_v26, %v4321_v49  ;;  %v1613_v36 = vld [vmem:[#allocation2 + $0x192] sm:$0xff]  ;;  %v4332_v49 = vld [vmem:[#allocation2 + $0xbd] sm:$0xff] }
 0x156   : > { %v1615_v26 = vld [vmem:[#allocation2 + $0x1a2] sm:$0xff] }
 0x157   : > { %5584 = vperm.xlu1 %8703, %v5434_v33   ;;  %v1616_v33 = vld [vmem:[#allocation2 + $0x1aa] sm:$0xff] }
 0x158   : > { %7678 = vmatmul.mubr.msk.bf16.gmra.mrb[20].mxu1 %vm502_vm1, %v9454_v24 }
 0x159   : > { %7681 = vmatprep.mubr.msk.bf16.mxu1 %vm502_vm1, %v9457_v31 }
 0x15a   : > { %7974 = vmatmul.mubr.msk.bf16.gmra.mrb[52].mxu0 %vm502_vm1, %v9285_v52  ;;  %v9473_v52 = vpack.c.bf16 %v1592_v39, %v1591_v35  ;;  %v5435_v35 = vld [vmem:[%s9426_s19 + $0xb0] sm:$0xff]  ;;  %v4380_v39 = vpack.c.bf16 %v4320_v48, %v4319_v14  ;;  %v4385_v14 = vpack.c.bf16 %v4330_v16, %v4329_v11  ;;  %v1622_v11 = vld [vmem:[#allocation2 + $0x1da] sm:$0xff] }
 0x15b   : > { %7977 = vmatprep.mubr.msk.bf16.mxu0 %vm502_vm1, %v9294_v8  ;;  %v1594_v8 = vld [vmem:[#allocation2 + $0xfa] sm:$0xff]  ;;  %5589 = vperm.xlu0 %8702, %v5435_v35   ;;  %v4333_v35 = vld [vmem:[#allocation2 + $0xc5] sm:$0xff] }
 0x15c   : > { %5594 = vperm.xlu1 %8703, %v5436_v53   ;;  %v4331_v48 = vld [vmem:[#allocation2 + $0xb5] sm:$0xff]  ;;  %v9561_v53 = vpack.c.bf16 %v1616_v33, %v1615_v26 }
 0x15d   : > { %v4339_v16 = vld [vmem:[#allocation2 + $0xf5] sm:$0xff] }
 0x15f   : > { %5599 = vperm.xlu0 %8702, %v5437_v47  }
 0x160   : > { %7682 = vmatmul.mubr.msk.bf16.gmra.mrb[24].mxu1 %vm502_vm1, %v9470_v43  ;;  %5604 = vperm.xlu1 %8703, %v5438_v20   ;;  %v4336_v20 = vld [vmem:[#allocation2 + $0xdd] sm:$0xff] }
 0x161   : > { %7685 = vmatprep.mubr.msk.bf16.mxu1 %vm502_vm1, %v9473_v52 }
 0x162   : > { %7978 = vmatmul.mubr.msk.bf16.gmra.mrb[56].mxu0 %vm502_vm1, %v9297_v18  ;;  %v9486_v18 = vpack.c.bf16 %v1594_v8, %v1593_v45  ;;  %v1605_v45 = vld [vmem:[#allocation2 + $0x152] sm:$0xff]  ;;  %v1606_v8 = vld [vmem:[#allocation2 + $0x15a] sm:$0xff] }
 0x163   : > { %7981 = vmatprep.mubr.msk.bf16.mxu0 %vm502_vm1, %v9307_v30  ;;  %v1597_v30 = vld [vmem:[#allocation2 + $0x112] sm:$0xff]  ;;  %v9529_v57 = vpack.c.bf16 %v1606_v8, %v1605_v45  ;;  %v5446_v45 = vld [vmem:[%s9426_s19 + $0x108] sm:$0xff] }
 0x164   : > { %v9500_v61 = vpack.c.bf16 %v1598_v59, %v1597_v30  ;;  %v9533_v30 = vpack.c.bf16 %v1608_v51, %v1607_v34  ;;  %v4383_v59 = vpack.c.bf16 %v4326_v6, %v4325_v4  ;;  %5614 = vperm.xlu1 %8703, %v5440_v56   ;;  %v5447_v8 = vld [vmem:[%s9426_s19 + $0x110] sm:$0xff]  ;;  %v1618_v34 = vld [vmem:[#allocation2 + $0x1ba] sm:$0xff] }
 0x165   : > { %v4335_v51 = vld [vmem:[#allocation2 + $0xd5] sm:$0xff]  ;;  %v5449_v6 = vld [vmem:[%s9426_s19 + $0x120] sm:$0xff] }
 0x166   : > { %v5448_v4 = vld [vmem:[%s9426_s19 + $0x118] sm:$0xff]  ;;  %v5451_v56 = vld [vmem:[%s9426_s19 + $0x130] sm:$0xff] }
 0x168   : > { %7686 = vmatmul.mubr.msk.bf16.gmra.mrb[28].mxu1 %vm502_vm1, %v9486_v18 }
 0x169   : > { %7689 = vmatprep.mubr.msk.bf16.mxu1 %vm502_vm1, %v9489_v58 }
 0x16a   : > { %7982 = vmatmul.mubr.msk.bf16.gmra.mrb[60].mxu0 %vm502_vm1, %v3858_v25  ;;  %v5439_v25 = vld [vmem:[%s9426_s19 + $0xd0] sm:$0xff] }
 0x16b   : > { %7987 = vmatprep.mubr.msk.bf16.mxu0 %vm502_vm1, %v4377_v38  ;;  %v4382_v38 = vpack.c.bf16 %v4324_v55, %v4323_v46  ;;  %5609 = vperm.xlu0 %8702, %v5439_v25   ;;  %v4386_v46 = vpack.c.bf16 %v4332_v49, %v4331_v48  ;;  %v1617_v55 = vld [vmem:[#allocation2 + $0x1b2] sm:$0xff]  ;;  %v1619_v25 = vld [vmem:[#allocation2 + $0x1c2] sm:$0xff] }
 0x16c   : > { %v4342_v48 = vld [vmem:[#allocation2 + $0x10d] sm:$0xff] }
 0x16d   : > { %v5455_v49 = vld [vmem:[%s9426_s19 + $0x150] sm:$0xff] }
 0x16f   : > { %5619 = vperm.xlu0 %8702, %v5441_v2   ;;  %v4388_v2 = vpack.c.bf16 %v4336_v20, %v4335_v51  ;;  %v4346_v51 = vld [vmem:[#allocation2 + $0x12d] sm:$0xff] }
 0x170   : > { %7690 = vmatmul.mubr.msk.bf16.gmra.mrb[32].mxu1 %vm502_vm1, %v9500_v61  ;;  %v5459_v20 = vld [vmem:[%s9426_s19 + $0x170] sm:$0xff] }
 0x171   : > { %7693 = vmatprep.mubr.msk.bf16.mxu1 %vm502_vm1, %v9503_v17 }
 0x172   : > { %7988 = vmatmul.mubr.msk.bf16.vlgmr.msra.gmra.mrb[0].mxu0 %vm502_vm1, %v4378_v63  ;;  %v9543_v63 = vpack.c.bf16 %v1610_v62, %v1609_v50  ;;  %v4338_v50 = vld [vmem:[#allocation2 + $0xed] sm:$0xff]  ;;  %v9571_v62 = vpack.c.bf16 %v1618_v34, %v1617_v55  ;;  %v4344_v55 = vld [vmem:[#allocation2 + $0x11d] sm:$0xff]  ;;  %v4345_v34 = vld [vmem:[#allocation2 + $0x125] sm:$0xff] }
 0x173   : > { %8052 = vmatpush3.bf16.msra.mxu0 %v5058_v12  ;;  %7991 = vmatprep.mubr.msk.bf16.mxu0 %vm502_vm1, %v4379_v19  ;;  %v5442_v19 = vld [vmem:[%s9426_s19 + $0xe8] sm:$0xff]  ;;  %v5443_v12 = vld [vmem:[%s9426_s19 + $0xf0] sm:$0xff] }
 0x174   : > { %5624 = vperm.xlu1 %8703, %v5442_v19   ;;  %5629 = vperm.xlu0 %8702, %v5443_v12   ;;  %v5452_v19 = vld [vmem:[%s9426_s19 + $0x138] sm:$0xff]  ;;  %v5453_v12 = vld [vmem:[%s9426_s19 + $0x140] sm:$0xff] }
 0x178   : > { %7694 = vmatmul.mubr.msk.bf16.gmra.mrb[36].mxu1 %vm502_vm1, %v9515_v32  ;;  %5634 = vperm.xlu1 %8703, %v5444_v28   ;;  %v9585_v28 = vpack.c.bf16 %v1622_v11, %v1621_v10  ;;  %v5462_v10 = vld [vmem:[%s9426_s19 + $0x188] sm:$0xff]  ;;  %v5463_v11 = vld [vmem:[%s9426_s19 + $0x190] sm:$0xff] }
 0x179   : > { %7697 = vmatprep.mubr.msk.bf16.mxu1 %vm502_vm1, %v9519_v42  ;;  %5639 = vperm.xlu0 %8702, %v5445_v29   ;;  %v5454_v29 = vld [vmem:[%s9426_s19 + $0x148] sm:$0xff] }
 0x17a   : > { %7992 = vmatmul.mubr.msk.bf16.gmra.mrb[4].mxu0 %vm502_vm1, %v4380_v39  ;;  %v4334_v39 = vld [vmem:[#allocation2 + $0xcd] sm:$0xff] }
 0x17b   : > { %7995 = vmatprep.mubr.msk.bf16.mxu0 %vm502_vm1, %v4381_v41  ;;  %v9557_v41 = vpack.c.bf16 %v1614_v27, %v1613_v36  ;;  %v4387_v47 = vpack.c.bf16 %v4334_v39, %v4333_v35  ;;  %v1624_v36 = vld [vmem:[#allocation2 + $0x1ea] sm:$0xff]  ;;  %v1625_v39 = vld [vmem:[#allocation2 + $0x1f2] sm:$0xff] }
 0x17c   : > { %5644 = vperm.xlu1 %8703, %v5446_v45   ;;  %v4341_v27 = vld [vmem:[#allocation2 + $0x105] sm:$0xff]  ;;  %v1626_v45 = vld [vmem:[#allocation2 + $0x1fa] sm:$0xff] }
 0x17d   : > { %5649 = vperm.xlu0 %8702, %v5447_v8   ;;  %v4391_v35 = vpack.c.bf16 %v4342_v48, %v4341_v27  ;;  %v5456_v8 = vld [vmem:[%s9426_s19 + $0x158] sm:$0xff]  ;;  %v4354_v27 = vld [vmem:[#allocation2 + $0x16d] sm:$0xff] }
 0x17e   : > { %v5467_v48 = vld [vmem:[%s9426_s19 + $0x1b0] sm:$0xff] }
 0x180   : > { %7698 = vmatmul.mubr.msk.bf16.gmra.mrb[40].mxu1 %vm502_vm1, %v9529_v57  ;;  %5654 = vperm.xlu1 %8703, %v5448_v4   ;;  %v9599_v4 = vpack.c.bf16 %v1626_v45, %v1625_v39  ;;  %v4357_v39 = vld [vmem:[#allocation2 + $0x185] sm:$0xff]  ;;  %v4358_v45 = vld [vmem:[#allocation2 + $0x18d] sm:$0xff] }
 0x181   : > { %7701 = vmatprep.mubr.msk.bf16.mxu1 %vm502_vm1, %v9533_v30  ;;  %5659 = vperm.xlu0 %8702, %v5449_v6   ;;  %v5458_v6 = vld [vmem:[%s9426_s19 + $0x168] sm:$0xff] }
 0x182   : > { %7996 = vmatmul.mubr.msk.bf16.gmra.mrb[8].mxu0 %vm502_vm1, %v4382_v38  ;;  %v1620_v38 = vld [vmem:[#allocation2 + $0x1ca] sm:$0xff] }
 0x183   : > { %7999 = vmatprep.mubr.msk.bf16.mxu0 %vm502_vm1, %v4383_v59  ;;  %v4337_v59 = vld [vmem:[#allocation2 + $0xe5] sm:$0xff]  ;;  %v9575_v9 = vpack.c.bf16 %v1620_v38, %v1619_v25  ;;  %v4393_v38 = vpack.c.bf16 %v4346_v51, %v4345_v34  ;;  %v4359_v34 = vld [vmem:[#allocation2 + $0x195] sm:$0xff]  ;;  %v4360_v51 = vld [vmem:[#allocation2 + $0x19d] sm:$0xff] }
 0x184   : > { %v4389_v5 = vpack.c.bf16 %v4338_v50, %v4337_v59  ;;  %5664 = vperm.xlu1 %8703, %v5450_v44   ;;  %v5460_v59 = vld [vmem:[%s9426_s19 + $0x178] sm:$0xff]  ;;  %v5461_v50 = vld [vmem:[%s9426_s19 + $0x180] sm:$0xff] }
 0x185   : > { %5669 = vperm.xlu0 %8702, %v5451_v56   ;;  %v4347_v44 = vld [vmem:[#allocation2 + $0x135] sm:$0xff]  ;;  %v4348_v56 = vld [vmem:[#allocation2 + $0x13d] sm:$0xff] }
 0x188   : > { %7702 = vmatmul.mubr.msk.bf16.gmra.mrb[44].mxu1 %vm502_vm1, %v9543_v63  ;;  %5674 = vperm.xlu1 %8703, %v5452_v19  }
 0x189   : > { %7705 = vmatprep.mubr.msk.bf16.mxu1 %vm502_vm1, %v9547_v22  ;;  %5679 = vperm.xlu0 %8702, %v5453_v12   ;;  %v5465_v12 = vld [vmem:[%s9426_s19 + $0x1a0] sm:$0xff] }
 0x18a   : > { %8000 = vmatmul.mubr.msk.bf16.gmra.mrb[12].mxu0 %vm502_vm1, %v4384_v60  ;;  %v4340_v60 = vld [vmem:[#allocation2 + $0xfd] sm:$0xff] }
 0x18b   : > { %8003 = vmatprep.mubr.msk.bf16.mxu0 %vm502_vm1, %v4385_v14  ;;  %v1623_v14 = vld [vmem:[#allocation2 + $0x1e2] sm:$0xff]  ;;  %v4390_v26 = vpack.c.bf16 %v4340_v60, %v4339_v16  ;;  %v4394_v16 = vpack.c.bf16 %v4348_v56, %v4347_v44  ;;  %v4351_v60 = vld [vmem:[#allocation2 + $0x155] sm:$0xff] }
 0x18c   : > { %v9589_v33 = vpack.c.bf16 %v1624_v36, %v1623_v14  ;;  %5684 = vperm.xlu1 %8703, %v5454_v29   ;;  %v4352_v14 = vld [vmem:[#allocation2 + $0x15d] sm:$0xff]  ;;  %v4353_v36 = vld [vmem:[#allocation2 + $0x165] sm:$0xff] }
 0x18d   : > { %5689 = vperm.xlu0 %8702, %v5455_v49   ;;  %v4397_v29 = vpack.c.bf16 %v4354_v27, %v4353_v36  ;;  %v5469_v49 = vld [vmem:[%s9426_s19 + $0x1c0] sm:$0xff] }
 0x18e   : > { %v4364_v44 = vld [vmem:[#allocation2 + $0x1bd] sm:$0xff]  ;;  %v4365_v56 = vld [vmem:[#allocation2 + $0x1c5] sm:$0xff] }
 0x18f   : > { %v4863_v27 = vld [vmem:[#allocation2 + $0x26] sm:$0xff] }
 0x190   : > { %7706 = vmatmul.mubr.msk.bf16.gmra.mrb[48].mxu1 %vm502_vm1, %v9557_v41  ;;  %5694 = vperm.xlu1 %8703, %v5456_v8   ;;  %v5470_v8 = vld [vmem:[%s9426_s19 + $0x1c8] sm:$0xff] }
 0x191   : > { %7709 = vmatprep.mubr.msk.bf16.mxu1 %vm502_vm1, %v9561_v53 }
 0x192   : > { %8004 = vmatmul.mubr.msk.bf16.gmra.mrb[16].mxu0 %vm502_vm1, %v4386_v46  ;;  %v5457_v46 = vld [vmem:[%s9426_s19 + $0x160] sm:$0xff] }
 0x193   : > { %8007 = vmatprep.mubr.msk.bf16.mxu0 %vm502_vm1, %v4387_v47  ;;  %v4343_v47 = vld [vmem:[#allocation2 + $0x115] sm:$0xff]  ;;  %5699 = vperm.xlu0 %8702, %v5457_v46  }
 0x194   : > { %v4392_v25 = vpack.c.bf16 %v4344_v55, %v4343_v47  ;;  %5704 = vperm.xlu1 %8703, %v5458_v6   ;;  %v5471_v46 = vld [vmem:[%s9426_s19 + $0x1d0] sm:$0xff]  ;;  %v4399_v47 = vpack.c.bf16 %v4358_v45, %v4357_v39  ;;  %v5473_v55 = vld [vmem:[%s9426_s19 + $0x1e0] sm:$0xff] }
 0x195   : > { %v4361_v6 = vld [vmem:[#allocation2 + $0x1a5] sm:$0xff]  ;;  %v4872_v39 = vld [vmem:[#allocation2 + $0x6e] sm:$0xff] }
 0x197   : > { %5709 = vperm.xlu0 %8702, %v5459_v20   ;;  %v4362_v20 = vld [vmem:[#allocation2 + $0x1ad] sm:$0xff] }
 0x198   : > { %7710 = vmatmul.mubr.msk.bf16.gmra.mrb[52].mxu1 %vm502_vm1, %v9571_v62  ;;  %5714 = vperm.xlu1 %8703, %v5460_v59   ;;  %v4400_v59 = vpack.c.bf16 %v4360_v51, %v4359_v34  ;;  %v4880_v34 = vld [vmem:[#allocation2 + $0xae] sm:$0xff] }
 0x199   : > { %7713 = vmatprep.mubr.msk.bf16.mxu1 %vm502_vm1, %v9575_v9 }
 0x19a   : > { %8008 = vmatmul.mubr.msk.bf16.gmra.mrb[20].mxu0 %vm502_vm1, %v4388_v2  ;;  %v4349_v2 = vld [vmem:[#allocation2 + $0x145] sm:$0xff] }
 0x19b   : > { %8011 = vmatprep.mubr.msk.bf16.mxu0 %vm502_vm1, %v4389_v5  ;;  %v4350_v5 = vld [vmem:[#allocation2 + $0x14d] sm:$0xff]  ;;  %5719 = vperm.xlu0 %8702, %v5461_v50   ;;  %v4363_v50 = vld [vmem:[#allocation2 + $0x1b5] sm:$0xff] }
 0x19c   : > { %v4395_v19 = vpack.c.bf16 %v4350_v5, %v4349_v2  ;;  %5724 = vperm.xlu1 %8703, %v5462_v10   ;;  %v4366_v2 = vld [vmem:[#allocation2 + $0x1cd] sm:$0xff]  ;;  %v4402_v5 = vpack.c.bf16 %v4364_v44, %v4363_v50 }
 0x19d   : > { %v4403_v10 = vpack.c.bf16 %v4366_v2, %v4365_v56  ;;  %v4891_v56 = vld [vmem:[#allocation2 + $0x106] sm:$0xff]  ;;  %v4892_v2 = vld [vmem:[#allocation2 + $0x10e] sm:$0xff] }
 0x19f   : > { %5729 = vperm.xlu0 %8702, %v5463_v11   ;;  %v4369_v11 = vld [vmem:[#allocation2 + $0x1e5] sm:$0xff] }
 0x1a0   : > { %7714 = vmatmul.mubr.msk.bf16.gmra.mrb[56].mxu1 %vm502_vm1, %v9585_v28 }
 0x1a1   : > { %7717 = vmatprep.mubr.msk.bf16.mxu1 %vm502_vm1, %v9589_v33 }
 0x1a2   : > { %8012 = vmatmul.mubr.msk.bf16.gmra.mrb[24].mxu0 %vm502_vm1, %v4390_v26  ;;  %v4355_v26 = vld [vmem:[#allocation2 + $0x175] sm:$0xff] }
 0x1a3   : > { %8015 = vmatprep.mubr.msk.bf16.mxu0 %vm502_vm1, %v4391_v35  ;;  %5739 = vperm.xlu0 %8702, %v5465_v12   ;;  %v4356_v35 = vld [vmem:[#allocation2 + $0x17d] sm:$0xff]  ;;  %v4373_v12 = vld [vmem:[#allocation2 + $0x205] sm:$0xff] }
 0x1a7   : > { %5749 = vperm.xlu0 %8702, %v5467_v48  }
 0x1a8   : > { %7718 = vmatmul.mubr.msk.bf16.gmra.mrb[60].mxu1 %vm502_vm1, %v9599_v4 }
 0x1a9   : > { %7723 = vmatprep.mubr.msk.bf16.mxu1 %vm502_vm1, %v9372_v54  ;;  %v5464_v54 = vld [vmem:[%s9426_s19 + $0x198] sm:$0xff] }
 0x1aa   : > { %8016 = vmatmul.mubr.msk.bf16.gmra.mrb[28].mxu0 %vm502_vm1, %v4392_v25  ;;  %5734 = vperm.xlu1 %8703, %v5464_v54   ;;  %v5474_v25 = vld [vmem:[%s9426_s19 + $0x1e8] sm:$0xff] }
 0x1ab   : > { %8019 = vmatprep.mubr.msk.bf16.mxu0 %vm502_vm1, %v4393_v38  ;;  %5759 = vperm.xlu0 %8702, %v5469_v49   ;;  %v5475_v38 = vld [vmem:[%s9426_s19 + $0x1f0] sm:$0xff] }
 0x1af   : > { %5769 = vperm.xlu0 %8702, %v5471_v46   ;;  %v4875_v46 = vld [vmem:[#allocation2 + $0x86] sm:$0xff] }
 0x1b0   : > { %7724 = vmatmul.mubr.msk.bf16.vlgmr.msra.gmra.mrb[0].mxu1 %vm502_vm1, %v9376_v40  ;;  %v5466_v40 = vld [vmem:[%s9426_s19 + $0x1a8] sm:$0xff] }
 0x1b1   : > { %8118 = vmatpush3.bf16.msra.mxu1 %v8923_v3  ;;  %7727 = vmatprep.mubr.msk.bf16.mxu1 %vm502_vm1, %v9390_v37  ;;  %v4396_v3 = vpack.c.bf16 %v4352_v14, %v4351_v60  ;;  %v5468_v37 = vld [vmem:[%s9426_s19 + $0x1b8] sm:$0xff]  ;;  %v4374_v60 = vld [vmem:[#allocation2 + $0x20d] sm:$0xff] }
 0x1b2   : > { %8020 = vmatmul.mubr.msk.bf16.gmra.mrb[32].mxu0 %vm502_vm1, %v4394_v16  ;;  %5744 = vperm.xlu1 %8703, %v5466_v40   ;;  %v4370_v16 = vld [vmem:[#allocation2 + $0x1ed] sm:$0xff]  ;;  %v4407_v36 = vpack.c.bf16 %v4374_v60, %v4373_v12 }
 0x1b3   : > { %8023 = vmatprep.mubr.msk.bf16.mxu0 %vm502_vm1, %v4395_v19  ;;  %5779 = vperm.xlu0 %8702, %v5473_v55   ;;  %v4405_v54 = vpack.c.bf16 %v4370_v16, %v4369_v11  ;;  %v4864_v40 = vld [vmem:[#allocation2 + $0x2e] sm:$0xff]  ;;  %v4879_v55 = vld [vmem:[#allocation2 + $0xa6] sm:$0xff]  ;;  %v2696_v16 = vld [vmem:[#allocation2 + $0x11b] sm:$0xff] }
 0x1b4   : > { %v2695_v11 = vld [vmem:[#allocation2 + $0x113] sm:$0xff] }
 0x1b5   : > { %v2743_v12 = vpack.c.bf16 %v2696_v16, %v2695_v11 }
 0x1b6   : > { %5754 = vperm.xlu1 %8703, %v5468_v37   ;;  %v4868_v37 = vld [vmem:[#allocation2 + $0x4e] sm:$0xff] }
 0x1b7   : > { %5789 = vperm.xlu0 %8702, %v5475_v38  }
 0x1b8   : > { %7728 = vmatmul.mubr.msk.bf16.gmra.mrb[4].mxu1 %vm502_vm1, %v9392_v23  ;;  %v4398_v23 = vpack.c.bf16 %v4356_v35, %v4355_v26  ;;  %v4871_v35 = vld [vmem:[#allocation2 + $0x66] sm:$0xff] }
 0x1b9   : > { %7731 = vmatprep.mubr.msk.bf16.mxu1 %vm502_vm1, %v9403_v0  ;;  %v5472_v0 = vld [vmem:[%s9426_s19 + $0x1d8] sm:$0xff] }
 0x1ba   : > { %8024 = vmatmul.mubr.msk.bf16.gmra.mrb[36].mxu0 %vm502_vm1, %v4396_v3  ;;  %5764 = vperm.xlu1 %8703, %v5470_v8   ;;  %v4927_v3 = vpack.c.bf16 %v4864_v40, %v4863_v27  ;;  %v4931_v8 = vpack.c.bf16 %v4872_v39, %v4871_v35  ;;  %v4899_v27 = vld [vmem:[#allocation2 + $0x146] sm:$0xff]  ;;  %v4900_v40 = vld [vmem:[#allocation2 + $0x14e] sm:$0xff] }
 0x1bb   : > { %8027 = vmatprep.mubr.msk.bf16.mxu0 %vm502_vm1, %v4397_v29  ;;  %v4867_v29 = vld [vmem:[#allocation2 + $0x46] sm:$0xff]  ;;  %v4904_v39 = vld [vmem:[#allocation2 + $0x16e] sm:$0xff] }
 0x1bc   : > { %v4929_v26 = vpack.c.bf16 %v4868_v37, %v4867_v29  ;;  %v2701_v29 = vld [vmem:[#allocation2 + $0x143] sm:$0xff]  ;;  %v2702_v37 = vld [vmem:[#allocation2 + $0x14b] sm:$0xff] }
 0x1bd   : > { %v4903_v35 = vld [vmem:[#allocation2 + $0x166] sm:$0xff] }
 0x1be   : > { %5774 = vperm.xlu1 %8703, %v5472_v0  }
 0x1c0   : > { %7732 = vmatmul.mubr.msk.bf16.gmra.mrb[8].mxu1 %vm502_vm1, %v9405_v1  ;;  %v4401_v1 = vpack.c.bf16 %v4362_v20, %v4361_v6  ;;  %v4935_v6 = vpack.c.bf16 %v4880_v34, %v4879_v55  ;;  %v4883_v20 = vld [vmem:[#allocation2 + $0xc6] sm:$0xff]  ;;  %v4908_v34 = vld [vmem:[#allocation2 + $0x18e] sm:$0xff] }
 0x1c1   : > { %7735 = vmatprep.mubr.msk.bf16.mxu1 %vm502_vm1, %v9419_v7  ;;  %v5476_v7 = vld [vmem:[%s9426_s19 + $0x1f8] sm:$0xff]  ;;  %v4907_v55 = vld [vmem:[#allocation2 + $0x186] sm:$0xff] }
 0x1c2   : > { %8028 = vmatmul.mubr.msk.bf16.gmra.mrb[40].mxu0 %vm502_vm1, %v4398_v23  ;;  %5784 = vperm.xlu1 %8703, %v5474_v25   ;;  %v4876_v23 = vld [vmem:[#allocation2 + $0x8e] sm:$0xff] }
 0x1c3   : > { %8031 = vmatprep.mubr.msk.bf16.mxu0 %vm502_vm1, %v4399_v47  ;;  %v4933_v0 = vpack.c.bf16 %v4876_v23, %v4875_v46  ;;  %v4884_v25 = vld [vmem:[#allocation2 + $0xce] sm:$0xff]  ;;  %v2705_v46 = vld [vmem:[#allocation2 + $0x163] sm:$0xff] }
 0x1c4   : > { %v2706_v23 = vld [vmem:[#allocation2 + $0x16b] sm:$0xff] }
 0x1c6   : > { %5794 = vperm.xlu1 %8703, %v5476_v7   ;;  %v4888_v7 = vld [vmem:[#allocation2 + $0xee] sm:$0xff] }
 0x1c8   : > { %7736 = vmatmul.mubr.msk.bf16.gmra.mrb[12].mxu1 %vm502_vm1, %v9421_v13  ;;  %v4367_v13 = vld [vmem:[#allocation2 + $0x1d5] sm:$0xff] }
 0x1c9   : > { %7739 = vmatprep.mubr.msk.bf16.mxu1 %vm502_vm1, %v9439_v21  ;;  %v4368_v21 = vld [vmem:[#allocation2 + $0x1dd] sm:$0xff] }
 0x1ca   : > { %8032 = vmatmul.mubr.msk.bf16.gmra.mrb[44].mxu0 %vm502_vm1, %v4400_v59  ;;  %v4404_v19 = vpack.c.bf16 %v4368_v21, %v4367_v13  ;;  %v4937_v59 = vpack.c.bf16 %v4884_v25, %v4883_v20  ;;  %v2176_v13 = vld [vmem:[#allocation2 + $0x20a] sm:$0xff]  ;;  %v4893_v21 = vld [vmem:[#allocation2 + $0x116] sm:$0xff] }
 0x1cb   : > { %8035 = vmatprep.mubr.msk.bf16.mxu0 %vm502_vm1, %v4401_v1  ;;  %v4887_v1 = vld [vmem:[#allocation2 + $0xe6] sm:$0xff] }
 0x1cc   : > { %v4939_v44 = vpack.c.bf16 %v4888_v7, %v4887_v1  ;;  %v2709_v20 = vld [vmem:[#allocation2 + $0x183] sm:$0xff]  ;;  %v2710_v25 = vld [vmem:[#allocation2 + $0x18b] sm:$0xff] }
 0x1cd   : > { %v4911_v1 = vld [vmem:[#allocation2 + $0x1a6] sm:$0xff]  ;;  %v4912_v7 = vld [vmem:[#allocation2 + $0x1ae] sm:$0xff] }
 0x1d0   : > { %7740 = vmatmul.mubr.msk.bf16.gmra.mrb[16].mxu1 %vm502_vm1, %v9441_v15  ;;  %v4371_v15 = vld [vmem:[#allocation2 + $0x1f5] sm:$0xff] }
 0x1d1   : > { %7743 = vmatprep.mubr.msk.bf16.mxu1 %vm502_vm1, %v9454_v24  ;;  %v4372_v24 = vld [vmem:[#allocation2 + $0x1fd] sm:$0xff] }
 0x1d2   : > { %8036 = vmatmul.mubr.msk.bf16.gmra.mrb[48].mxu0 %vm502_vm1, %v4402_v5  ;;  %v4406_v14 = vpack.c.bf16 %v4372_v24, %v4371_v15 }
 0x1d3   : > { %8039 = vmatprep.mubr.msk.bf16.mxu0 %vm502_vm1, %v4403_v10  ;;  %v4941_v10 = vpack.c.bf16 %v4892_v2, %v4891_v56  ;;  %v2713_v56 = vld [vmem:[#allocation2 + $0x1a3] sm:$0xff]  ;;  %v2714_v2 = vld [vmem:[#allocation2 + $0x1ab] sm:$0xff] }
 0x1d4   : > { %v2752_v11 = vpack.c.bf16 %v2714_v2, %v2713_v56 }
 0x1d8   : > { %7744 = vmatmul.mubr.msk.bf16.gmra.mrb[20].mxu1 %vm502_vm1, %v9457_v31  ;;  %v4375_v31 = vld [vmem:[#allocation2 + $0x215] sm:$0xff] }
 0x1d9   : > { %7747 = vmatprep.mubr.msk.bf16.mxu1 %vm502_vm1, %v9470_v43  ;;  %v4376_v43 = vld [vmem:[#allocation2 + $0x21d] sm:$0xff] }
 0x1da   : > { %8040 = vmatmul.mubr.msk.bf16.gmra.mrb[52].mxu0 %vm502_vm1, %v4404_v19  ;;  %v4408_v48 = vpack.c.bf16 %v4376_v43, %v4375_v31  ;;  %v4895_v19 = vld [vmem:[#allocation2 + $0x126] sm:$0xff]  ;;  %v2699_v31 = vld [vmem:[#allocation2 + $0x133] sm:$0xff]  ;;  %v2700_v43 = vld [vmem:[#allocation2 + $0x13b] sm:$0xff] }
 0x1db   : > { %8043 = vmatprep.mubr.msk.bf16.mxu0 %vm502_vm1, %v4405_v54  ;;  %v4896_v54 = vld [vmem:[#allocation2 + $0x12e] sm:$0xff] }
 0x1dc   : > { %v4943_v60 = vpack.c.bf16 %v4896_v54, %v4895_v19 }
 0x1e0   : > { %7748 = vmatmul.mubr.msk.bf16.gmra.mrb[24].mxu1 %vm502_vm1, %v9473_v52  ;;  %v4865_v52 = vld [vmem:[#allocation2 + $0x36] sm:$0xff] }
 0x1e1   : > { %7751 = vmatprep.mubr.msk.bf16.mxu1 %vm502_vm1, %v9486_v18  ;;  %v4866_v18 = vld [vmem:[#allocation2 + $0x3e] sm:$0xff] }
 0x1e2   : > { %8044 = vmatmul.mubr.msk.bf16.gmra.mrb[56].mxu0 %vm502_vm1, %v4406_v14  ;;  %v4928_v49 = vpack.c.bf16 %v4866_v18, %v4865_v52  ;;  %v4897_v14 = vld [vmem:[#allocation2 + $0x136] sm:$0xff]  ;;  %v2745_v52 = vpack.c.bf16 %v2700_v43, %v2699_v31  ;;  %v4945_v18 = vpack.c.bf16 %v4900_v40, %v4899_v27 }
 0x1e3   : > { %8047 = vmatprep.mubr.msk.bf16.mxu0 %vm502_vm1, %v4407_v36  ;;  %v4898_v36 = vld [vmem:[#allocation2 + $0x13e] sm:$0xff] }
 0x1e8   : > { %7752 = vmatmul.mubr.msk.bf16.gmra.mrb[28].mxu1 %vm502_vm1, %v9489_v58  ;;  %v4869_v58 = vld [vmem:[#allocation2 + $0x56] sm:$0xff] }
 0x1e9   : > { %7755 = vmatprep.mubr.msk.bf16.mxu1 %vm502_vm1, %v9500_v61  ;;  %v4870_v61 = vld [vmem:[#allocation2 + $0x5e] sm:$0xff] }
 0x1ea   : > { %8048 = vmatmul.mubr.msk.bf16.gmra.mrb[60].mxu0 %vm502_vm1, %v4408_v48  ;;  %v4930_v45 = vpack.c.bf16 %v4870_v61, %v4869_v58  ;;  %v2703_v58 = vld [vmem:[#allocation2 + $0x153] sm:$0xff]  ;;  %v2704_v61 = vld [vmem:[#allocation2 + $0x15b] sm:$0xff] }
 0x1eb   : > { %8053 = vmatprep.mubr.msk.bf16.mxu0 %vm502_vm1, %v4927_v3  ;;  %v4944_v3 = vpack.c.bf16 %v4898_v36, %v4897_v14  ;;  %v4919_v14 = vld [vmem:[#allocation2 + $0x1e6] sm:$0xff]  ;;  %v4920_v36 = vld [vmem:[#allocation2 + $0x1ee] sm:$0xff] }
 0x1ec   : > { %v4955_v40 = vpack.c.bf16 %v4920_v36, %v4919_v14 }
 0x1f0   : > { %7756 = vmatmul.mubr.msk.bf16.gmra.mrb[32].mxu1 %vm502_vm1, %v9503_v17  ;;  %v4873_v17 = vld [vmem:[#allocation2 + $0x76] sm:$0xff] }
 0x1f1   : > { %7759 = vmatprep.mubr.msk.bf16.mxu1 %vm502_vm1, %v9515_v32  ;;  %v4874_v32 = vld [vmem:[#allocation2 + $0x7e] sm:$0xff] }
 0x1f2   : > { %8054 = vmatmul.mubr.msk.bf16.vlgmr.msra.gmra.mrb[0].mxu0 %vm502_vm1, %v4928_v49  ;;  %v4932_v47 = vpack.c.bf16 %v4874_v32, %v4873_v17  ;;  %v4901_v49 = vld [vmem:[#allocation2 + $0x156] sm:$0xff]  ;;  %v2747_v17 = vpack.c.bf16 %v2704_v61, %v2703_v58  ;;  %v4947_v32 = vpack.c.bf16 %v4904_v39, %v4903_v35 }
 0x1f3   : > { %8057 = vmatprep.mubr.msk.bf16.mxu0 %vm502_vm1, %v4929_v26  ;;  %v4902_v26 = vld [vmem:[#allocation2 + $0x15e] sm:$0xff] }
 0x1f8   : > { %7760 = vmatmul.mubr.msk.bf16.gmra.mrb[36].mxu1 %vm502_vm1, %v9519_v42  ;;  %v4877_v42 = vld [vmem:[#allocation2 + $0x96] sm:$0xff] }
 0x1f9   : > { %7763 = vmatprep.mubr.msk.bf16.mxu1 %vm502_vm1, %v9529_v57  ;;  %v4878_v57 = vld [vmem:[#allocation2 + $0x9e] sm:$0xff] }
 0x1fa   : > { %8058 = vmatmul.mubr.msk.bf16.gmra.mrb[4].mxu0 %vm502_vm1, %v4930_v45  ;;  %v4934_v51 = vpack.c.bf16 %v4878_v57, %v4877_v42  ;;  %v2746_v45 = vpack.c.bf16 %v2702_v37, %v2701_v29  ;;  %v2707_v42 = vld [vmem:[#allocation2 + $0x173] sm:$0xff]  ;;  %v2708_v57 = vld [vmem:[#allocation2 + $0x17b] sm:$0xff] }
 0x1fb   : > { %8061 = vmatprep.mubr.msk.bf16.mxu0 %vm502_vm1, %v4931_v8  ;;  %v4946_v8 = vpack.c.bf16 %v4902_v26, %v4901_v49  ;;  %v2723_v29 = vld [vmem:[#allocation2 + $0x1f3] sm:$0xff]  ;;  %v2724_v37 = vld [vmem:[#allocation2 + $0x1fb] sm:$0xff]  ;;  %v4923_v49 = vld [vmem:[#allocation2 + $0x206] sm:$0xff] }
 0x1fc   : > { %v4924_v26 = vld [vmem:[#allocation2 + $0x20e] sm:$0xff]  ;;  %v2757_v35 = vpack.c.bf16 %v2724_v37, %v2723_v29 }
 0x1fd   : > { %v4957_v39 = vpack.c.bf16 %v4924_v26, %v4923_v49 }
 0x200   : > { %7764 = vmatmul.mubr.msk.bf16.gmra.mrb[40].mxu1 %vm502_vm1, %v9533_v30  ;;  %v4881_v30 = vld [vmem:[#allocation2 + $0xb6] sm:$0xff] }
 0x201   : > { %7767 = vmatprep.mubr.msk.bf16.mxu1 %vm502_vm1, %v9543_v63  ;;  %v4882_v63 = vld [vmem:[#allocation2 + $0xbe] sm:$0xff] }
 0x202   : > { %8062 = vmatmul.mubr.msk.bf16.gmra.mrb[8].mxu0 %vm502_vm1, %v4932_v47  ;;  %v4936_v38 = vpack.c.bf16 %v4882_v63, %v4881_v30  ;;  %v4905_v47 = vld [vmem:[#allocation2 + $0x176] sm:$0xff]  ;;  %v2749_v30 = vpack.c.bf16 %v2708_v57, %v2707_v42  ;;  %v4949_v63 = vpack.c.bf16 %v4908_v34, %v4907_v55 }
 0x203   : > { %8065 = vmatprep.mubr.msk.bf16.mxu0 %vm502_vm1, %v4933_v0  ;;  %v4906_v0 = vld [vmem:[#allocation2 + $0x17e] sm:$0xff] }
 0x208   : > { %7768 = vmatmul.mubr.msk.bf16.gmra.mrb[44].mxu1 %vm502_vm1, %v9547_v22  ;;  %v4885_v22 = vld [vmem:[#allocation2 + $0xd6] sm:$0xff] }
 0x209   : > { %7771 = vmatprep.mubr.msk.bf16.mxu1 %vm502_vm1, %v9557_v41  ;;  %v4886_v41 = vld [vmem:[#allocation2 + $0xde] sm:$0xff] }
 0x20a   : > { %8066 = vmatmul.mubr.msk.bf16.gmra.mrb[12].mxu0 %vm502_vm1, %v4934_v51  ;;  %v4938_v50 = vpack.c.bf16 %v4886_v41, %v4885_v22  ;;  %v2748_v51 = vpack.c.bf16 %v2706_v23, %v2705_v46  ;;  %v2711_v22 = vld [vmem:[#allocation2 + $0x193] sm:$0xff]  ;;  %v2712_v41 = vld [vmem:[#allocation2 + $0x19b] sm:$0xff] }
 0x20b   : > { %8069 = vmatprep.mubr.msk.bf16.mxu0 %vm502_vm1, %v4935_v6  ;;  %v4948_v6 = vpack.c.bf16 %v4906_v0, %v4905_v47  ;;  %v9751_v47 = vpop.permute.xlu0 %5479  ;;  %v9753_v0 = vpop.permute.xlu1 %5489 }
 0x20f   : > { %v9755_v42 = vpop.permute.xlu0 %5484  ;;  %v9757_v57 = vpop.permute.xlu1 %5494 }
 0x210   : > { %7772 = vmatmul.mubr.msk.bf16.gmra.mrb[48].mxu1 %vm502_vm1, %v9561_v53  ;;  %v4889_v53 = vld [vmem:[#allocation2 + $0xf6] sm:$0xff] }
 0x211   : > { %7775 = vmatprep.mubr.msk.bf16.mxu1 %vm502_vm1, %v9571_v62  ;;  %v4890_v62 = vld [vmem:[#allocation2 + $0xfe] sm:$0xff] }
 0x212   : > { %8070 = vmatmul.mubr.msk.bf16.gmra.mrb[16].mxu0 %vm502_vm1, %v4936_v38  ;;  %v4940_v5 = vpack.c.bf16 %v4890_v62, %v4889_v53  ;;  %v4909_v38 = vld [vmem:[#allocation2 + $0x196] sm:$0xff]  ;;  %v2751_v53 = vpack.c.bf16 %v2712_v41, %v2711_v22  ;;  %v4951_v62 = vpack.c.bf16 %v4912_v7, %v4911_v1 }
 0x213   : > { %8073 = vmatprep.mubr.msk.bf16.mxu0 %vm502_vm1, %v4937_v59  ;;  %v4910_v59 = vld [vmem:[#allocation2 + $0x19e] sm:$0xff]  ;;  %v9759_v55 = vpop.permute.xlu0 %5499 }
 0x218   : > { %7776 = vmatmul.mubr.msk.bf16.gmra.mrb[52].mxu1 %vm502_vm1, %v9575_v9  ;;  %v2175_v9 = vld [vmem:[#allocation2 + $0x202] sm:$0xff] }
 0x219   : > { %7779 = vmatprep.mubr.msk.bf16.mxu1 %vm502_vm1, %v9585_v28  ;;  %v4894_v28 = vld [vmem:[#allocation2 + $0x11e] sm:$0xff]  ;;  %v2208_v15 = vpack.c.bf16 %v2176_v13, %v2175_v9  ;;  %v2715_v9 = vld [vmem:[#allocation2 + $0x1b3] sm:$0xff] }
 0x21a   : > { %8074 = vmatmul.mubr.msk.bf16.gmra.mrb[20].mxu0 %vm502_vm1, %v4938_v50  ;;  %v4942_v24 = vpack.c.bf16 %v4894_v28, %v4893_v21  ;;  %v2750_v50 = vpack.c.bf16 %v2710_v25, %v2709_v20  ;;  %v2716_v13 = vld [vmem:[#allocation2 + $0x1bb] sm:$0xff]  ;;  %v4915_v21 = vld [vmem:[#allocation2 + $0x1c6] sm:$0xff]  ;;  %v4916_v28 = vld [vmem:[#allocation2 + $0x1ce] sm:$0xff] }
 0x21b   : > { %8077 = vmatprep.mubr.msk.bf16.mxu0 %vm502_vm1, %v4939_v44  ;;  %v4950_v44 = vpack.c.bf16 %v4910_v59, %v4909_v38  ;;  %v2753_v19 = vpack.c.bf16 %v2716_v13, %v2715_v9  ;;  %v4953_v54 = vpack.c.bf16 %v4916_v28, %v4915_v21 }
 0x220   : > { %7780 = vmatmul.mubr.msk.bf16.gmra.mrb[56].mxu1 %vm502_vm1, %v9589_v33  ;;  %v2697_v33 = vld [vmem:[#allocation2 + $0x123] sm:$0xff] }
 0x221   : > { %7783 = vmatprep.mubr.msk.bf16.mxu1 %vm502_vm1, %v9599_v4  ;;  %v2698_v4 = vld [vmem:[#allocation2 + $0x12b] sm:$0xff] }
 0x222   : > { %8078 = vmatmul.mubr.msk.bf16.gmra.mrb[24].mxu0 %vm502_vm1, %v4940_v5  ;;  %v2744_v48 = vpack.c.bf16 %v2698_v4, %v2697_v33  ;;  %v4913_v5 = vld [vmem:[#allocation2 + $0x1b6] sm:$0xff] }
 0x223   : > { %8081 = vmatprep.mubr.msk.bf16.mxu0 %vm502_vm1, %v4941_v10  ;;  %v4914_v10 = vld [vmem:[#allocation2 + $0x1be] sm:$0xff]  ;;  %v2719_v33 = vld [vmem:[#allocation2 + $0x1d3] sm:$0xff] }
 0x224   : > { %v4952_v16 = vpack.c.bf16 %v4914_v10, %v4913_v5  ;;  %v2720_v4 = vld [vmem:[#allocation2 + $0x1db] sm:$0xff] }
 0x225   : > { %v2755_v27 = vpack.c.bf16 %v2720_v4, %v2719_v33 }
 0x228   : > { %7784 = vmatmul.mubr.msk.bf16.gmra.mrb[60].mxu1 %vm502_vm1, %v2208_v15  ;;  %v2717_v15 = vld [vmem:[#allocation2 + $0x1c3] sm:$0xff] }
 0x229   : > { %7821 = vmatprep.mubr.msk.bf16.mxu1 %vm502_vm1, %v2743_v12  ;;  %v4917_v12 = vld [vmem:[#allocation2 + $0x1d6] sm:$0xff] }
 0x22a   : > { %8082 = vmatmul.mubr.msk.bf16.gmra.mrb[28].mxu0 %vm502_vm1, %v4942_v24  ;;  %v2718_v24 = vld [vmem:[#allocation2 + $0x1cb] sm:$0xff] }
 0x22b   : > { %8085 = vmatprep.mubr.msk.bf16.mxu0 %vm502_vm1, %v4943_v60  ;;  %v4918_v60 = vld [vmem:[#allocation2 + $0x1de] sm:$0xff]  ;;  %v2754_v31 = vpack.c.bf16 %v2718_v24, %v2717_v15 }
 0x22c   : > { %v4954_v43 = vpack.c.bf16 %v4918_v60, %v4917_v12 }
 0x230   : > { %7822 = vmatmul.mubr.msk.bf16.vlgmr.msra.gmra.mrb[32].mxu1 %vm502_vm1, %v2744_v48  ;;  %v2721_v48 = vld [vmem:[#allocation2 + $0x1e3] sm:$0xff] }
 0x231   : > { %7825 = vmatprep.mubr.msk.bf16.mxu1 %vm502_vm1, %v2745_v52  ;;  %v4921_v52 = vld [vmem:[#allocation2 + $0x1f6] sm:$0xff] }
 0x232   : > { %8086 = vmatmul.mubr.msk.bf16.gmra.mrb[32].mxu0 %vm502_vm1, %v4944_v3  ;;  %v2722_v3 = vld [vmem:[#allocation2 + $0x1eb] sm:$0xff] }
 0x233   : > { %8089 = vmatprep.mubr.msk.bf16.mxu0 %vm502_vm1, %v4945_v18  ;;  %v4922_v18 = vld [vmem:[#allocation2 + $0x1fe] sm:$0xff]  ;;  %v2756_v58 = vpack.c.bf16 %v2722_v3, %v2721_v48 }
 0x234   : > { %v4956_v61 = vpack.c.bf16 %v4922_v18, %v4921_v52 }
 0x238   : > { %7826 = vmatmul.mubr.msk.bf16.gmra.mrb[36].mxu1 %vm502_vm1, %v2746_v45  ;;  %v2725_v45 = vld [vmem:[#allocation2 + $0x203] sm:$0xff] }
 0x239   : > { %7829 = vmatprep.mubr.msk.bf16.mxu1 %vm502_vm1, %v2747_v17  ;;  %v4925_v17 = vld [vmem:[#allocation2 + $0x216] sm:$0xff] }
 0x23a   : > { %8090 = vmatmul.mubr.msk.bf16.gmra.mrb[36].mxu0 %vm502_vm1, %v4946_v8  ;;  %v2726_v8 = vld [vmem:[#allocation2 + $0x20b] sm:$0xff] }
 0x23b   : > { %8093 = vmatprep.mubr.msk.bf16.mxu0 %vm502_vm1, %v4947_v32  ;;  %v4926_v32 = vld [vmem:[#allocation2 + $0x21e] sm:$0xff]  ;;  %v2758_v46 = vpack.c.bf16 %v2726_v8, %v2725_v45 }
 0x23c   : > { %v4958_v23 = vpack.c.bf16 %v4926_v32, %v4925_v17 }
 0x240   : > { %7830 = vmatmul.mubr.msk.bf16.gmra.mrb[40].mxu1 %vm502_vm1, %v2748_v51  ;;  %v9761_v51 = vpop.permute.xlu1 %5504 }
 0x241   : > { %7833 = vmatprep.mubr.msk.bf16.mxu1 %vm502_vm1, %v2749_v30  ;;  %v9763_v30 = vpop.permute.xlu0 %5509 }
 0x242   : > { %8094 = vmatmul.mubr.msk.bf16.gmra.mrb[40].mxu0 %vm502_vm1, %v4948_v6 }
 0x243   : > { %8097 = vmatprep.mubr.msk.bf16.mxu0 %vm502_vm1, %v4949_v63 }
 0x244   : > { %v9767_v25 = vpop.permute.xlu1 %5514 }
 0x245   : > { %v9769_v38 = vpop.permute.xlu0 %5519 }
 0x248   : > { %7834 = vmatmul.mubr.msk.bf16.gmra.mrb[44].mxu1 %vm502_vm1, %v2750_v50  ;;  %v9779_v7 = vpop.permute.xlu1 %5524 }
 0x249   : > { %7837 = vmatprep.mubr.msk.bf16.mxu1 %vm502_vm1, %v2751_v53  ;;  %v9781_v50 = vpop.permute.xlu0 %5529 }
 0x24a   : > { %8098 = vmatmul.mubr.msk.bf16.gmra.mrb[44].mxu0 %vm502_vm1, %v4950_v44 }
 0x24b   : > { %8101 = vmatprep.mubr.msk.bf16.mxu0 %vm502_vm1, %v4951_v62 }
 0x24c   : > { %v9789_v56 = vpop.permute.xlu1 %5534 }
 0x24d   : > { %v9793_v5 = vpop.permute.xlu0 %5539 }
 0x250   : > { %7838 = vmatmul.mubr.msk.bf16.gmra.mrb[48].mxu1 %vm502_vm1, %v2752_v11  ;;  %v9797_v9 = vpop.permute.xlu1 %5544 }
 0x251   : > { %7841 = vmatprep.mubr.msk.bf16.mxu1 %vm502_vm1, %v2753_v19  ;;  %v9801_v21 = vpop.permute.xlu0 %5549 }
 0x252   : > { %8102 = vmatmul.mubr.msk.bf16.gmra.mrb[48].mxu0 %vm502_vm1, %v4952_v16 }
 0x253   : > { %8105 = vmatprep.mubr.msk.bf16.mxu0 %vm502_vm1, %v4953_v54 }
 0x254   : > { %v9807_v16 = vpop.permute.xlu1 %5554 }
 0x255   : > { %v9809_v19 = vpop.permute.xlu0 %5559 }
 0x258   : > { %7842 = vmatmul.mubr.msk.bf16.gmra.mrb[52].mxu1 %vm502_vm1, %v2754_v31  ;;  %v9819_v60 = vpop.permute.xlu1 %5564 }
 0x259   : > { %7845 = vmatprep.mubr.msk.bf16.mxu1 %vm502_vm1, %v2755_v27  ;;  %v9821_v33 = vpop.permute.xlu0 %5569 }
 0x25a   : > { %8106 = vmatmul.mubr.msk.bf16.gmra.mrb[52].mxu0 %vm502_vm1, %v4954_v43 }
 0x25b   : > { %8109 = vmatprep.mubr.msk.bf16.mxu0 %vm502_vm1, %v4955_v40 }
 0x25c   : > { %v9829_v31 = vpop.permute.xlu1 %5574 }
 0x25d   : > { %v9833_v27 = vpop.permute.xlu0 %5579 }
 0x260   : > { %7846 = vmatmul.mubr.msk.bf16.gmra.mrb[56].mxu1 %vm502_vm1, %v2756_v58  ;;  %v9837_v48 = vpop.permute.xlu1 %5584 }
 0x261   : > { %7849 = vmatprep.mubr.msk.bf16.mxu1 %vm502_vm1, %v2757_v35  ;;  %v9841_v52 = vpop.permute.xlu0 %5589 }
 0x262   : > { %8110 = vmatmul.mubr.msk.bf16.gmra.mrb[56].mxu0 %vm502_vm1, %v4956_v61 }
 0x263   : > { %8113 = vmatprep.mubr.msk.bf16.mxu0 %vm502_vm1, %v4957_v39 }
 0x264   : > { %v9847_v37 = vpop.permute.xlu1 %5594 }
 0x265   : > { %v9849_v49 = vpop.permute.xlu0 %5599 }
 0x266   : > { %10249 = vst [vmem:[#allocation10_spill] sm:$0xff] %v9849_v49 }
 0x268   : > { %7850 = vmatmul.mubr.msk.bf16.gmra.mrb[60].mxu1 %vm502_vm1, %v2758_v46  ;;  %v9859_v39 = vpop.permute.xlu1 %5604 }
 0x269   : > { %10254 = vst [vmem:[#allocation15_spill] sm:$0xff] %v9859_v39  ;;  %v9861_v45 = vpop.permute.xlu0 %5609 }
 0x26a   : > { %8114 = vmatmul.mubr.msk.bf16.gmra.mrb[60].mxu0 %vm502_vm1, %v4958_v23 }
 0x26c   : > { %v9864_v46 = vpop.permute.xlu1 %5614 }
 0x26d   : > { %v9866_v49 = vpop.permute.xlu0 %5619 }
 0x26e   : > { %10255 = vst [vmem:[#allocation16_spill] sm:$0xff] %v9866_v49 }
 0x283   : > { %v7725_v34 = vpop.f32.mrb[0].mxu1 }
 0x284   : > { %v2344_v6 = vpop.f32.mrb[1].mxu1 }
 0x285   : > { %v7726_v63 = vpop.f32.mrb[2].mxu1 }
 0x286   : > { %v9765_v20 = vpop.f32.mrb[3].mxu1 }
 0x28b   : > { %v9771_v59 = vpop.f32.mrb[4].mxu1 }
 0x28c   : > { %v9773_v22 = vpop.f32.mrb[5].mxu1 }
 0x28d   : > { %v9775_v41 = vpop.f32.mrb[6].mxu1 }
 0x28e   : > { %v9777_v1 = vpop.f32.mrb[7].mxu1 }
 0x293   : > { %v9783_v44 = vpop.f32.mrb[8].mxu1 }
 0x294   : > { %v9785_v53 = vpop.f32.mrb[9].mxu1 }
 0x295   : > { %v9787_v62 = vpop.f32.mrb[10].mxu1 }
 0x296   : > { %v9791_v2 = vpop.f32.mrb[11].mxu1 }
 0x29b   : > { %v9795_v10 = vpop.f32.mrb[12].mxu1 }
 0x29c   : > { %v9799_v13 = vpop.f32.mrb[13].mxu1 }
 0x29d   : > { %v9803_v28 = vpop.f32.mrb[14].mxu1 }
 0x29e   : > { %v9805_v11 = vpop.f32.mrb[15].mxu1 }
 0x2a3   : > { %v9811_v54 = vpop.f32.mrb[16].mxu1 }
 0x2a4   : > { %v9813_v15 = vpop.f32.mrb[17].mxu1 }
 0x2a5   : > { %v9815_v24 = vpop.f32.mrb[18].mxu1 }
 0x2a6   : > { %v9817_v12 = vpop.f32.mrb[19].mxu1 }
 0x2ab   : > { %v9823_v4 = vpop.f32.mrb[20].mxu1 }
 0x2ac   : > { %v9825_v14 = vpop.f32.mrb[21].mxu1 }
 0x2ad   : > { %v9827_v36 = vpop.f32.mrb[22].mxu1 }
 0x2ae   : > { %v9831_v43 = vpop.f32.mrb[23].mxu1 }
 0x2b3   : > { %v9835_v40 = vpop.f32.mrb[24].mxu1 }
 0x2b4   : > { %v9839_v3 = vpop.f32.mrb[25].mxu1 }
 0x2b5   : > { %v9843_v18 = vpop.f32.mrb[26].mxu1 }
 0x2b6   : > { %v9845_v29 = vpop.f32.mrb[27].mxu1 }
 0x2b7   : > { %10248 = vst [vmem:[#allocation9_spill] sm:$0xff] %v9845_v29 }
 0x2bb   : > { %v9851_v26 = vpop.f32.mrb[28].mxu1 }
 0x2bc   : > { %10250 = vst [vmem:[#allocation11_spill] sm:$0xff] %v9851_v26  ;;  %v9853_v58 = vpop.f32.mrb[29].mxu1 }
 0x2bd   : > { %10251 = vst [vmem:[#allocation12_spill] sm:$0xff] %v9853_v58  ;;  %v9855_v61 = vpop.f32.mrb[30].mxu1 }
 0x2be   : > { %10252 = vst [vmem:[#allocation13_spill] sm:$0xff] %v9855_v61  ;;  %v9857_v35 = vpop.f32.mrb[31].mxu1 }
 0x2bf   : > { %10253 = vst [vmem:[#allocation14_spill] sm:$0xff] %v9857_v35 }
 0x2c5   : > { %v8055_v8 = vpop.f32.mrb[0].mxu0 }
 0x2c6   : > { %v8119_v17 = vadd.f32 %v8055_v8, %v7725_v34  ;;  %v5094_v32 = vpop.f32.mrb[1].mxu0 }
 0x2c7   : > { %v8120_v23 = vadd.f32 %v5094_v32, %v2344_v6  ;;  %v8056_v29 = vpop.f32.mrb[2].mxu0 }
 0x2c8   : > { %v5799_v58 = vmul.f32 %v8119_v17, %v9753_v0  ;;  %v8121_v26 = vadd.f32 %v8056_v29, %v7726_v63  ;;  %v5097_v61 = vpop.f32.mrb[3].mxu0  ;;  %v9880_v29 = vpop.permute.xlu1 %5624 }
 0x2c9   : > { %v5797_v34 = vmul.f32 %v8120_v23, %v9751_v47  ;;  %v8122_v6 = vadd.f32 %v5097_v61, %v9765_v20  ;;  %10256 = vst [vmem:[#allocation17_spill] sm:$0xff] %v9880_v29  ;;  %v9884_v20 = vpop.permute.xlu0 %5629 }
 0x2ca   : > { %v6984_v8 = vpack.c.bf16 %v5799_v58, %v5799_v58  ;;  %v5800_v32 = vmul.f32 %v8121_v26, %v9757_v57  ;;  %10257 = vst [vmem:[#allocation18_spill] sm:$0xff] %v9884_v20 }
 0x2cb   : > { %v6982_v35 = vpack.c.bf16 %v5797_v34, %v5797_v34  ;;  %v5798_v0 = vmul.f32 %v8122_v6, %v9755_v42  ;;  %v6252_v17 = vmul.f32 %v5797_v34, %v5797_v34  ;;  %v6254_v42 = vmul.f32 %v5799_v58, %v5799_v58 }
 0x2cc   : > { %6120 = vst.msk [vmem:[%s9872_s30 + $0x8] sm:$0xf] %vm6117_vm2, %v6984_v8  ;;  %v6985_v63 = vpack.c.bf16 %v5800_v32, %v5800_v32  ;;  %v6255_v29 = vmul.f32 %v5800_v32, %v5800_v32 }
 0x2cd   : > { %6118 = vst.msk [vmem:[%s9872_s30] sm:$0xf] %vm6117_vm2, %v6982_v35  ;;  %v6983_v49 = vpack.c.bf16 %v5798_v0, %v5798_v0  ;;  %v6182_v47 = vadd.f32 %v5798_v0, %v5797_v34  ;;  %v6253_v23 = vmul.f32 %v5798_v0, %v5798_v0  ;;  %v8059_v39 = vpop.f32.mrb[4].mxu0 }
 0x2ce   : > { %6121 = vst.msk [vmem:[%s9872_s30 + $0xc] sm:$0xf] %vm6117_vm2, %v6985_v63  ;;  %v8123_v57 = vadd.f32 %v8059_v39, %v9771_v59  ;;  %v5110_v26 = vpop.f32.mrb[5].mxu0 }
 0x2cf   : > { %6119 = vst.msk [vmem:[%s9872_s30 + $0x4] sm:$0xf] %vm6117_vm2, %v6983_v49  ;;  %v6183_v61 = vadd.f32 %v6182_v47, %v5799_v58  ;;  %v6316_v6 = vadd.f32 %v6253_v23, %v6252_v17  ;;  %v8124_v8 = vadd.f32 %v5110_v26, %v9773_v22  ;;  %v8060_v35 = vpop.f32.mrb[6].mxu0  ;;  %v9897_v22 = vpop.permute.xlu1 %5634 }
 0x2d0   : > { %v5803_v34 = vmul.f32 %v8123_v57, %v9763_v30  ;;  %v8125_v0 = vadd.f32 %v8060_v35, %v9775_v41  ;;  %v5113_v20 = vpop.f32.mrb[7].mxu0  ;;  %v9899_v57 = vpop.permute.xlu0 %5639 }
 0x2d1   : > { %v6317_v63 = vadd.f32 %v6316_v6, %v6254_v42  ;;  %v5801_v59 = vmul.f32 %v8124_v8, %v9759_v55  ;;  %v6184_v39 = vadd.f32 %v6183_v61, %v5800_v32  ;;  %v8126_v49 = vadd.f32 %v5113_v20, %v9777_v1 }
 0x2d2   : > { %v6988_v58 = vpack.c.bf16 %v5803_v34, %v5803_v34  ;;  %v5804_v17 = vmul.f32 %v8125_v0, %v9767_v25  ;;  %v6258_v6 = vmul.f32 %v5803_v34, %v5803_v34 }
 0x2d3   : > { %v6986_v47 = vpack.c.bf16 %v5801_v59, %v5801_v59  ;;  %v6185_v23 = vadd.f32 %v6184_v39, %v5801_v59  ;;  %v6256_v26 = vmul.f32 %v5801_v59, %v5801_v59  ;;  %v6318_v30 = vadd.f32 %v6317_v63, %v6255_v29 }
 0x2d4   : > { %6124 = vst.msk [vmem:[%s9872_s30 + $0x18] sm:$0xf] %vm6117_vm2, %v6988_v58  ;;  %v6989_v41 = vpack.c.bf16 %v5804_v17, %v5804_v17  ;;  %v5802_v55 = vmul.f32 %v8126_v49, %v9761_v51  ;;  %v9914_v49 = vpop.permute.xlu1 %5644 }
 0x2d5   : > { %6122 = vst.msk [vmem:[%s9872_s30 + $0x10] sm:$0xf] %vm6117_vm2, %v6986_v47  ;;  %v6319_v1 = vadd.f32 %v6318_v30, %v6256_v26  ;;  %v8063_v32 = vpop.f32.mrb[8].mxu0  ;;  %v9918_v47 = vpop.permute.xlu0 %5649 }
 0x2d6   : > { %6125 = vst.msk [vmem:[%s9872_s30 + $0x1c] sm:$0xf] %vm6117_vm2, %v6989_v41  ;;  %v6987_v25 = vpack.c.bf16 %v5802_v55, %v5802_v55  ;;  %v6186_v20 = vadd.f32 %v6185_v23, %v5802_v55  ;;  %v6257_v42 = vmul.f32 %v5802_v55, %v5802_v55  ;;  %v8127_v61 = vadd.f32 %v8063_v32, %v9783_v44  ;;  %v5126_v29 = vpop.f32.mrb[9].mxu0 }
 0x2d7   : > { %v8128_v8 = vadd.f32 %v5126_v29, %v9785_v53  ;;  %v8064_v35 = vpop.f32.mrb[10].mxu0  ;;  %v6259_v53 = vmul.f32 %v5804_v17, %v5804_v17 }
 0x2d8   : > { %6123 = vst.msk [vmem:[%s9872_s30 + $0x14] sm:$0xf] %vm6117_vm2, %v6987_v25  ;;  %v6187_v0 = vadd.f32 %v6186_v20, %v5803_v34  ;;  %v6320_v51 = vadd.f32 %v6319_v1, %v6257_v42  ;;  %v5807_v63 = vmul.f32 %v8127_v61, %v9781_v50  ;;  %v8129_v59 = vadd.f32 %v8064_v35, %v9787_v62  ;;  %v5129_v39 = vpop.f32.mrb[11].mxu0 }
 0x2d9   : > { %v5805_v44 = vmul.f32 %v8128_v8, %v9769_v38  ;;  %v8130_v58 = vadd.f32 %v5129_v39, %v9791_v2  ;;  %v9934_v8 = vpop.permute.xlu0 %5659 }
 0x2da   : > { %v6321_v23 = vadd.f32 %v6320_v51, %v6258_v6  ;;  %v6992_v26 = vpack.c.bf16 %v5807_v63, %v5807_v63  ;;  %v6188_v34 = vadd.f32 %v6187_v0, %v5804_v17  ;;  %v5808_v50 = vmul.f32 %v8129_v59, %v9789_v56  ;;  %v9927_v56 = vpop.permute.xlu1 %5654 }
 0x2db   : > { %v6990_v30 = vpack.c.bf16 %v5805_v44, %v5805_v44  ;;  %v6260_v41 = vmul.f32 %v5805_v44, %v5805_v44  ;;  %v5806_v62 = vmul.f32 %v8130_v58, %v9779_v7  ;;  %v6262_v29 = vmul.f32 %v5807_v63, %v5807_v63 }
 0x2dc   : > { %6128 = vst.msk [vmem:[%s9872_s30 + $0x28] sm:$0xf] %vm6117_vm2, %v6992_v26  ;;  %v6189_v55 = vadd.f32 %v6188_v34, %v5805_v44  ;;  %v6322_v38 = vadd.f32 %v6321_v23, %v6259_v53  ;;  %v6993_v2 = vpack.c.bf16 %v5808_v50, %v5808_v50  ;;  %v6263_v58 = vmul.f32 %v5808_v50, %v5808_v50 }
 0x2dd   : > { %6126 = vst.msk [vmem:[%s9872_s30 + $0x20] sm:$0xf] %vm6117_vm2, %v6990_v30  ;;  %v6991_v1 = vpack.c.bf16 %v5806_v62, %v5806_v62  ;;  %v6261_v32 = vmul.f32 %v5806_v62, %v5806_v62  ;;  %v8067_v25 = vpop.f32.mrb[12].mxu0 }
 0x2de   : > { %v6323_v20 = vadd.f32 %v6322_v38, %v6260_v41  ;;  %v6190_v17 = vadd.f32 %v6189_v55, %v5806_v62  ;;  %v8131_v42 = vadd.f32 %v8067_v25, %v9795_v10  ;;  %v5142_v61 = vpop.f32.mrb[13].mxu0  ;;  %6129 = vst.msk [vmem:[%s9872_s30 + $0x2c] sm:$0xf] %vm6117_vm2, %v6993_v2  ;;  %v9944_v41 = vpop.permute.xlu1 %5664 }
 0x2df   : > { %6127 = vst.msk [vmem:[%s9872_s30 + $0x24] sm:$0xf] %vm6117_vm2, %v6991_v1  ;;  %v8132_v7 = vadd.f32 %v5142_v61, %v9799_v13  ;;  %v8068_v6 = vpop.f32.mrb[14].mxu0  ;;  %v9948_v55 = vpop.permute.xlu0 %5669 }
 0x2e0   : > { %v6191_v35 = vadd.f32 %v6190_v17, %v5807_v63  ;;  %v6324_v0 = vadd.f32 %v6323_v20, %v6261_v32  ;;  %v5811_v51 = vmul.f32 %v8131_v42, %v9801_v21  ;;  %v8133_v10 = vadd.f32 %v8068_v6, %v9803_v28  ;;  %v5145_v59 = vpop.f32.mrb[15].mxu0 }
 0x2e1   : > { %v5809_v39 = vmul.f32 %v8132_v7, %v9793_v5  ;;  %v8134_v44 = vadd.f32 %v5145_v59, %v9805_v11 }
 0x2e2   : > { %v6325_v53 = vadd.f32 %v6324_v0, %v6262_v29  ;;  %v6996_v23 = vpack.c.bf16 %v5811_v51, %v5811_v51  ;;  %v6192_v13 = vadd.f32 %v6191_v35, %v5808_v50  ;;  %v5812_v30 = vmul.f32 %v8133_v10, %v9807_v16  ;;  %v9960_v59 = vpop.permute.xlu1 %5674 }
 0x2e3   : > { %v6994_v26 = vpack.c.bf16 %v5809_v39, %v5809_v39  ;;  %v6264_v34 = vmul.f32 %v5809_v39, %v5809_v39  ;;  %v5810_v63 = vmul.f32 %v8134_v44, %v9797_v9  ;;  %v6266_v1 = vmul.f32 %v5811_v51, %v5811_v51 }
 0x2e4   : > { %6132 = vst.msk [vmem:[%s9872_s30 + $0x38] sm:$0xf] %vm6117_vm2, %v6996_v23  ;;  %v6193_v21 = vadd.f32 %v6192_v13, %v5809_v39  ;;  %v6326_v28 = vadd.f32 %v6325_v53, %v6263_v58  ;;  %v6997_v5 = vpack.c.bf16 %v5812_v30, %v5812_v30  ;;  %v6267_v6 = vmul.f32 %v5812_v30, %v5812_v30 }
 0x2e5   : > { %6130 = vst.msk [vmem:[%s9872_s30 + $0x30] sm:$0xf] %vm6117_vm2, %v6994_v26  ;;  %v6995_v11 = vpack.c.bf16 %v5810_v63, %v5810_v63  ;;  %v6265_v62 = vmul.f32 %v5810_v63, %v5810_v63  ;;  %v8071_v50 = vpop.f32.mrb[16].mxu0 }
 0x2e6   : > { %v6327_v38 = vadd.f32 %v6326_v28, %v6264_v34  ;;  %v6194_v16 = vadd.f32 %v6193_v21, %v5810_v63  ;;  %v8135_v9 = vadd.f32 %v8071_v50, %v9811_v54  ;;  %v5158_v2 = vpop.f32.mrb[17].mxu0  ;;  %6133 = vst.msk [vmem:[%s9872_s30 + $0x3c] sm:$0xf] %vm6117_vm2, %v6997_v5  ;;  %v9978_v50 = vpop.permute.xlu1 %5684 }
 0x2e7   : > { %6131 = vst.msk [vmem:[%s9872_s30 + $0x34] sm:$0xf] %vm6117_vm2, %v6995_v11  ;;  %v8136_v32 = vadd.f32 %v5158_v2, %v9813_v15  ;;  %v8072_v25 = vpop.f32.mrb[18].mxu0 }
 0x2e8   : > { %v6195_v20 = vadd.f32 %v6194_v16, %v5811_v51  ;;  %v6328_v17 = vadd.f32 %v6327_v38, %v6265_v62  ;;  %v5815_v42 = vmul.f32 %v8135_v9, %v9821_v33  ;;  %v8137_v61 = vadd.f32 %v8072_v25, %v9815_v24  ;;  %v5161_v29 = vpop.f32.mrb[19].mxu0  ;;  %v9964_v24 = vpop.permute.xlu0 %5679 }
 0x2e9   : > { %v5813_v54 = vmul.f32 %v8136_v32, %v9809_v19  ;;  %v8138_v7 = vadd.f32 %v5161_v29, %v9817_v12 }
 0x2ea   : > { %v6329_v35 = vadd.f32 %v6328_v17, %v6266_v1  ;;  %v7000_v0 = vpack.c.bf16 %v5815_v42, %v5815_v42  ;;  %v6196_v10 = vadd.f32 %v6195_v20, %v5812_v30  ;;  %v5816_v39 = vmul.f32 %v8137_v61, %v9829_v31 }
 0x2eb   : > { %v6998_v15 = vpack.c.bf16 %v5813_v54, %v5813_v54  ;;  %v6268_v51 = vmul.f32 %v5813_v54, %v5813_v54  ;;  %v5814_v33 = vmul.f32 %v8138_v7, %v9819_v60  ;;  %v6270_v30 = vmul.f32 %v5815_v42, %v5815_v42 }
 0x2ec   : > { %6136 = vst.msk [vmem:[%s9872_s30 + $0x48] sm:$0xf] %vm6117_vm2, %v7000_v0  ;;  %v6197_v19 = vadd.f32 %v6196_v10, %v5813_v54  ;;  %v6330_v12 = vadd.f32 %v6329_v35, %v6267_v6  ;;  %v7001_v44 = vpack.c.bf16 %v5816_v39, %v5816_v39  ;;  %v9982_v16 = vpop.permute.xlu0 %5689  ;;  %v6271_v9 = vmul.f32 %v5816_v39, %v5816_v39 }
 0x2ed   : > { %6134 = vst.msk [vmem:[%s9872_s30 + $0x40] sm:$0xf] %vm6117_vm2, %v6998_v15  ;;  %v6999_v58 = vpack.c.bf16 %v5814_v33, %v5814_v33  ;;  %v6269_v53 = vmul.f32 %v5814_v33, %v5814_v33  ;;  %v8075_v23 = vpop.f32.mrb[20].mxu0 }
 0x2ee   : > { %v6331_v13 = vadd.f32 %v6330_v12, %v6268_v51  ;;  %v6198_v26 = vadd.f32 %v6197_v19, %v5814_v33  ;;  %v8139_v31 = vadd.f32 %v8075_v23, %v9823_v4  ;;  %v5174_v34 = vpop.f32.mrb[21].mxu0  ;;  %6137 = vst.msk [vmem:[%s9872_s30 + $0x4c] sm:$0xf] %vm6117_vm2, %v7001_v44  ;;  %v10258_v19 = vld [vmem:[#allocation10_spill] sm:$0xff]  ;;  %v10259_v44 = vld [vmem:[#allocation9_spill] sm:$0xff] }
 0x2ef   : > { %6135 = vst.msk [vmem:[%s9872_s30 + $0x44] sm:$0xf] %vm6117_vm2, %v6999_v58  ;;  %v8140_v60 = vadd.f32 %v5174_v34, %v9825_v14  ;;  %v8076_v63 = vpop.f32.mrb[22].mxu0 }
 0x2f0   : > { %v6199_v21 = vadd.f32 %v6198_v26, %v5815_v42  ;;  %v6332_v28 = vadd.f32 %v6331_v13, %v6269_v53  ;;  %v5819_v5 = vmul.f32 %v8139_v31, %v9841_v52  ;;  %v8141_v11 = vadd.f32 %v8076_v63, %v9827_v36  ;;  %v5177_v62 = vpop.f32.mrb[23].mxu0  ;;  %v9998_v10 = vpop.permute.xlu0 %5699 }
 0x2f1   : > { %v5817_v4 = vmul.f32 %v8140_v60, %v9833_v27  ;;  %v8142_v38 = vadd.f32 %v5177_v62, %v9831_v43 }
 0x2f2   : > { %v6333_v14 = vadd.f32 %v6332_v28, %v6270_v30  ;;  %v7004_v2 = vpack.c.bf16 %v5819_v5, %v5819_v5  ;;  %v6200_v1 = vadd.f32 %v6199_v21, %v5816_v39  ;;  %v5820_v52 = vmul.f32 %v8141_v11, %v9847_v37  ;;  %v9991_v37 = vpop.permute.xlu1 %5694  ;;  %v10260_v30 = vld [vmem:[#allocation15_spill] sm:$0xff] }
 0x2f3   : > { %v7002_v32 = vpack.c.bf16 %v5817_v4, %v5817_v4  ;;  %v6272_v25 = vmul.f32 %v5817_v4, %v5817_v4  ;;  %v5818_v36 = vmul.f32 %v8142_v38, %v9837_v48  ;;  %v6274_v35 = vmul.f32 %v5819_v5, %v5819_v5  ;;  %v10261_v38 = vld [vmem:[#allocation11_spill] sm:$0xff] }
 0x2f4   : > { %6140 = vst.msk [vmem:[%s9872_s30 + $0x58] sm:$0xf] %vm6117_vm2, %v7004_v2  ;;  %v6201_v20 = vadd.f32 %v6200_v1, %v5817_v4  ;;  %v6334_v27 = vadd.f32 %v6333_v14, %v6271_v9  ;;  %v7005_v43 = vpack.c.bf16 %v5820_v52, %v5820_v52  ;;  %v6275_v53 = vmul.f32 %v5820_v52, %v5820_v52  ;;  %v10012_v62 = vpop.permute.xlu0 %5709  ;;  %v10262_v1 = vld [vmem:[#allocation12_spill] sm:$0xff] }
 0x2f5   : > { %6138 = vst.msk [vmem:[%s9872_s30 + $0x50] sm:$0xf] %vm6117_vm2, %v7002_v32  ;;  %v7003_v17 = vpack.c.bf16 %v5818_v36, %v5818_v36  ;;  %v6273_v42 = vmul.f32 %v5818_v36, %v5818_v36  ;;  %v8079_v61 = vpop.f32.mrb[24].mxu0 }
 0x2f6   : > { %v6335_v29 = vadd.f32 %v6334_v27, %v6272_v25  ;;  %v6202_v54 = vadd.f32 %v6201_v20, %v5818_v36  ;;  %v8143_v7 = vadd.f32 %v8079_v61, %v9835_v40  ;;  %v5190_v6 = vpop.f32.mrb[25].mxu0  ;;  %6141 = vst.msk [vmem:[%s9872_s30 + $0x5c] sm:$0xf] %vm6117_vm2, %v7005_v43  ;;  %v10008_v63 = vpop.permute.xlu1 %5704  ;;  %v10263_v20 = vld [vmem:[#allocation18_spill] sm:$0xff]  ;;  %v10264_v43 = vld [vmem:[#allocation13_spill] sm:$0xff]  ;;  %v10265_v61 = vld [vmem:[#allocation16_spill] sm:$0xff] }
 0x2f7   : > { %6139 = vst.msk [vmem:[%s9872_s30 + $0x54] sm:$0xf] %vm6117_vm2, %v7003_v17  ;;  %v8144_v48 = vadd.f32 %v5190_v6, %v9839_v3  ;;  %v8080_v0 = vpop.f32.mrb[26].mxu0 }
 0x2f8   : > { %v6203_v15 = vadd.f32 %v6202_v54, %v5819_v5  ;;  %v6336_v51 = vadd.f32 %v6335_v29, %v6273_v42  ;;  %v5823_v39 = vmul.f32 %v8143_v7, %v9861_v45  ;;  %v8145_v40 = vadd.f32 %v8080_v0, %v9843_v18  ;;  %v5193_v33 = vpop.f32.mrb[27].mxu0  ;;  %v10266_v54 = vld [vmem:[#allocation14_spill] sm:$0xff] }
 0x2f9   : > { %v5821_v12 = vmul.f32 %v8144_v48, %v10258_v19  ;;  %v8146_v58 = vadd.f32 %v5193_v33, %v10259_v44  ;;  %v10267_v33 = vld [vmem:[#allocation17_spill] sm:$0xff] }
 0x2fa   : > { %v6337_v23 = vadd.f32 %v6336_v51, %v6274_v35  ;;  %v7008_v13 = vpack.c.bf16 %v5823_v39, %v5823_v39  ;;  %v6204_v3 = vadd.f32 %v6203_v15, %v5820_v52  ;;  %v5824_v34 = vmul.f32 %v8145_v40, %v9864_v46  ;;  %v10024_v15 = vpop.permute.xlu1 %5714 }
 0x2fb   : > { %v7006_v26 = vpack.c.bf16 %v5821_v12, %v5821_v12  ;;  %v6276_v31 = vmul.f32 %v5821_v12, %v5821_v12  ;;  %v5822_v60 = vmul.f32 %v8146_v58, %v10260_v30  ;;  %v6278_v2 = vmul.f32 %v5823_v39, %v5823_v39 }
 0x2fc   : > { %6144 = vst.msk [vmem:[%s9872_s30 + $0x68] sm:$0xf] %vm6117_vm2, %v7008_v13  ;;  %v6205_v18 = vadd.f32 %v6204_v3, %v5821_v12  ;;  %v6338_v45 = vadd.f32 %v6337_v23, %v6275_v53  ;;  %v7009_v21 = vpack.c.bf16 %v5824_v34, %v5824_v34  ;;  %v6279_v6 = vmul.f32 %v5824_v34, %v5824_v34  ;;  %v10028_v12 = vpop.permute.xlu0 %5719 }
 0x2fd   : > { %6142 = vst.msk [vmem:[%s9872_s30 + $0x60] sm:$0xf] %vm6117_vm2, %v7006_v26  ;;  %v7007_v28 = vpack.c.bf16 %v5822_v60, %v5822_v60  ;;  %v6277_v5 = vmul.f32 %v5822_v60, %v5822_v60  ;;  %v8083_v11 = vpop.f32.mrb[28].mxu0 }
 0x2fe   : > { %v6339_v4 = vadd.f32 %v6338_v45, %v6276_v31  ;;  %v6206_v46 = vadd.f32 %v6205_v18, %v5822_v60  ;;  %v8147_v9 = vadd.f32 %v8083_v11, %v10261_v38  ;;  %v5206_v14 = vpop.f32.mrb[29].mxu0  ;;  %6145 = vst.msk [vmem:[%s9872_s30 + $0x6c] sm:$0xf] %vm6117_vm2, %v7009_v21 }
 0x2ff   : > { %6143 = vst.msk [vmem:[%s9872_s30 + $0x64] sm:$0xf] %vm6117_vm2, %v7007_v28  ;;  %v8148_v32 = vadd.f32 %v5206_v14, %v10262_v1  ;;  %v8084_v25 = vpop.f32.mrb[30].mxu0 }
 0x300   : > { %v6207_v52 = vadd.f32 %v6206_v46, %v5823_v39  ;;  %v6340_v36 = vadd.f32 %v6339_v4, %v6277_v5  ;;  %v5827_v27 = vmul.f32 %v8147_v9, %v10263_v20  ;;  %v8149_v17 = vadd.f32 %v8084_v25, %v10264_v43  ;;  %v5209_v42 = vpop.f32.mrb[31].mxu0 }
 0x301   : > { %v5825_v29 = vmul.f32 %v8148_v32, %v10265_v61  ;;  %v8150_v7 = vadd.f32 %v5209_v42, %v10266_v54  ;;  %v10044_v42 = vpop.permute.xlu0 %5729 }
 0x302   : > { %v6341_v35 = vadd.f32 %v6340_v36, %v6278_v2  ;;  %v7012_v48 = vpack.c.bf16 %v5827_v27, %v5827_v27  ;;  %v6208_v0 = vadd.f32 %v6207_v52, %v5824_v34  ;;  %v5828_v40 = vmul.f32 %v8149_v17, %v9897_v22  ;;  %v10040_v36 = vpop.permute.xlu1 %5724 }
 0x303   : > { %v7010_v51 = vpack.c.bf16 %v5825_v29, %v5825_v29  ;;  %v6280_v39 = vmul.f32 %v5825_v29, %v5825_v29  ;;  %v5826_v19 = vmul.f32 %v8150_v7, %v10267_v33  ;;  %v7823_v53 = vpop.f32.mrb[32].mxu1  ;;  %v6282_v45 = vmul.f32 %v5827_v27, %v5827_v27 }
 0x304   : > { %6148 = vst.msk [vmem:[%s9872_s30 + $0x78] sm:$0xf] %vm6117_vm2, %v7012_v48  ;;  %v6209_v44 = vadd.f32 %v6208_v0, %v5825_v29  ;;  %v6342_v58 = vadd.f32 %v6341_v35, %v6279_v6  ;;  %v7013_v23 = vpack.c.bf16 %v5828_v40, %v5828_v40  ;;  %v3022_v31 = vpop.f32.mrb[33].mxu1  ;;  %v6283_v1 = vmul.f32 %v5828_v40, %v5828_v40 }
 0x305   : > { %6146 = vst.msk [vmem:[%s9872_s30 + $0x70] sm:$0xf] %vm6117_vm2, %v7010_v51  ;;  %v7011_v13 = vpack.c.bf16 %v5826_v19, %v5826_v19  ;;  %v6281_v3 = vmul.f32 %v5826_v19, %v5826_v19  ;;  %v8087_v26 = vpop.f32.mrb[32].mxu0  ;;  %v7824_v18 = vpop.f32.mrb[34].mxu1 }
 0x306   : > { %v6343_v34 = vadd.f32 %v6342_v58, %v6280_v39  ;;  %v6210_v22 = vadd.f32 %v6209_v44, %v5826_v19  ;;  %v8151_v30 = vadd.f32 %v8087_v26, %v7823_v53  ;;  %v5222_v60 = vpop.f32.mrb[33].mxu0  ;;  %6149 = vst.msk [vmem:[%s9872_s30 + $0x7c] sm:$0xf] %vm6117_vm2, %v7013_v23  ;;  %v3025_v5 = vpop.f32.mrb[35].mxu1 }
 0x307   : > { %6147 = vst.msk [vmem:[%s9872_s30 + $0x74] sm:$0xf] %vm6117_vm2, %v7011_v13  ;;  %v8152_v21 = vadd.f32 %v5222_v60, %v3022_v31  ;;  %v8088_v28 = vpop.f32.mrb[34].mxu0  ;;  %v10056_v60 = vpop.permute.xlu1 %5734 }
 0x308   : > { %v6211_v11 = vadd.f32 %v6210_v22, %v5827_v27  ;;  %v6344_v4 = vadd.f32 %v6343_v34, %v6281_v3  ;;  %v5831_v46 = vmul.f32 %v8151_v30, %v9918_v47  ;;  %v8153_v38 = vadd.f32 %v8088_v28, %v7824_v18  ;;  %v5225_v9 = vpop.f32.mrb[35].mxu0 }
 0x309   : > { %v5829_v14 = vmul.f32 %v8152_v21, %v9899_v57  ;;  %v8154_v2 = vadd.f32 %v5225_v9, %v3025_v5  ;;  %v10060_v5 = vpop.permute.xlu0 %5739 }
 0x30a   : > { %v6345_v32 = vadd.f32 %v6344_v4, %v6282_v45  ;;  %v7016_v25 = vpack.c.bf16 %v5831_v46, %v5831_v46  ;;  %v6212_v52 = vadd.f32 %v6211_v11, %v5828_v40  ;;  %v5832_v27 = vmul.f32 %v8153_v38, %v9927_v56 }
 0x30b   : > { %v7014_v20 = vpack.c.bf16 %v5829_v14, %v5829_v14  ;;  %v6284_v43 = vmul.f32 %v5829_v14, %v5829_v14  ;;  %v5830_v17 = vmul.f32 %v8154_v2, %v9914_v49  ;;  %v7827_v61 = vpop.f32.mrb[36].mxu1  ;;  %v6286_v39 = vmul.f32 %v5831_v46, %v5831_v46 }
 0x30c   : > { %6152 = vst.msk [vmem:[%s9872_s30 + $0x88] sm:$0xf] %vm6117_vm2, %v7016_v25  ;;  %v6213_v57 = vadd.f32 %v6212_v52, %v5829_v14  ;;  %v6346_v47 = vadd.f32 %v6345_v32, %v6283_v1  ;;  %v7017_v29 = vpack.c.bf16 %v5832_v27, %v5832_v27  ;;  %v3038_v35 = vpop.f32.mrb[37].mxu1  ;;  %v6287_v31 = vmul.f32 %v5832_v27, %v5832_v27 }
 0x30d   : > { %6150 = vst.msk [vmem:[%s9872_s30 + $0x80] sm:$0xf] %vm6117_vm2, %v7014_v20  ;;  %v7015_v54 = vpack.c.bf16 %v5830_v17, %v5830_v17  ;;  %v6285_v7 = vmul.f32 %v5830_v17, %v5830_v17  ;;  %v8091_v6 = vpop.f32.mrb[36].mxu0  ;;  %v7828_v51 = vpop.f32.mrb[38].mxu1 }
 0x30e   : > { %v6347_v48 = vadd.f32 %v6346_v47, %v6284_v43  ;;  %v6214_v56 = vadd.f32 %v6213_v57, %v5830_v17  ;;  %v8155_v0 = vadd.f32 %v8091_v6, %v7827_v61  ;;  %v5238_v49 = vpop.f32.mrb[37].mxu0  ;;  %6153 = vst.msk [vmem:[%s9872_s30 + $0x8c] sm:$0xf] %vm6117_vm2, %v7017_v29  ;;  %v3041_v19 = vpop.f32.mrb[39].mxu1 }
 0x30f   : > { %6151 = vst.msk [vmem:[%s9872_s30 + $0x84] sm:$0xf] %vm6117_vm2, %v7015_v54  ;;  %v8156_v40 = vadd.f32 %v5238_v49, %v3038_v35  ;;  %v8092_v33 = vpop.f32.mrb[38].mxu0 }
 0x310   : > { %v6215_v44 = vadd.f32 %v6214_v56, %v5831_v46  ;;  %v6348_v58 = vadd.f32 %v6347_v48, %v6285_v7  ;;  %v5835_v53 = vmul.f32 %v8155_v0, %v9948_v55  ;;  %v8157_v23 = vadd.f32 %v8092_v33, %v7828_v51  ;;  %v5241_v13 = vpop.f32.mrb[39].mxu0  ;;  %v10072_v56 = vpop.permute.xlu1 %5744 }
 0x311   : > { %v5833_v3 = vmul.f32 %v8156_v40, %v9934_v8  ;;  %v8158_v26 = vadd.f32 %v5241_v13, %v3041_v19  ;;  %v10076_v40 = vpop.permute.xlu0 %5749 }
 0x312   : > { %v6349_v34 = vadd.f32 %v6348_v58, %v6286_v39  ;;  %v7020_v22 = vpack.c.bf16 %v5835_v53, %v5835_v53  ;;  %v6216_v30 = vadd.f32 %v6215_v44, %v5832_v27  ;;  %v5836_v21 = vmul.f32 %v8157_v23, %v9960_v59 }
 0x313   : > { %v7018_v18 = vpack.c.bf16 %v5833_v3, %v5833_v3  ;;  %v6288_v45 = vmul.f32 %v5833_v3, %v5833_v3  ;;  %v5834_v28 = vmul.f32 %v8158_v26, %v9944_v41  ;;  %v7831_v11 = vpop.f32.mrb[40].mxu1  ;;  %v6290_v25 = vmul.f32 %v5835_v53, %v5835_v53 }
 0x314   : > { %6156 = vst.msk [vmem:[%s9872_s30 + $0x98] sm:$0xf] %vm6117_vm2, %v7020_v22  ;;  %v6217_v8 = vadd.f32 %v6216_v30, %v5833_v3  ;;  %v6350_v55 = vadd.f32 %v6349_v34, %v6287_v31  ;;  %v7021_v4 = vpack.c.bf16 %v5836_v21, %v5836_v21  ;;  %v3054_v14 = vpop.f32.mrb[41].mxu1  ;;  %v6291_v7 = vmul.f32 %v5836_v21, %v5836_v21 }
 0x315   : > { %6154 = vst.msk [vmem:[%s9872_s30 + $0x90] sm:$0xf] %vm6117_vm2, %v7018_v18  ;;  %v7019_v46 = vpack.c.bf16 %v5834_v28, %v5834_v28  ;;  %v6289_v38 = vmul.f32 %v5834_v28, %v5834_v28  ;;  %v8095_v9 = vpop.f32.mrb[40].mxu0  ;;  %v7832_v32 = vpop.f32.mrb[42].mxu1 }
 0x316   : > { %v6351_v2 = vadd.f32 %v6350_v55, %v6288_v45  ;;  %v6218_v59 = vadd.f32 %v6217_v8, %v5834_v28  ;;  %v8159_v1 = vadd.f32 %v8095_v9, %v7831_v11  ;;  %v5254_v41 = vpop.f32.mrb[41].mxu0  ;;  %6157 = vst.msk [vmem:[%s9872_s30 + $0x9c] sm:$0xf] %vm6117_vm2, %v7021_v4  ;;  %v3057_v43 = vpop.f32.mrb[43].mxu1 }
 0x317   : > { %6155 = vst.msk [vmem:[%s9872_s30 + $0x94] sm:$0xf] %vm6117_vm2, %v7019_v46  ;;  %v8160_v52 = vadd.f32 %v5254_v41, %v3054_v14  ;;  %v8096_v20 = vpop.f32.mrb[42].mxu0  ;;  %v10088_v14 = vpop.permute.xlu1 %5754 }
 0x318   : > { %v6219_v27 = vadd.f32 %v6218_v59, %v5835_v53  ;;  %v6352_v17 = vadd.f32 %v6351_v2, %v6289_v38  ;;  %v5839_v57 = vmul.f32 %v8159_v1, %v9982_v16  ;;  %v8161_v47 = vadd.f32 %v8096_v20, %v7832_v32  ;;  %v5257_v61 = vpop.f32.mrb[43].mxu0  ;;  %v10092_v32 = vpop.permute.xlu0 %5759 }
 0x319   : > { %v5837_v29 = vmul.f32 %v8160_v52, %v9964_v24  ;;  %v8162_v54 = vadd.f32 %v5257_v61, %v3057_v43 }
 0x31a   : > { %v6353_v6 = vadd.f32 %v6352_v17, %v6290_v25  ;;  %v7024_v35 = vpack.c.bf16 %v5839_v57, %v5839_v57  ;;  %v6220_v48 = vadd.f32 %v6219_v27, %v5836_v21  ;;  %v5840_v51 = vmul.f32 %v8161_v47, %v9991_v37 }
 0x31b   : > { %v7022_v0 = vpack.c.bf16 %v5837_v29, %v5837_v29  ;;  %v6292_v49 = vmul.f32 %v5837_v29, %v5837_v29  ;;  %v5838_v39 = vmul.f32 %v8162_v54, %v9978_v50  ;;  %v7835_v33 = vpop.f32.mrb[44].mxu1  ;;  %v6294_v31 = vmul.f32 %v5839_v57, %v5839_v57 }
 0x31c   : > { %6160 = vst.msk [vmem:[%s9872_s30 + $0xa8] sm:$0xf] %vm6117_vm2, %v7024_v35  ;;  %v6221_v24 = vadd.f32 %v6220_v48, %v5837_v29  ;;  %v6354_v16 = vadd.f32 %v6353_v6, %v6291_v7  ;;  %v7025_v19 = vpack.c.bf16 %v5840_v51, %v5840_v51  ;;  %v3070_v23 = vpop.f32.mrb[45].mxu1  ;;  %v6295_v4 = vmul.f32 %v5840_v51, %v5840_v51 }
 0x31d   : > { %6158 = vst.msk [vmem:[%s9872_s30 + $0xa0] sm:$0xf] %vm6117_vm2, %v7022_v0  ;;  %v7023_v44 = vpack.c.bf16 %v5838_v39, %v5838_v39  ;;  %v6293_v58 = vmul.f32 %v5838_v39, %v5838_v39  ;;  %v8099_v53 = vpop.f32.mrb[44].mxu0  ;;  %v7836_v26 = vpop.f32.mrb[46].mxu1 }
 0x31e   : > { %v6355_v13 = vadd.f32 %v6354_v16, %v6292_v49  ;;  %v6222_v37 = vadd.f32 %v6221_v24, %v5838_v39  ;;  %v8163_v3 = vadd.f32 %v8099_v53, %v7835_v33  ;;  %v5270_v50 = vpop.f32.mrb[45].mxu0  ;;  %6161 = vst.msk [vmem:[%s9872_s30 + $0xac] sm:$0xf] %vm6117_vm2, %v7025_v19  ;;  %v3073_v30 = vpop.f32.mrb[47].mxu1 }
 0x31f   : > { %6159 = vst.msk [vmem:[%s9872_s30 + $0xa4] sm:$0xf] %vm6117_vm2, %v7023_v44  ;;  %v8164_v34 = vadd.f32 %v5270_v50, %v3070_v23  ;;  %v8100_v22 = vpop.f32.mrb[46].mxu0 }
 0x320   : > { %v6223_v18 = vadd.f32 %v6222_v37, %v5839_v57  ;;  %v6356_v45 = vadd.f32 %v6355_v13, %v6293_v58  ;;  %v5843_v21 = vmul.f32 %v8163_v3, %v10012_v62  ;;  %v8165_v28 = vadd.f32 %v8100_v22, %v7836_v26  ;;  %v5273_v8 = vpop.f32.mrb[47].mxu0  ;;  %v10104_v58 = vpop.permute.xlu1 %5764 }
 0x321   : > { %v5841_v55 = vmul.f32 %v8164_v34, %v9998_v10  ;;  %v8166_v11 = vadd.f32 %v5273_v8, %v3073_v30  ;;  %v5770_v3 = vpop.permute.xlu0 %5769 }
 0x322   : > { %v6357_v46 = vadd.f32 %v6356_v45, %v6294_v31  ;;  %v7028_v38 = vpack.c.bf16 %v5843_v21, %v5843_v21  ;;  %v6224_v9 = vadd.f32 %v6223_v18, %v5840_v51  ;;  %v5844_v1 = vmul.f32 %v8165_v28, %v10024_v15 }
 0x323   : > { %v7026_v2 = vpack.c.bf16 %v5841_v55, %v5841_v55  ;;  %v6296_v59 = vmul.f32 %v5841_v55, %v5841_v55  ;;  %v5842_v41 = vmul.f32 %v8166_v11, %v10008_v63  ;;  %v7839_v25 = vpop.f32.mrb[48].mxu1  ;;  %v6298_v29 = vmul.f32 %v5843_v21, %v5843_v21 }
 0x324   : > { %6164 = vst.msk [vmem:[%s9872_s30 + $0xb8] sm:$0xf] %vm6117_vm2, %v7028_v38  ;;  %v6225_v10 = vadd.f32 %v6224_v9, %v5841_v55  ;;  %v6358_v62 = vadd.f32 %v6357_v46, %v6295_v4  ;;  %v7029_v52 = vpack.c.bf16 %v5844_v1, %v5844_v1  ;;  %v3086_v17 = vpop.f32.mrb[49].mxu1  ;;  %v6299_v16 = vmul.f32 %v5844_v1, %v5844_v1 }
 0x325   : > { %6162 = vst.msk [vmem:[%s9872_s30 + $0xb0] sm:$0xf] %vm6117_vm2, %v7026_v2  ;;  %v7027_v20 = vpack.c.bf16 %v5842_v41, %v5842_v41  ;;  %v6297_v43 = vmul.f32 %v5842_v41, %v5842_v41  ;;  %v8103_v27 = vpop.f32.mrb[48].mxu0  ;;  %v7840_v61 = vpop.f32.mrb[50].mxu1 }
 0x326   : > { %v6359_v57 = vadd.f32 %v6358_v62, %v6296_v59  ;;  %v6226_v15 = vadd.f32 %v6225_v10, %v5842_v41  ;;  %v8167_v47 = vadd.f32 %v8103_v27, %v7839_v25  ;;  %v5286_v63 = vpop.f32.mrb[49].mxu0  ;;  %6165 = vst.msk [vmem:[%s9872_s30 + $0xbc] sm:$0xf] %vm6117_vm2, %v7029_v52  ;;  %v3089_v6 = vpop.f32.mrb[51].mxu1 }
 0x327   : > { %6163 = vst.msk [vmem:[%s9872_s30 + $0xb4] sm:$0xf] %vm6117_vm2, %v7027_v20  ;;  %v8168_v54 = vadd.f32 %v5286_v63, %v3086_v17  ;;  %v8104_v7 = vpop.f32.mrb[50].mxu0  ;;  %v5775_v52 = vpop.permute.xlu1 %5774 }
 0x328   : > { %v6227_v35 = vadd.f32 %v6226_v15, %v5843_v21  ;;  %v6360_v48 = vadd.f32 %v6359_v57, %v6297_v43  ;;  %v5847_v0 = vmul.f32 %v8167_v47, %v10044_v42  ;;  %v8169_v49 = vadd.f32 %v8104_v7, %v7840_v61  ;;  %v5289_v51 = vpop.f32.mrb[51].mxu0  ;;  %v10120_v57 = vpop.permute.xlu0 %5779 }
 0x329   : > { %v5845_v39 = vmul.f32 %v8168_v54, %v10028_v12  ;;  %v8170_v24 = vadd.f32 %v5289_v51, %v3089_v6 }
 0x32a   : > { %v6361_v33 = vadd.f32 %v6360_v48, %v6298_v29  ;;  %v7032_v19 = vpack.c.bf16 %v5847_v0, %v5847_v0  ;;  %v6228_v44 = vadd.f32 %v6227_v35, %v5844_v1  ;;  %v5848_v13 = vmul.f32 %v8169_v49, %v10056_v60 }
 0x32b   : > { %v7030_v53 = vpack.c.bf16 %v5845_v39, %v5845_v39  ;;  %v6300_v23 = vmul.f32 %v5845_v39, %v5845_v39  ;;  %v5846_v37 = vmul.f32 %v8170_v24, %v10040_v36  ;;  %v7843_v50 = vpop.f32.mrb[52].mxu1  ;;  %v6302_v28 = vmul.f32 %v5847_v0, %v5847_v0 }
 0x32c   : > { %6168 = vst.msk [vmem:[%s9872_s30 + $0xc8] sm:$0xf] %vm6117_vm2, %v7032_v19  ;;  %v6229_v42 = vadd.f32 %v6228_v44, %v5845_v39  ;;  %v6362_v12 = vadd.f32 %v6361_v33, %v6299_v16  ;;  %v7033_v26 = vpack.c.bf16 %v5848_v13, %v5848_v13  ;;  %v3102_v30 = vpop.f32.mrb[53].mxu1  ;;  %v6303_v41 = vmul.f32 %v5848_v13, %v5848_v13 }
 0x32d   : > { %6166 = vst.msk [vmem:[%s9872_s30 + $0xc0] sm:$0xf] %vm6117_vm2, %v7030_v53  ;;  %v7031_v31 = vpack.c.bf16 %v5846_v37, %v5846_v37  ;;  %v6301_v34 = vmul.f32 %v5846_v37, %v5846_v37  ;;  %v8107_v22 = vpop.f32.mrb[52].mxu0  ;;  %v7844_v36 = vpop.f32.mrb[54].mxu1 }
 0x32e   : > { %v6363_v18 = vadd.f32 %v6362_v12, %v6300_v23  ;;  %v6230_v45 = vadd.f32 %v6229_v42, %v5846_v37  ;;  %v8171_v60 = vadd.f32 %v8107_v22, %v7843_v50  ;;  %v5302_v21 = vpop.f32.mrb[53].mxu0  ;;  %6169 = vst.msk [vmem:[%s9872_s30 + $0xcc] sm:$0xf] %vm6117_vm2, %v7033_v26  ;;  %v3105_v11 = vpop.f32.mrb[55].mxu1 }
 0x32f   : > { %6167 = vst.msk [vmem:[%s9872_s30 + $0xc4] sm:$0xf] %vm6117_vm2, %v7031_v31  ;;  %v8172_v8 = vadd.f32 %v5302_v21, %v3102_v30  ;;  %v8108_v55 = vpop.f32.mrb[54].mxu0  ;;  %v5785_v12 = vpop.permute.xlu1 %5784 }
 0x330   : > { %v6231_v4 = vadd.f32 %v6230_v45, %v5847_v0  ;;  %v6364_v46 = vadd.f32 %v6363_v18, %v6301_v34  ;;  %v5851_v38 = vmul.f32 %v8171_v60, %v10076_v40  ;;  %v8173_v9 = vadd.f32 %v8108_v55, %v7844_v36  ;;  %v5305_v2 = vpop.f32.mrb[55].mxu0  ;;  %v5790_v22 = vpop.permute.xlu0 %5789 }
 0x331   : > { %v5849_v59 = vmul.f32 %v8172_v8, %v10060_v5  ;;  %v8174_v1 = vadd.f32 %v5305_v2, %v3105_v11 }
 0x332   : > { %v6365_v10 = vadd.f32 %v6364_v46, %v6302_v28  ;;  %v7036_v62 = vpack.c.bf16 %v5851_v38, %v5851_v38  ;;  %v6232_v25 = vadd.f32 %v6231_v4, %v5848_v13  ;;  %v5852_v27 = vmul.f32 %v8173_v9, %v10088_v14 }
 0x333   : > { %v7034_v20 = vpack.c.bf16 %v5849_v59, %v5849_v59  ;;  %v6304_v43 = vmul.f32 %v5849_v59, %v5849_v59  ;;  %v5850_v17 = vmul.f32 %v8174_v1, %v10072_v56  ;;  %v7847_v15 = vpop.f32.mrb[56].mxu1  ;;  %v6306_v48 = vmul.f32 %v5851_v38, %v5851_v38 }
 0x334   : > { %6172 = vst.msk [vmem:[%s9872_s30 + $0xd8] sm:$0xf] %vm6117_vm2, %v7036_v62  ;;  %v6233_v40 = vadd.f32 %v6232_v25, %v5849_v59  ;;  %v6366_v5 = vadd.f32 %v6365_v10, %v6303_v41  ;;  %v7037_v47 = vpack.c.bf16 %v5852_v27, %v5852_v27  ;;  %v3118_v54 = vpop.f32.mrb[57].mxu1  ;;  %v6307_v23 = vmul.f32 %v5852_v27, %v5852_v27 }
 0x335   : > { %6170 = vst.msk [vmem:[%s9872_s30 + $0xd0] sm:$0xf] %vm6117_vm2, %v7034_v20  ;;  %v7035_v63 = vpack.c.bf16 %v5850_v17, %v5850_v17  ;;  %v6305_v61 = vmul.f32 %v5850_v17, %v5850_v17  ;;  %v8111_v29 = vpop.f32.mrb[56].mxu0  ;;  %v7848_v35 = vpop.f32.mrb[58].mxu1 }
 0x336   : > { %v6367_v7 = vadd.f32 %v6366_v5, %v6304_v43  ;;  %v6234_v14 = vadd.f32 %v6233_v40, %v5850_v17  ;;  %v8175_v6 = vadd.f32 %v8111_v29, %v7847_v15  ;;  %v5318_v56 = vpop.f32.mrb[57].mxu0  ;;  %6173 = vst.msk [vmem:[%s9872_s30 + $0xdc] sm:$0xf] %vm6117_vm2, %v7037_v47  ;;  %v3121_v51 = vpop.f32.mrb[59].mxu1 }
 0x337   : > { %6171 = vst.msk [vmem:[%s9872_s30 + $0xd4] sm:$0xf] %vm6117_vm2, %v7035_v63  ;;  %v8176_v0 = vadd.f32 %v5318_v56, %v3118_v54  ;;  %v8112_v49 = vpop.f32.mrb[58].mxu0 }
 0x338   : > { %v6235_v39 = vadd.f32 %v6234_v14, %v5851_v38  ;;  %v6368_v24 = vadd.f32 %v6367_v7, %v6305_v61  ;;  %v5855_v16 = vmul.f32 %v8175_v6, %v5770_v3  ;;  %v8177_v33 = vadd.f32 %v8112_v49, %v7848_v35  ;;  %v5321_v19 = vpop.f32.mrb[59].mxu0 }
 0x339   : > { %v5853_v44 = vmul.f32 %v8176_v0, %v10092_v32  ;;  %v8178_v53 = vadd.f32 %v5321_v19, %v3121_v51 }
 0x33a   : > { %v6369_v13 = vadd.f32 %v6368_v24, %v6306_v48  ;;  %v7040_v37 = vpack.c.bf16 %v5855_v16, %v5855_v16  ;;  %v6236_v42 = vadd.f32 %v6235_v39, %v5852_v27  ;;  %v5856_v31 = vmul.f32 %v8177_v33, %v5775_v52  ;;  %v5795_v52 = vpop.permute.xlu1 %5794 }
 0x33b   : > { %v7038_v50 = vpack.c.bf16 %v5853_v44, %v5853_v44  ;;  %v6308_v26 = vmul.f32 %v5853_v44, %v5853_v44  ;;  %v5854_v34 = vmul.f32 %v8178_v53, %v10104_v58  ;;  %v7851_v32 = vpop.f32.mrb[60].mxu1  ;;  %v6310_v4 = vmul.f32 %v5855_v16, %v5855_v16 }
 0x33c   : > { %6176 = vst.msk [vmem:[%s9872_s30 + $0xe8] sm:$0xf] %vm6117_vm2, %v7040_v37  ;;  %v6237_v3 = vadd.f32 %v6236_v42, %v5853_v44  ;;  %v6370_v30 = vadd.f32 %v6369_v13, %v6307_v23  ;;  %v7041_v18 = vpack.c.bf16 %v5856_v31, %v5856_v31  ;;  %v3134_v36 = vpop.f32.mrb[61].mxu1  ;;  %v6311_v20 = vmul.f32 %v5856_v31, %v5856_v31 }
 0x33d   : > { %6174 = vst.msk [vmem:[%s9872_s30 + $0xe0] sm:$0xf] %vm6117_vm2, %v7038_v50  ;;  %v7039_v45 = vpack.c.bf16 %v5854_v34, %v5854_v34  ;;  %v6309_v60 = vmul.f32 %v5854_v34, %v5854_v34  ;;  %v8115_v21 = vpop.f32.mrb[60].mxu0  ;;  %v7852_v58 = vpop.f32.mrb[62].mxu1 }
 0x33e   : > { %v6371_v28 = vadd.f32 %v6370_v30, %v6308_v26  ;;  %v6238_v8 = vadd.f32 %v6237_v3, %v5854_v34  ;;  %v8179_v55 = vadd.f32 %v8115_v21, %v7851_v32  ;;  %v5334_v11 = vpop.f32.mrb[61].mxu0  ;;  %6177 = vst.msk [vmem:[%s9872_s30 + $0xec] sm:$0xf] %vm6117_vm2, %v7041_v18  ;;  %v3137_v9 = vpop.f32.mrb[63].mxu1 }
 0x33f   : > { %6175 = vst.msk [vmem:[%s9872_s30 + $0xe4] sm:$0xf] %vm6117_vm2, %v7039_v45  ;;  %v8180_v46 = vadd.f32 %v5334_v11, %v3134_v36  ;;  %v8116_v38 = vpop.f32.mrb[62].mxu0 }
 0x340   : > { %v6239_v2 = vadd.f32 %v6238_v8, %v5855_v16  ;;  %v6372_v59 = vadd.f32 %v6371_v28, %v6309_v60  ;;  %v5859_v1 = vmul.f32 %v8179_v55, %v5790_v22  ;;  %v8181_v41 = vadd.f32 %v8116_v38, %v7852_v58  ;;  %v5337_v10 = vpop.f32.mrb[63].mxu0 }
 0x341   : > { %v5857_v62 = vmul.f32 %v8180_v46, %v10120_v57  ;;  %v8182_v25 = vadd.f32 %v5337_v10, %v3137_v9 }
 0x342   : > { %v6373_v43 = vadd.f32 %v6372_v59, %v6310_v4  ;;  %v7044_v27 = vpack.c.bf16 %v5859_v1, %v5859_v1  ;;  %v6240_v17 = vadd.f32 %v6239_v2, %v5856_v31  ;;  %v5860_v15 = vmul.f32 %v8181_v41, %v5795_v52 }
 0x343   : > { %v7042_v40 = vpack.c.bf16 %v5857_v62, %v5857_v62  ;;  %v6312_v5 = vmul.f32 %v5857_v62, %v5857_v62  ;;  %v5858_v47 = vmul.f32 %v8182_v25, %v5785_v12  ;;  %v6314_v6 = vmul.f32 %v5859_v1, %v5859_v1 }
 0x344   : > { %6180 = vst.msk [vmem:[%s9872_s30 + $0xf8] sm:$0xf] %vm6117_vm2, %v7044_v27  ;;  %v6241_v63 = vadd.f32 %v6240_v17, %v5857_v62  ;;  %v6374_v61 = vadd.f32 %v6373_v43, %v6311_v20  ;;  %v7045_v57 = vpack.c.bf16 %v5860_v15, %v5860_v15  ;;  %v6315_v48 = vmul.f32 %v5860_v15, %v5860_v15 }
 0x345   : > { %6178 = vst.msk [vmem:[%s9872_s30 + $0xf0] sm:$0xf] %vm6117_vm2, %v7042_v40  ;;  %v7043_v29 = vpack.c.bf16 %v5858_v47, %v5858_v47  ;;  %v6313_v54 = vmul.f32 %v5858_v47, %v5858_v47 }
 0x346   : > { %v6375_v7 = vadd.f32 %v6374_v61, %v6312_v5  ;;  %v6242_v14 = vadd.f32 %v6241_v63, %v5858_v47  ;;  %6181 = vst.msk [vmem:[%s9872_s30 + $0xfc] sm:$0xf] %vm6117_vm2, %v7045_v57 }
 0x347   : > { %6179 = vst.msk [vmem:[%s9872_s30 + $0xf4] sm:$0xf] %vm6117_vm2, %v7043_v29  ;;  %s8818_s30 = smov [#allocation3]  }
 0x348   : > { %v6243_v56 = vadd.f32 %v6242_v14, %v5859_v1  ;;  %v6376_v35 = vadd.f32 %v6375_v7, %v6313_v54  ;;  %s8709_s16 = sshll.u32 %s8818_s30, 4  ;;  %s8710_s16 = int_to_ptr.vmem [resolvable:$false] %s8709_s16 }
 0x349   : > { %s8711_s17 = scalar_lea.vmem %s8710_s16, 32  ;;  %p8712_p3 = scmp.lt.s32.totalorder %s10162_s12, %s8710_s16 }
 0x34a   : > { %v6244_v0 = vadd.f32 %v6243_v56, %v5860_v15  ;;  %v6377_v49 = vadd.f32 %v6376_v35, %v6314_v6  ;;  %p8713_p5 = scmp.lt.s32.totalorder %s8711_s17, %s8705_s28 }
 0x34c   : > { %v6245_v51 = vrot.slane %v6244_v0, 4  ;;  %v6378_v39 = vadd.f32 %v6377_v49, %v6315_v48  ;;  %p8714_p6 = por %p8713_p5, %p8712_p3 }
 0x34e   : > { %v6246_v24 = vadd.f32 %v6245_v51, %v6244_v0  ;;  %v6379_v16 = vrot.slane %v6378_v39, 4  ;;  %p8715_p7 = pnand %p8714_p6, %p8708_p2 }
 0x350   : > { %v6247_v33 = vrot.slane %v6246_v24, 2  ;;  %v6380_v19 = vadd.f32 %v6379_v16, %v6378_v39 }
 0x352   : > { %v6248_v44 = vadd.f32 %v6247_v33, %v6246_v24  ;;  %v6381_v53 = vrot.slane %v6380_v19, 2 }
 0x354   : > { %v6249_v23 = vrot.slane %v6248_v44, 1  ;;  %v6382_v13 = vadd.f32 %v6381_v53, %v6380_v19 }
 0x356   : > { %v6250_v37 = vadd.f32 %v6249_v23, %v6248_v44  ;;  %v6383_v42 = vrot.slane %v6382_v13, 1 }
 0x358   : > { %6251 = vst [vmem:[%s331_s11] sm:$0x1] %v6250_v37  ;;  %v6384_v12 = vadd.f32 %v6383_v42, %v6382_v13 }
 0x359   : > { %8718 = shalt.err (!%p8715_p7)
}
 0x35a   : > { %s8719_s8 = scalar_lea.hbm %s10160_s18, 16  ;;  %s8723_s19 = scalar_lea.hbm %s10244_s5, 32 }
 0x35b   : > { %p8720_p9 = scmp.ne.s32.totalorder %s10160_s18, %s8719_s8  ;;  %p8724_p12 = scmp.lt.u32.totalorder %s10160_s18, %s10244_s5 }
 0x35c   : > { %p8725_p13 = scmp.lt.u32.totalorder %s8723_s19, %s8719_s8  ;;  %p8727_p1 = scmp.lt.u32.totalorder %s8719_s8, %s10160_s18 }
 0x35d   : > { %p8721_p10 = pnand %p8720_p9, %p8895_p4 }
 0x35e   : > { %p8726_p0 = por %p8725_p13, %p8724_p12 }
 0x35f   : > { %p8722_p11 = pneg %p8721_p10 }
 0x360   : > { %p8728_p2 = por %p8727_p1, %p8726_p0 }
 0x362   : > { %p8729_p3 = pnand %p8728_p2, %p8722_p11 }
 0x364   : > { %8732 = shalt.err (!%p8729_p3)
}
 0x365   : > { %8641 = dma.vmem_to_hbm [thread:$0]  (%p8895_p4), %s10162_s12, 16, %s10160_s18, %s6395_s27   ;;  %6385 = vst [vmem:[%s337_s13] sm:$0x1] %v6384_v12 }
 0x366   : > { %s6399_s28 = scalar_lea.sflag [#allocation6], %s10150_s15  ;;  %s8733_s17 = scalar_lea.vmem %s10169_s14, 16 }
 0x367   : > { %p8734_p5 = scmp.ne.s32.totalorder %s10169_s14, %s8733_s17  ;;  %s8819_s8 = smov [#allocation5]  }
 0x368   : > { %s8737_s11 = sshll.u32 %s8819_s8, 4  ;;  %s8738_s11 = int_to_ptr.vmem [resolvable:$false] %s8737_s11 }
 0x369   : > { %p8735_p6 = pnand %p8734_p5, %p8895_p4  ;;  %s8739_s24 = scalar_lea.vmem %s8738_s11, 32 }
 0x36a   : > { %p8740_p9 = scmp.lt.s32.totalorder %s10169_s14, %s8738_s11  ;;  %p8741_p10 = scmp.lt.s32.totalorder %s8739_s24, %s8733_s17 }
 0x36b   : > { %p8736_p7 = pneg %p8735_p6 }
 0x36c   : > { %p8742_p11 = por %p8741_p10, %p8740_p9 }
 0x36e   : > { %p8743_p12 = pnand %p8742_p11, %p8736_p7 }
 0x370   : > { %8746 = shalt.err (!%p8743_p12)
}
 0x371   : > { %s8747_s15 = scalar_lea.hbm %s10167_s20, 16  ;;  %s8751_s18 = scalar_lea.hbm %s10245_s6, 32 }
 0x372   : > { %p8748_p13 = scmp.ne.s32.totalorder %s10167_s20, %s8747_s15  ;;  %p8752_p2 = scmp.lt.u32.totalorder %s10167_s20, %s10245_s6 }
 0x373   : > { %p8753_p3 = scmp.lt.u32.totalorder %s8751_s18, %s8747_s15  ;;  %p8755_p6 = scmp.lt.u32.totalorder %s8747_s15, %s10167_s20 }
 0x374   : > { %p8749_p0 = pnand %p8748_p13, %p8895_p4 }
 0x375   : > { %p8754_p5 = por %p8753_p3, %p8752_p2 }
 0x376   : > { %p8750_p1 = pneg %p8749_p0 }
 0x377   : > { %p8756_p7 = por %p8755_p6, %p8754_p5 }
 0x379   : > { %p8757_p9 = pnand %p8756_p7, %p8750_p1 }
 0x37b   : > { %8760 = shalt.err (!%p8757_p9)
}
 0x37c   : > { %8642 = dma.vmem_to_hbm [thread:$0]  (%p8895_p4), %s10169_s14, 16, %s10167_s20, %s6399_s28  }
 0x37d PF: > { %p8652_p10 = scmp.ge.s32.totalorder %s8815_s26, 2  ;;  %s6453_s30 = sand.u32 1, %s8795_s21  }
 0x37e   : > { %s6454_s16 = scalar_lea.sflag [#allocation4], %s6453_s30 }
 0x37f   : > { %p8646_p11 = pnand %p8652_p10, %p8902_p8 }
 0x381   : > { %8786 = dma.done.wait (!%p8646_p11), %s6454_s16, 16  }
 0x382   : > { %8788 = vsyncadd (!%p8646_p11), %s6454_s16, 4294967280  ;;  %s6462_s17 = scalar_lea.sflag [#allocation6], %s6453_s30 }
 0x383   : > { %8790 = dma.done.wait (!%p8646_p11), %s6462_s17, 16  }
 0x384   : > { %8792 = vsyncadd (!%p8646_p11), %s6462_s17, 4294967280  ;;  %s23_s26 = sadd.s32 1, %s8815_s26   ;;  %s10268_s21 = smov %s8799_s22 }
 0x385   : > { %p20_p12 = scmp.ge.s32.totalorder %s23_s26, 4   ;;  %s10269_s22 = smov %s8803_s23 }
 0x386   : > { %s10270_s23 = smov %s8908_s10  ;;  %s10271_s24 = smov %s8811_s25 }
 0x387   : > { %s10272_s25 = smov %s10274_s29  ;;  %22 = sbr.rel (!%p20_p12) target bundleno = 6 (0x6), region = 117 }
 0x38e   :  { %6466 = vsyncpa [#allocation4], 1 }
 0x38f   :  { %6468 = vsyncpa [#allocation4 + $0x1], 1 }
 0x390   :  { %6469 = vsyncpa [#allocation6], 1 }
 0x391   :  { %6471 = vsyncpa [#allocation6 + $0x1], 1 }

</bundles_post_ra>
